<compile_context>
chip_gen: v7x
topology: tpu7x:2x2x1
jax: 0.10.0
libtpu: 0.0.40
codegen_flags: <defaults>
</compile_context>

<pallas_src>
import math

import jax
import jax.numpy as jnp
from jax.experimental import pallas as pl
from jax.experimental.pallas import tpu as pltpu

# ----------------------------- model config (small synthetic BERT) -----------------------------
VOCAB = 64
HIDDEN = 32
LAYERS = 2
HEADS = 4
HEAD_DIM = HIDDEN // HEADS
INTER = 64
MAX_POS = 16
TYPE_VOCAB = 2
LN_EPS = 1e-12


# ------------------------------------- in-kernel helpers ---------------------------------------
def _ln(x, g, b):
    mean = jnp.mean(x, axis=-1, keepdims=True)
    c = x - mean
    var = jnp.mean(c * c, axis=-1, keepdims=True)
    return c * jax.lax.rsqrt(var + LN_EPS) * g + b


def _erf(x):
    # Abramowitz & Stegun 7.1.26 rational approximation (~1.5e-7 max abs err); only exp/mul/select.
    a1, a2, a3, a4, a5 = 0.254829592, -0.284496736, 1.421413741, -1.453152027, 1.061405429
    p = 0.3275911
    ax = jnp.abs(x)
    t = 1.0 / (1.0 + p * ax)
    poly = ((((a5 * t + a4) * t + a3) * t + a2) * t + a1) * t
    y = 1.0 - poly * jnp.exp(-(ax * ax))
    return jnp.where(x >= 0.0, y, -y)


def _gelu(x):
    return 0.5 * x * (1.0 + _erf(x * 0.7071067811865476))


# ------------------------------------ fused encoder kernel -------------------------------------
def _make_bert_kernel(B, S):
    def kernel(x_ref, mask_ref,
               emb_g_ref, emb_b_ref,
               qkv_w_ref, qkv_b_ref,
               o_w_ref, o_b_ref,
               ln1_g_ref, ln1_b_ref,
               i_w_ref, i_b_ref,
               out_w_ref, out_b_ref,
               ln2_g_ref, ln2_b_ref,
               pool_w_ref, pool_b_ref,
               out_ref):
        f32 = jnp.float32
        bf16 = jnp.bfloat16
        scale = 1.0 / math.sqrt(HEAD_DIM)

        # Embedding LayerNorm (embedding gathers + sum are done outside the kernel).
        x = _ln(x_ref[...].astype(f32), emb_g_ref[...], emb_b_ref[...])            # (B*S, H) f32
        # Hoisted additive-mask broadcast (shared by every head / layer).
        add_mask = jnp.broadcast_to(mask_ref[...], (B, S, S))                      # (B, S, S) f32

        # Static unroll over layers; stacked per-layer weights stay resident in VMEM (bf16).
        for l in range(LAYERS):
            # Fused QKV: one (B*S, H) x (H, 3H) bf16 MXU pass, f32 accumulation.
            qkv = jnp.dot(x.astype(bf16), qkv_w_ref[l],
                          preferred_element_type=f32) + qkv_b_ref[l]               # (B*S, 3H) f32
            qkv16 = qkv.astype(bf16)

            # Per-head scores/context, batched over the batch dimension (3-D einsums, no k.T).
            ctx_parts = []
            for h in range(HEADS):
                lo = h * HEAD_DIM
                qh = qkv16[:, lo:lo + HEAD_DIM].reshape(B, S, HEAD_DIM)
                kh = qkv16[:, HIDDEN + lo:HIDDEN + lo + HEAD_DIM].reshape(B, S, HEAD_DIM)
                vh = qkv16[:, 2 * HIDDEN + lo:2 * HIDDEN + lo + HEAD_DIM].reshape(B, S, HEAD_DIM)

                s = jnp.einsum('bqd,bkd->bqk', qh, kh,
                               preferred_element_type=f32) * scale + add_mask      # (B, S, S)
                s = s - jnp.max(s, axis=-1, keepdims=True)
                p = jnp.exp(s)
                p = p / jnp.sum(p, axis=-1, keepdims=True)        # exact softmax (no approx recip)

                ctx = jnp.einsum('bqk,bkd->bqd', p.astype(bf16), vh,
                                 preferred_element_type=f32)                       # (B, S, D)
                ctx_parts.append(ctx.reshape(B * S, HEAD_DIM))

            # Head-merge folded into a single output-projection matmul.
            ctx_all = jnp.concatenate(ctx_parts, axis=-1).astype(bf16)             # (B*S, H)
            attn_out = jnp.dot(ctx_all, o_w_ref[l],
                               preferred_element_type=f32) + o_b_ref[l]            # (B*S, H) f32

            # Residual add fused into LayerNorm.
            x = _ln(attn_out + x, ln1_g_ref[l], ln1_b_ref[l])

            # FFN: dense -> erf-GELU -> dense; residual fused into LayerNorm.
            inter = _gelu(jnp.dot(x.astype(bf16), i_w_ref[l],
                                  preferred_element_type=f32) + i_b_ref[l])        # (B*S, INTER)
            ffn = jnp.dot(inter.astype(bf16), out_w_ref[l],
                          preferred_element_type=f32) + out_b_ref[l]               # (B*S, H)
            x = _ln(ffn + x, ln2_g_ref[l], ln2_b_ref[l])

        # Pooler: tanh(dense(hidden state of the [CLS] token of every batch element)).
        cls = jnp.concatenate([x[b * S:b * S + 1, :] for b in range(B)], axis=0)   # (B, H)
        pooled = jnp.tanh(jnp.dot(cls.astype(bf16), pool_w_ref[...],
                                  preferred_element_type=f32) + pool_b_ref[...])   # (B, H)
        out_ref[...] = pooled.astype(out_ref.dtype)

    return kernel


# ------------------------------------------ BERT forward ---------------------------------------
def init_params(key):
    keys = iter(jax.random.split(key, 64))
    nrm = lambda shape: 0.02 * jax.random.normal(next(keys), shape, jnp.float32)
    zeros = lambda shape: jnp.zeros(shape, jnp.float32)
    ones = lambda shape: jnp.ones(shape, jnp.float32)
    bf = lambda a: a.astype(jnp.bfloat16)   # matmul weights live in bf16 (MXU fast path, half DMA)

    def layer():
        q_w, k_w, v_w = nrm((HIDDEN, HIDDEN)), nrm((HIDDEN, HIDDEN)), nrm((HIDDEN, HIDDEN))
        return {
            "qkv_w": bf(jnp.concatenate([q_w, k_w, v_w], axis=1)),     # fused (H, 3H)
            "qkv_b": zeros((1, 3 * HIDDEN)),
            "o_w": bf(nrm((HIDDEN, HIDDEN))), "o_b": zeros((1, HIDDEN)),
            "ln1_g": ones((1, HIDDEN)), "ln1_b": zeros((1, HIDDEN)),
            "i_w": bf(nrm((HIDDEN, INTER))), "i_b": zeros((1, INTER)),
            "out_w": bf(nrm((INTER, HIDDEN))), "out_b": zeros((1, HIDDEN)),
            "ln2_g": ones((1, HIDDEN)), "ln2_b": zeros((1, HIDDEN)),
        }

    layers = [layer() for _ in range(LAYERS)]
    params = {k: jnp.stack([lay[k] for lay in layers], axis=0) for k in layers[0]}
    params.update({
        "word_emb": nrm((VOCAB, HIDDEN)),
        "pos_emb": nrm((MAX_POS, HIDDEN)),
        "type_emb": nrm((TYPE_VOCAB, HIDDEN)),
        "emb_ln_g": ones((1, HIDDEN)), "emb_ln_b": zeros((1, HIDDEN)),
        "pool_w": bf(nrm((HIDDEN, HIDDEN))), "pool_b": zeros((1, HIDDEN)),
    })
    return params


def bert_encoder_forward(params, input_ids, token_type_ids, attention_mask):
    """Returns the BertModel 'pooler_output': tanh(W_pool @ hidden[:, 0] + b_pool)."""
    B, S = input_ids.shape

    # Embedding gathers (integer table lookups) are JAX glue; everything after is one kernel.
    we = params["word_emb"][input_ids]                                # (B, S, H)
    pe = params["pos_emb"][jnp.arange(S)][None, :, :]                 # (1, S, H)
    te = params["type_emb"][token_type_ids]                           # (B, S, H)
    x_emb = (we + pe + te).astype(jnp.float32).reshape(B * S, HIDDEN)  # batch folded into rows

    # Additive attention mask (HF convention), shared by every head: (B, 1, S).
    add_mask = ((1.0 - attention_mask.astype(jnp.float32)) * -10000.0).reshape(B, 1, S)

    def full(shape):
        return pl.BlockSpec(shape, lambda i, _n=len(shape): (0,) * _n)

    out = pl.pallas_call(
        _make_bert_kernel(B, S),
        grid=(1,),                                                    # single fused step
        in_specs=[
            full((B * S, HIDDEN)),                                    # embedded activations
            full((B, 1, S)),                                          # additive mask
            full((1, HIDDEN)), full((1, HIDDEN)),                     # embedding LN
            full((LAYERS, HIDDEN, 3 * HIDDEN)), full((LAYERS, 1, 3 * HIDDEN)),   # fused QKV
            full((LAYERS, HIDDEN, HIDDEN)), full((LAYERS, 1, HIDDEN)),           # attn out proj
            full((LAYERS, 1, HIDDEN)), full((LAYERS, 1, HIDDEN)),                # LN1
            full((LAYERS, HIDDEN, INTER)), full((LAYERS, 1, INTER)),             # FFN in
            full((LAYERS, INTER, HIDDEN)), full((LAYERS, 1, HIDDEN)),            # FFN out
            full((LAYERS, 1, HIDDEN)), full((LAYERS, 1, HIDDEN)),                # LN2
            full((HIDDEN, HIDDEN)), full((1, HIDDEN)),                           # pooler
        ],
        out_specs=full((B, HIDDEN)),                                  # lane-dense 2-D output
        out_shape=jax.ShapeDtypeStruct((B, HIDDEN), jnp.float32),
        compiler_params=pltpu.CompilerParams(
            dimension_semantics=("arbitrary",),
            vmem_limit_bytes=64 * 1024 * 1024),
    )(
        x_emb, add_mask,
        params["emb_ln_g"], params["emb_ln_b"],
        params["qkv_w"], params["qkv_b"],
        params["o_w"], params["o_b"],
        params["ln1_g"], params["ln1_b"],
        params["i_w"], params["i_b"],
        params["out_w"], params["out_b"],
        params["ln2_g"], params["ln2_b"],
        params["pool_w"], params["pool_b"],
    )
    return out


# ---------------------------------------------- main -------------------------------------------
if __name__ == "__main__":
    B, S = 2, 8
    key = jax.random.PRNGKey(0)
    k_param, k_ids = jax.random.split(key)

    params = init_params(k_param)
    input_ids = jax.random.randint(k_ids, (B, S), 0, VOCAB, dtype=jnp.int32)
    token_type_ids = jnp.zeros((B, S), jnp.int32)
    attention_mask = jnp.ones((B, S), jnp.float32).at[1, 6:].set(0.0)  # pad last 2 tokens of ex. 1

    fwd = jax.jit(bert_encoder_forward)
    pooler_output = fwd(params, input_ids, token_type_ids, attention_mask)
    jax.block_until_ready(pooler_output)

    assert pooler_output.shape == (B, HIDDEN)
    assert bool(jnp.all(jnp.isfinite(pooler_output)))
    print("KERNEL_OK")
</pallas_src>

<mosaic_0001>
module attributes {stable_mosaic.version = 11 : i64} {
  func.func @kernel(%arg0: i32, %arg1: memref<16x32xf32, #tpu.memory_space<vmem>>, %arg2: memref<2x1x8xf32, #tpu.memory_space<vmem>>, %arg3: memref<1x32xf32, #tpu.memory_space<vmem>>, %arg4: memref<1x32xf32, #tpu.memory_space<vmem>>, %arg5: memref<2x32x96xbf16, #tpu.memory_space<vmem>>, %arg6: memref<2x1x96xf32, #tpu.memory_space<vmem>>, %arg7: memref<2x32x32xbf16, #tpu.memory_space<vmem>>, %arg8: memref<2x1x32xf32, #tpu.memory_space<vmem>>, %arg9: memref<2x1x32xf32, #tpu.memory_space<vmem>>, %arg10: memref<2x1x32xf32, #tpu.memory_space<vmem>>, %arg11: memref<2x32x64xbf16, #tpu.memory_space<vmem>>, %arg12: memref<2x1x64xf32, #tpu.memory_space<vmem>>, %arg13: memref<2x64x32xbf16, #tpu.memory_space<vmem>>, %arg14: memref<2x1x32xf32, #tpu.memory_space<vmem>>, %arg15: memref<2x1x32xf32, #tpu.memory_space<vmem>>, %arg16: memref<2x1x32xf32, #tpu.memory_space<vmem>>, %arg17: memref<32x32xbf16, #tpu.memory_space<vmem>>, %arg18: memref<1x32xf32, #tpu.memory_space<vmem>>, %arg19: memref<2x32xf32, #tpu.memory_space<vmem>>) attributes {dimension_semantics = [#tpu.dimension_semantics<arbitrary>], iteration_bounds = array<i64: 1>, scalar_prefetch = 0 : i64, scratch_operands = 0 : i64, tpu.core_type = #tpu.core_type<tc>, window_params = [{pipeline_mode = #tpu.pipeline_mode<synchronous>, transform_indices = @transform_0, window_bounds = array<i64: 16, 32>}, {pipeline_mode = #tpu.pipeline_mode<synchronous>, transform_indices = @transform_1, window_bounds = array<i64: 2, 1, 8>}, {pipeline_mode = #tpu.pipeline_mode<synchronous>, transform_indices = @transform_2, window_bounds = array<i64: 1, 32>}, {pipeline_mode = #tpu.pipeline_mode<synchronous>, transform_indices = @transform_3, window_bounds = array<i64: 1, 32>}, {pipeline_mode = #tpu.pipeline_mode<synchronous>, transform_indices = @transform_4, window_bounds = array<i64: 2, 32, 96>}, {pipeline_mode = #tpu.pipeline_mode<synchronous>, transform_indices = @transform_5, window_bounds = array<i64: 2, 1, 96>}, {pipeline_mode = #tpu.pipeline_mode<synchronous>, transform_indices = @transform_6, window_bounds = array<i64: 2, 32, 32>}, {pipeline_mode = #tpu.pipeline_mode<synchronous>, transform_indices = @transform_7, window_bounds = array<i64: 2, 1, 32>}, {pipeline_mode = #tpu.pipeline_mode<synchronous>, transform_indices = @transform_8, window_bounds = array<i64: 2, 1, 32>}, {pipeline_mode = #tpu.pipeline_mode<synchronous>, transform_indices = @transform_9, window_bounds = array<i64: 2, 1, 32>}, {pipeline_mode = #tpu.pipeline_mode<synchronous>, transform_indices = @transform_10, window_bounds = array<i64: 2, 32, 64>}, {pipeline_mode = #tpu.pipeline_mode<synchronous>, transform_indices = @transform_11, window_bounds = array<i64: 2, 1, 64>}, {pipeline_mode = #tpu.pipeline_mode<synchronous>, transform_indices = @transform_12, window_bounds = array<i64: 2, 64, 32>}, {pipeline_mode = #tpu.pipeline_mode<synchronous>, transform_indices = @transform_13, window_bounds = array<i64: 2, 1, 32>}, {pipeline_mode = #tpu.pipeline_mode<synchronous>, transform_indices = @transform_14, window_bounds = array<i64: 2, 1, 32>}, {pipeline_mode = #tpu.pipeline_mode<synchronous>, transform_indices = @transform_15, window_bounds = array<i64: 2, 1, 32>}, {pipeline_mode = #tpu.pipeline_mode<synchronous>, transform_indices = @transform_16, window_bounds = array<i64: 32, 32>}, {pipeline_mode = #tpu.pipeline_mode<synchronous>, transform_indices = @transform_17, window_bounds = array<i64: 1, 32>}, {pipeline_mode = #tpu.pipeline_mode<synchronous>, transform_indices = @transform_18, window_bounds = array<i64: 2, 32>}]} {
    %c0 = arith.constant 0 : index
    %c0_0 = arith.constant 0 : index
    %0 = vector.load %arg1[%c0, %c0_0] : memref<16x32xf32, #tpu.memory_space<vmem>>, vector<16x32xf32>
    %c0_1 = arith.constant 0 : index
    %c0_2 = arith.constant 0 : index
    %1 = vector.load %arg3[%c0_1, %c0_2] : memref<1x32xf32, #tpu.memory_space<vmem>>, vector<1x32xf32>
    %c0_3 = arith.constant 0 : index
    %c0_4 = arith.constant 0 : index
    %2 = vector.load %arg4[%c0_3, %c0_4] : memref<1x32xf32, #tpu.memory_space<vmem>>, vector<1x32xf32>
    %cst = arith.constant dense<0.000000e+00> : vector<16xf32>
    %3 = vector.multi_reduction <add>, %0, %cst [1] : vector<16x32xf32> to vector<16xf32>
    %4 = vector.shape_cast %3 : vector<16xf32> to vector<16x1xf32>
    %cst_5 = arith.constant 3.200000e+01 : f32
    %5 = vector.broadcast %cst_5 : f32 to vector<16x1xf32>
    %6 = arith.divf %4, %5 : vector<16x1xf32>
    %7 = vector.broadcast %6 : vector<16x1xf32> to vector<16x32xf32>
    %8 = arith.subf %0, %7 : vector<16x32xf32>
    %9 = arith.mulf %8, %8 : vector<16x32xf32>
    %cst_6 = arith.constant dense<0.000000e+00> : vector<16xf32>
    %10 = vector.multi_reduction <add>, %9, %cst_6 [1] : vector<16x32xf32> to vector<16xf32>
    %11 = vector.shape_cast %10 : vector<16xf32> to vector<16x1xf32>
    %cst_7 = arith.constant 3.200000e+01 : f32
    %12 = vector.broadcast %cst_7 : f32 to vector<16x1xf32>
    %13 = arith.divf %11, %12 : vector<16x1xf32>
    %cst_8 = arith.constant 9.99999996E-13 : f32
    %14 = vector.broadcast %cst_8 : f32 to vector<16x1xf32>
    %15 = arith.addf %13, %14 : vector<16x1xf32>
    %16 = math.rsqrt %15 : vector<16x1xf32>
    %17 = vector.broadcast %16 : vector<16x1xf32> to vector<16x32xf32>
    %18 = arith.mulf %8, %17 : vector<16x32xf32>
    %19 = vector.broadcast %1 : vector<1x32xf32> to vector<16x32xf32>
    %20 = arith.mulf %18, %19 : vector<16x32xf32>
    %21 = vector.broadcast %2 : vector<1x32xf32> to vector<16x32xf32>
    %22 = arith.addf %20, %21 : vector<16x32xf32>
    %c0_9 = arith.constant 0 : index
    %c0_10 = arith.constant 0 : index
    %c0_11 = arith.constant 0 : index
    %23 = vector.load %arg2[%c0_9, %c0_10, %c0_11] : memref<2x1x8xf32, #tpu.memory_space<vmem>>, vector<2x1x8xf32>
    %24 = vector.shape_cast %23 : vector<2x1x8xf32> to vector<2x1x8xf32>
    %25 = vector.broadcast %24 : vector<2x1x8xf32> to vector<2x8x8xf32>
    %26 = arith.truncf %22 : vector<16x32xf32> to vector<16x32xbf16>
    %c0_12 = arith.constant 0 : index
    %c0_13 = arith.constant 0 : index
    %c0_14 = arith.constant 0 : index
    %27 = vector.load %arg5[%c0_12, %c0_13, %c0_14] : memref<2x32x96xbf16, #tpu.memory_space<vmem>>, vector<1x32x96xbf16>
    %28 = vector.shape_cast %27 : vector<1x32x96xbf16> to vector<32x96xbf16>
    %cst_15 = arith.constant dense<0.000000e+00> : vector<16x96xf32>
    %29 = tpu.matmul %26, %28, %cst_15 {dimension_numbers = #tpu.dot_dimension_numbers<[1], [0], [0], [1], [0, 0, 1, 1], [], []>} : vector<16x32xbf16>, vector<32x96xbf16>, vector<16x96xf32> -> vector<16x96xf32>
    %c0_16 = arith.constant 0 : index
    %c0_17 = arith.constant 0 : index
    %c0_18 = arith.constant 0 : index
    %30 = vector.load %arg6[%c0_16, %c0_17, %c0_18] : memref<2x1x96xf32, #tpu.memory_space<vmem>>, vector<1x1x96xf32>
    %31 = vector.shape_cast %30 : vector<1x1x96xf32> to vector<1x96xf32>
    %32 = vector.broadcast %31 : vector<1x96xf32> to vector<16x96xf32>
    %33 = arith.addf %29, %32 : vector<16x96xf32>
    %34 = arith.truncf %33 : vector<16x96xf32> to vector<16x96xbf16>
    %35 = vector.extract_strided_slice %34 {offsets = [0, 0], sizes = [16, 8], strides = [1, 1]} : vector<16x96xbf16> to vector<16x8xbf16>
    %36 = vector.shape_cast %35 : vector<16x8xbf16> to vector<2x8x8xbf16>
    %37 = vector.extract_strided_slice %34 {offsets = [0, 32], sizes = [16, 8], strides = [1, 1]} : vector<16x96xbf16> to vector<16x8xbf16>
    %38 = vector.shape_cast %37 : vector<16x8xbf16> to vector<2x8x8xbf16>
    %39 = vector.extract_strided_slice %34 {offsets = [0, 64], sizes = [16, 8], strides = [1, 1]} : vector<16x96xbf16> to vector<16x8xbf16>
    %40 = vector.shape_cast %39 : vector<16x8xbf16> to vector<2x8x8xbf16>
    "tpu.trace_start"() <{level = 10 : i32, message = "bqd,bkd->bqk"}> : () -> ()
    %cst_19 = arith.constant dense<0.000000e+00> : vector<2x8x8xf32>
    %41 = tpu.matmul %36, %38, %cst_19 {dimension_numbers = #tpu.dot_dimension_numbers<[2], [2], [1], [1], [0, 0, 0, 1, 1, 1], [0], [0]>} : vector<2x8x8xbf16>, vector<2x8x8xbf16>, vector<2x8x8xf32> -> vector<2x8x8xf32>
    "tpu.trace_stop"() : () -> ()
    %cst_20 = arith.constant 0.353553385 : f32
    %42 = vector.broadcast %cst_20 : f32 to vector<2x8x8xf32>
    %43 = arith.mulf %41, %42 : vector<2x8x8xf32>
    %44 = arith.addf %43, %25 : vector<2x8x8xf32>
    %cst_21 = arith.constant dense<0xFF800000> : vector<2x8xf32>
    %45 = vector.multi_reduction <maximumf>, %44, %cst_21 [2] : vector<2x8x8xf32> to vector<2x8xf32>
    %46 = vector.shape_cast %45 : vector<2x8xf32> to vector<2x8x1xf32>
    %47 = vector.broadcast %46 : vector<2x8x1xf32> to vector<2x8x8xf32>
    %48 = arith.subf %44, %47 : vector<2x8x8xf32>
    %49 = math.exp %48 : vector<2x8x8xf32>
    %cst_22 = arith.constant dense<0.000000e+00> : vector<2x8xf32>
    %50 = vector.multi_reduction <add>, %49, %cst_22 [2] : vector<2x8x8xf32> to vector<2x8xf32>
    %51 = vector.shape_cast %50 : vector<2x8xf32> to vector<2x8x1xf32>
    %52 = vector.broadcast %51 : vector<2x8x1xf32> to vector<2x8x8xf32>
    %53 = arith.divf %49, %52 : vector<2x8x8xf32>
    %54 = arith.truncf %53 : vector<2x8x8xf32> to vector<2x8x8xbf16>
    "tpu.trace_start"() <{level = 10 : i32, message = "bqk,bkd->bqd"}> : () -> ()
    %cst_23 = arith.constant dense<0.000000e+00> : vector<2x8x8xf32>
    %55 = tpu.matmul %54, %40, %cst_23 {dimension_numbers = #tpu.dot_dimension_numbers<[2], [1], [1], [2], [0, 0, 0, 1, 1, 2], [0], [0]>} : vector<2x8x8xbf16>, vector<2x8x8xbf16>, vector<2x8x8xf32> -> vector<2x8x8xf32>
    "tpu.trace_stop"() : () -> ()
    %56 = vector.shape_cast %55 : vector<2x8x8xf32> to vector<16x8xf32>
    %57 = vector.extract_strided_slice %34 {offsets = [0, 8], sizes = [16, 8], strides = [1, 1]} : vector<16x96xbf16> to vector<16x8xbf16>
    %58 = vector.shape_cast %57 : vector<16x8xbf16> to vector<2x8x8xbf16>
    %59 = vector.extract_strided_slice %34 {offsets = [0, 40], sizes = [16, 8], strides = [1, 1]} : vector<16x96xbf16> to vector<16x8xbf16>
    %60 = vector.shape_cast %59 : vector<16x8xbf16> to vector<2x8x8xbf16>
    %61 = vector.extract_strided_slice %34 {offsets = [0, 72], sizes = [16, 8], strides = [1, 1]} : vector<16x96xbf16> to vector<16x8xbf16>
    %62 = vector.shape_cast %61 : vector<16x8xbf16> to vector<2x8x8xbf16>
    "tpu.trace_start"() <{level = 10 : i32, message = "bqd,bkd->bqk"}> : () -> ()
    %cst_24 = arith.constant dense<0.000000e+00> : vector<2x8x8xf32>
    %63 = tpu.matmul %58, %60, %cst_24 {dimension_numbers = #tpu.dot_dimension_numbers<[2], [2], [1], [1], [0, 0, 0, 1, 1, 1], [0], [0]>} : vector<2x8x8xbf16>, vector<2x8x8xbf16>, vector<2x8x8xf32> -> vector<2x8x8xf32>
    "tpu.trace_stop"() : () -> ()
    %cst_25 = arith.constant 0.353553385 : f32
    %64 = vector.broadcast %cst_25 : f32 to vector<2x8x8xf32>
    %65 = arith.mulf %63, %64 : vector<2x8x8xf32>
    %66 = arith.addf %65, %25 : vector<2x8x8xf32>
    %cst_26 = arith.constant dense<0xFF800000> : vector<2x8xf32>
    %67 = vector.multi_reduction <maximumf>, %66, %cst_26 [2] : vector<2x8x8xf32> to vector<2x8xf32>
    %68 = vector.shape_cast %67 : vector<2x8xf32> to vector<2x8x1xf32>
    %69 = vector.broadcast %68 : vector<2x8x1xf32> to vector<2x8x8xf32>
    %70 = arith.subf %66, %69 : vector<2x8x8xf32>
    %71 = math.exp %70 : vector<2x8x8xf32>
    %cst_27 = arith.constant dense<0.000000e+00> : vector<2x8xf32>
    %72 = vector.multi_reduction <add>, %71, %cst_27 [2] : vector<2x8x8xf32> to vector<2x8xf32>
    %73 = vector.shape_cast %72 : vector<2x8xf32> to vector<2x8x1xf32>
    %74 = vector.broadcast %73 : vector<2x8x1xf32> to vector<2x8x8xf32>
    %75 = arith.divf %71, %74 : vector<2x8x8xf32>
    %76 = arith.truncf %75 : vector<2x8x8xf32> to vector<2x8x8xbf16>
    "tpu.trace_start"() <{level = 10 : i32, message = "bqk,bkd->bqd"}> : () -> ()
    %cst_28 = arith.constant dense<0.000000e+00> : vector<2x8x8xf32>
    %77 = tpu.matmul %76, %62, %cst_28 {dimension_numbers = #tpu.dot_dimension_numbers<[2], [1], [1], [2], [0, 0, 0, 1, 1, 2], [0], [0]>} : vector<2x8x8xbf16>, vector<2x8x8xbf16>, vector<2x8x8xf32> -> vector<2x8x8xf32>
    "tpu.trace_stop"() : () -> ()
    %78 = vector.shape_cast %77 : vector<2x8x8xf32> to vector<16x8xf32>
    %79 = vector.extract_strided_slice %34 {offsets = [0, 16], sizes = [16, 8], strides = [1, 1]} : vector<16x96xbf16> to vector<16x8xbf16>
    %80 = vector.shape_cast %79 : vector<16x8xbf16> to vector<2x8x8xbf16>
    %81 = vector.extract_strided_slice %34 {offsets = [0, 48], sizes = [16, 8], strides = [1, 1]} : vector<16x96xbf16> to vector<16x8xbf16>
    %82 = vector.shape_cast %81 : vector<16x8xbf16> to vector<2x8x8xbf16>
    %83 = vector.extract_strided_slice %34 {offsets = [0, 80], sizes = [16, 8], strides = [1, 1]} : vector<16x96xbf16> to vector<16x8xbf16>
    %84 = vector.shape_cast %83 : vector<16x8xbf16> to vector<2x8x8xbf16>
    "tpu.trace_start"() <{level = 10 : i32, message = "bqd,bkd->bqk"}> : () -> ()
    %cst_29 = arith.constant dense<0.000000e+00> : vector<2x8x8xf32>
    %85 = tpu.matmul %80, %82, %cst_29 {dimension_numbers = #tpu.dot_dimension_numbers<[2], [2], [1], [1], [0, 0, 0, 1, 1, 1], [0], [0]>} : vector<2x8x8xbf16>, vector<2x8x8xbf16>, vector<2x8x8xf32> -> vector<2x8x8xf32>
    "tpu.trace_stop"() : () -> ()
    %cst_30 = arith.constant 0.353553385 : f32
    %86 = vector.broadcast %cst_30 : f32 to vector<2x8x8xf32>
    %87 = arith.mulf %85, %86 : vector<2x8x8xf32>
    %88 = arith.addf %87, %25 : vector<2x8x8xf32>
    %cst_31 = arith.constant dense<0xFF800000> : vector<2x8xf32>
    %89 = vector.multi_reduction <maximumf>, %88, %cst_31 [2] : vector<2x8x8xf32> to vector<2x8xf32>
    %90 = vector.shape_cast %89 : vector<2x8xf32> to vector<2x8x1xf32>
    %91 = vector.broadcast %90 : vector<2x8x1xf32> to vector<2x8x8xf32>
    %92 = arith.subf %88, %91 : vector<2x8x8xf32>
    %93 = math.exp %92 : vector<2x8x8xf32>
    %cst_32 = arith.constant dense<0.000000e+00> : vector<2x8xf32>
    %94 = vector.multi_reduction <add>, %93, %cst_32 [2] : vector<2x8x8xf32> to vector<2x8xf32>
    %95 = vector.shape_cast %94 : vector<2x8xf32> to vector<2x8x1xf32>
    %96 = vector.broadcast %95 : vector<2x8x1xf32> to vector<2x8x8xf32>
    %97 = arith.divf %93, %96 : vector<2x8x8xf32>
    %98 = arith.truncf %97 : vector<2x8x8xf32> to vector<2x8x8xbf16>
    "tpu.trace_start"() <{level = 10 : i32, message = "bqk,bkd->bqd"}> : () -> ()
    %cst_33 = arith.constant dense<0.000000e+00> : vector<2x8x8xf32>
    %99 = tpu.matmul %98, %84, %cst_33 {dimension_numbers = #tpu.dot_dimension_numbers<[2], [1], [1], [2], [0, 0, 0, 1, 1, 2], [0], [0]>} : vector<2x8x8xbf16>, vector<2x8x8xbf16>, vector<2x8x8xf32> -> vector<2x8x8xf32>
    "tpu.trace_stop"() : () -> ()
    %100 = vector.shape_cast %99 : vector<2x8x8xf32> to vector<16x8xf32>
    %101 = vector.extract_strided_slice %34 {offsets = [0, 24], sizes = [16, 8], strides = [1, 1]} : vector<16x96xbf16> to vector<16x8xbf16>
    %102 = vector.shape_cast %101 : vector<16x8xbf16> to vector<2x8x8xbf16>
    %103 = vector.extract_strided_slice %34 {offsets = [0, 56], sizes = [16, 8], strides = [1, 1]} : vector<16x96xbf16> to vector<16x8xbf16>
    %104 = vector.shape_cast %103 : vector<16x8xbf16> to vector<2x8x8xbf16>
    %105 = vector.extract_strided_slice %34 {offsets = [0, 88], sizes = [16, 8], strides = [1, 1]} : vector<16x96xbf16> to vector<16x8xbf16>
    %106 = vector.shape_cast %105 : vector<16x8xbf16> to vector<2x8x8xbf16>
    "tpu.trace_start"() <{level = 10 : i32, message = "bqd,bkd->bqk"}> : () -> ()
    %cst_34 = arith.constant dense<0.000000e+00> : vector<2x8x8xf32>
    %107 = tpu.matmul %102, %104, %cst_34 {dimension_numbers = #tpu.dot_dimension_numbers<[2], [2], [1], [1], [0, 0, 0, 1, 1, 1], [0], [0]>} : vector<2x8x8xbf16>, vector<2x8x8xbf16>, vector<2x8x8xf32> -> vector<2x8x8xf32>
    "tpu.trace_stop"() : () -> ()
    %cst_35 = arith.constant 0.353553385 : f32
    %108 = vector.broadcast %cst_35 : f32 to vector<2x8x8xf32>
    %109 = arith.mulf %107, %108 : vector<2x8x8xf32>
    %110 = arith.addf %109, %25 : vector<2x8x8xf32>
    %cst_36 = arith.constant dense<0xFF800000> : vector<2x8xf32>
    %111 = vector.multi_reduction <maximumf>, %110, %cst_36 [2] : vector<2x8x8xf32> to vector<2x8xf32>
    %112 = vector.shape_cast %111 : vector<2x8xf32> to vector<2x8x1xf32>
    %113 = vector.broadcast %112 : vector<2x8x1xf32> to vector<2x8x8xf32>
    %114 = arith.subf %110, %113 : vector<2x8x8xf32>
    %115 = math.exp %114 : vector<2x8x8xf32>
    %cst_37 = arith.constant dense<0.000000e+00> : vector<2x8xf32>
    %116 = vector.multi_reduction <add>, %115, %cst_37 [2] : vector<2x8x8xf32> to vector<2x8xf32>
    %117 = vector.shape_cast %116 : vector<2x8xf32> to vector<2x8x1xf32>
    %118 = vector.broadcast %117 : vector<2x8x1xf32> to vector<2x8x8xf32>
    %119 = arith.divf %115, %118 : vector<2x8x8xf32>
    %120 = arith.truncf %119 : vector<2x8x8xf32> to vector<2x8x8xbf16>
    "tpu.trace_start"() <{level = 10 : i32, message = "bqk,bkd->bqd"}> : () -> ()
    %cst_38 = arith.constant dense<0.000000e+00> : vector<2x8x8xf32>
    %121 = tpu.matmul %120, %106, %cst_38 {dimension_numbers = #tpu.dot_dimension_numbers<[2], [1], [1], [2], [0, 0, 0, 1, 1, 2], [0], [0]>} : vector<2x8x8xbf16>, vector<2x8x8xbf16>, vector<2x8x8xf32> -> vector<2x8x8xf32>
    "tpu.trace_stop"() : () -> ()
    %122 = vector.shape_cast %121 : vector<2x8x8xf32> to vector<16x8xf32>
    %123 = tpu.concatenate %56, %78, %100, %122 in 1 : vector<16x8xf32>, vector<16x8xf32>, vector<16x8xf32>, vector<16x8xf32> -> vector<16x32xf32>
    %124 = arith.truncf %123 : vector<16x32xf32> to vector<16x32xbf16>
    %c0_39 = arith.constant 0 : index
    %c0_40 = arith.constant 0 : index
    %c0_41 = arith.constant 0 : index
    %125 = vector.load %arg7[%c0_39, %c0_40, %c0_41] : memref<2x32x32xbf16, #tpu.memory_space<vmem>>, vector<1x32x32xbf16>
    %126 = vector.shape_cast %125 : vector<1x32x32xbf16> to vector<32x32xbf16>
    %cst_42 = arith.constant dense<0.000000e+00> : vector<16x32xf32>
    %127 = tpu.matmul %124, %126, %cst_42 {dimension_numbers = #tpu.dot_dimension_numbers<[1], [0], [0], [1], [0, 0, 1, 1], [], []>} : vector<16x32xbf16>, vector<32x32xbf16>, vector<16x32xf32> -> vector<16x32xf32>
    %c0_43 = arith.constant 0 : index
    %c0_44 = arith.constant 0 : index
    %c0_45 = arith.constant 0 : index
    %128 = vector.load %arg8[%c0_43, %c0_44, %c0_45] : memref<2x1x32xf32, #tpu.memory_space<vmem>>, vector<1x1x32xf32>
    %129 = vector.shape_cast %128 : vector<1x1x32xf32> to vector<1x32xf32>
    %130 = vector.broadcast %129 : vector<1x32xf32> to vector<16x32xf32>
    %131 = arith.addf %127, %130 : vector<16x32xf32>
    %132 = arith.addf %131, %22 : vector<16x32xf32>
    %c0_46 = arith.constant 0 : index
    %c0_47 = arith.constant 0 : index
    %c0_48 = arith.constant 0 : index
    %133 = vector.load %arg9[%c0_46, %c0_47, %c0_48] : memref<2x1x32xf32, #tpu.memory_space<vmem>>, vector<1x1x32xf32>
    %134 = vector.shape_cast %133 : vector<1x1x32xf32> to vector<1x32xf32>
    %c0_49 = arith.constant 0 : index
    %c0_50 = arith.constant 0 : index
    %c0_51 = arith.constant 0 : index
    %135 = vector.load %arg10[%c0_49, %c0_50, %c0_51] : memref<2x1x32xf32, #tpu.memory_space<vmem>>, vector<1x1x32xf32>
    %136 = vector.shape_cast %135 : vector<1x1x32xf32> to vector<1x32xf32>
    %cst_52 = arith.constant dense<0.000000e+00> : vector<16xf32>
    %137 = vector.multi_reduction <add>, %132, %cst_52 [1] : vector<16x32xf32> to vector<16xf32>
    %138 = vector.shape_cast %137 : vector<16xf32> to vector<16x1xf32>
    %cst_53 = arith.constant 3.200000e+01 : f32
    %139 = vector.broadcast %cst_53 : f32 to vector<16x1xf32>
    %140 = arith.divf %138, %139 : vector<16x1xf32>
    %141 = vector.broadcast %140 : vector<16x1xf32> to vector<16x32xf32>
    %142 = arith.subf %132, %141 : vector<16x32xf32>
    %143 = arith.mulf %142, %142 : vector<16x32xf32>
    %cst_54 = arith.constant dense<0.000000e+00> : vector<16xf32>
    %144 = vector.multi_reduction <add>, %143, %cst_54 [1] : vector<16x32xf32> to vector<16xf32>
    %145 = vector.shape_cast %144 : vector<16xf32> to vector<16x1xf32>
    %cst_55 = arith.constant 3.200000e+01 : f32
    %146 = vector.broadcast %cst_55 : f32 to vector<16x1xf32>
    %147 = arith.divf %145, %146 : vector<16x1xf32>
    %cst_56 = arith.constant 9.99999996E-13 : f32
    %148 = vector.broadcast %cst_56 : f32 to vector<16x1xf32>
    %149 = arith.addf %147, %148 : vector<16x1xf32>
    %150 = math.rsqrt %149 : vector<16x1xf32>
    %151 = vector.broadcast %150 : vector<16x1xf32> to vector<16x32xf32>
    %152 = arith.mulf %142, %151 : vector<16x32xf32>
    %153 = vector.broadcast %134 : vector<1x32xf32> to vector<16x32xf32>
    %154 = arith.mulf %152, %153 : vector<16x32xf32>
    %155 = vector.broadcast %136 : vector<1x32xf32> to vector<16x32xf32>
    %156 = arith.addf %154, %155 : vector<16x32xf32>
    %157 = arith.truncf %156 : vector<16x32xf32> to vector<16x32xbf16>
    %c0_57 = arith.constant 0 : index
    %c0_58 = arith.constant 0 : index
    %c0_59 = arith.constant 0 : index
    %158 = vector.load %arg11[%c0_57, %c0_58, %c0_59] : memref<2x32x64xbf16, #tpu.memory_space<vmem>>, vector<1x32x64xbf16>
    %159 = vector.shape_cast %158 : vector<1x32x64xbf16> to vector<32x64xbf16>
    %cst_60 = arith.constant dense<0.000000e+00> : vector<16x64xf32>
    %160 = tpu.matmul %157, %159, %cst_60 {dimension_numbers = #tpu.dot_dimension_numbers<[1], [0], [0], [1], [0, 0, 1, 1], [], []>} : vector<16x32xbf16>, vector<32x64xbf16>, vector<16x64xf32> -> vector<16x64xf32>
    %c0_61 = arith.constant 0 : index
    %c0_62 = arith.constant 0 : index
    %c0_63 = arith.constant 0 : index
    %161 = vector.load %arg12[%c0_61, %c0_62, %c0_63] : memref<2x1x64xf32, #tpu.memory_space<vmem>>, vector<1x1x64xf32>
    %162 = vector.shape_cast %161 : vector<1x1x64xf32> to vector<1x64xf32>
    %163 = vector.broadcast %162 : vector<1x64xf32> to vector<16x64xf32>
    %164 = arith.addf %160, %163 : vector<16x64xf32>
    %cst_64 = arith.constant 5.000000e-01 : f32
    %165 = vector.broadcast %cst_64 : f32 to vector<16x64xf32>
    %166 = arith.mulf %165, %164 : vector<16x64xf32>
    %cst_65 = arith.constant 0.707106769 : f32
    %167 = vector.broadcast %cst_65 : f32 to vector<16x64xf32>
    %168 = arith.mulf %164, %167 : vector<16x64xf32>
    %169 = math.absf %168 : vector<16x64xf32>
    %cst_66 = arith.constant 0.327591091 : f32
    %170 = vector.broadcast %cst_66 : f32 to vector<16x64xf32>
    %171 = arith.mulf %170, %169 : vector<16x64xf32>
    %cst_67 = arith.constant 1.000000e+00 : f32
    %172 = vector.broadcast %cst_67 : f32 to vector<16x64xf32>
    %173 = arith.addf %172, %171 : vector<16x64xf32>
    %cst_68 = arith.constant 1.000000e+00 : f32
    %174 = vector.broadcast %cst_68 : f32 to vector<16x64xf32>
    %175 = arith.divf %174, %173 : vector<16x64xf32>
    %cst_69 = arith.constant 1.06140542 : f32
    %176 = vector.broadcast %cst_69 : f32 to vector<16x64xf32>
    %177 = arith.mulf %176, %175 : vector<16x64xf32>
    %cst_70 = arith.constant -1.45315206 : f32
    %178 = vector.broadcast %cst_70 : f32 to vector<16x64xf32>
    %179 = arith.addf %177, %178 : vector<16x64xf32>
    %180 = arith.mulf %179, %175 : vector<16x64xf32>
    %cst_71 = arith.constant 1.42141378 : f32
    %181 = vector.broadcast %cst_71 : f32 to vector<16x64xf32>
    %182 = arith.addf %180, %181 : vector<16x64xf32>
    %183 = arith.mulf %182, %175 : vector<16x64xf32>
    %cst_72 = arith.constant -0.284496725 : f32
    %184 = vector.broadcast %cst_72 : f32 to vector<16x64xf32>
    %185 = arith.addf %183, %184 : vector<16x64xf32>
    %186 = arith.mulf %185, %175 : vector<16x64xf32>
    %cst_73 = arith.constant 0.254829586 : f32
    %187 = vector.broadcast %cst_73 : f32 to vector<16x64xf32>
    %188 = arith.addf %186, %187 : vector<16x64xf32>
    %189 = arith.mulf %188, %175 : vector<16x64xf32>
    %190 = arith.mulf %169, %169 : vector<16x64xf32>
    %cst_74 = arith.constant 0.000000e+00 : f32
    %191 = vector.broadcast %cst_74 : f32 to vector<16x64xf32>
    %192 = arith.subf %191, %190 : vector<16x64xf32>
    %193 = math.exp %192 : vector<16x64xf32>
    %194 = arith.mulf %189, %193 : vector<16x64xf32>
    %cst_75 = arith.constant 1.000000e+00 : f32
    %195 = vector.broadcast %cst_75 : f32 to vector<16x64xf32>
    %196 = arith.subf %195, %194 : vector<16x64xf32>
    %cst_76 = arith.constant 0.000000e+00 : f32
    %197 = vector.broadcast %cst_76 : f32 to vector<16x64xf32>
    %198 = arith.cmpf oge, %168, %197 : vector<16x64xf32>
    %cst_77 = arith.constant 0.000000e+00 : f32
    %199 = vector.broadcast %cst_77 : f32 to vector<16x64xf32>
    %200 = arith.subf %199, %196 : vector<16x64xf32>
    %201 = arith.select %198, %196, %200 : vector<16x64xi1>, vector<16x64xf32>
    %cst_78 = arith.constant 1.000000e+00 : f32
    %202 = vector.broadcast %cst_78 : f32 to vector<16x64xf32>
    %203 = arith.addf %202, %201 : vector<16x64xf32>
    %204 = arith.mulf %166, %203 : vector<16x64xf32>
    %205 = arith.truncf %204 : vector<16x64xf32> to vector<16x64xbf16>
    %c0_79 = arith.constant 0 : index
    %c0_80 = arith.constant 0 : index
    %c0_81 = arith.constant 0 : index
    %206 = vector.load %arg13[%c0_79, %c0_80, %c0_81] : memref<2x64x32xbf16, #tpu.memory_space<vmem>>, vector<1x64x32xbf16>
    %207 = vector.shape_cast %206 : vector<1x64x32xbf16> to vector<64x32xbf16>
    %cst_82 = arith.constant dense<0.000000e+00> : vector<16x32xf32>
    %208 = tpu.matmul %205, %207, %cst_82 {dimension_numbers = #tpu.dot_dimension_numbers<[1], [0], [0], [1], [0, 0, 1, 1], [], []>} : vector<16x64xbf16>, vector<64x32xbf16>, vector<16x32xf32> -> vector<16x32xf32>
    %c0_83 = arith.constant 0 : index
    %c0_84 = arith.constant 0 : index
    %c0_85 = arith.constant 0 : index
    %209 = vector.load %arg14[%c0_83, %c0_84, %c0_85] : memref<2x1x32xf32, #tpu.memory_space<vmem>>, vector<1x1x32xf32>
    %210 = vector.shape_cast %209 : vector<1x1x32xf32> to vector<1x32xf32>
    %211 = vector.broadcast %210 : vector<1x32xf32> to vector<16x32xf32>
    %212 = arith.addf %208, %211 : vector<16x32xf32>
    %213 = arith.addf %212, %156 : vector<16x32xf32>
    %c0_86 = arith.constant 0 : index
    %c0_87 = arith.constant 0 : index
    %c0_88 = arith.constant 0 : index
    %214 = vector.load %arg15[%c0_86, %c0_87, %c0_88] : memref<2x1x32xf32, #tpu.memory_space<vmem>>, vector<1x1x32xf32>
    %215 = vector.shape_cast %214 : vector<1x1x32xf32> to vector<1x32xf32>
    %c0_89 = arith.constant 0 : index
    %c0_90 = arith.constant 0 : index
    %c0_91 = arith.constant 0 : index
    %216 = vector.load %arg16[%c0_89, %c0_90, %c0_91] : memref<2x1x32xf32, #tpu.memory_space<vmem>>, vector<1x1x32xf32>
    %217 = vector.shape_cast %216 : vector<1x1x32xf32> to vector<1x32xf32>
    %cst_92 = arith.constant dense<0.000000e+00> : vector<16xf32>
    %218 = vector.multi_reduction <add>, %213, %cst_92 [1] : vector<16x32xf32> to vector<16xf32>
    %219 = vector.shape_cast %218 : vector<16xf32> to vector<16x1xf32>
    %cst_93 = arith.constant 3.200000e+01 : f32
    %220 = vector.broadcast %cst_93 : f32 to vector<16x1xf32>
    %221 = arith.divf %219, %220 : vector<16x1xf32>
    %222 = vector.broadcast %221 : vector<16x1xf32> to vector<16x32xf32>
    %223 = arith.subf %213, %222 : vector<16x32xf32>
    %224 = arith.mulf %223, %223 : vector<16x32xf32>
    %cst_94 = arith.constant dense<0.000000e+00> : vector<16xf32>
    %225 = vector.multi_reduction <add>, %224, %cst_94 [1] : vector<16x32xf32> to vector<16xf32>
    %226 = vector.shape_cast %225 : vector<16xf32> to vector<16x1xf32>
    %cst_95 = arith.constant 3.200000e+01 : f32
    %227 = vector.broadcast %cst_95 : f32 to vector<16x1xf32>
    %228 = arith.divf %226, %227 : vector<16x1xf32>
    %cst_96 = arith.constant 9.99999996E-13 : f32
    %229 = vector.broadcast %cst_96 : f32 to vector<16x1xf32>
    %230 = arith.addf %228, %229 : vector<16x1xf32>
    %231 = math.rsqrt %230 : vector<16x1xf32>
    %232 = vector.broadcast %231 : vector<16x1xf32> to vector<16x32xf32>
    %233 = arith.mulf %223, %232 : vector<16x32xf32>
    %234 = vector.broadcast %215 : vector<1x32xf32> to vector<16x32xf32>
    %235 = arith.mulf %233, %234 : vector<16x32xf32>
    %236 = vector.broadcast %217 : vector<1x32xf32> to vector<16x32xf32>
    %237 = arith.addf %235, %236 : vector<16x32xf32>
    %238 = arith.truncf %237 : vector<16x32xf32> to vector<16x32xbf16>
    %c1 = arith.constant 1 : index
    %c0_97 = arith.constant 0 : index
    %c0_98 = arith.constant 0 : index
    %239 = vector.load %arg5[%c1, %c0_97, %c0_98] : memref<2x32x96xbf16, #tpu.memory_space<vmem>>, vector<1x32x96xbf16>
    %240 = vector.shape_cast %239 : vector<1x32x96xbf16> to vector<32x96xbf16>
    %cst_99 = arith.constant dense<0.000000e+00> : vector<16x96xf32>
    %241 = tpu.matmul %238, %240, %cst_99 {dimension_numbers = #tpu.dot_dimension_numbers<[1], [0], [0], [1], [0, 0, 1, 1], [], []>} : vector<16x32xbf16>, vector<32x96xbf16>, vector<16x96xf32> -> vector<16x96xf32>
    %c1_100 = arith.constant 1 : index
    %c0_101 = arith.constant 0 : index
    %c0_102 = arith.constant 0 : index
    %242 = vector.load %arg6[%c1_100, %c0_101, %c0_102] : memref<2x1x96xf32, #tpu.memory_space<vmem>>, vector<1x1x96xf32>
    %243 = vector.shape_cast %242 : vector<1x1x96xf32> to vector<1x96xf32>
    %244 = vector.broadcast %243 : vector<1x96xf32> to vector<16x96xf32>
    %245 = arith.addf %241, %244 : vector<16x96xf32>
    %246 = arith.truncf %245 : vector<16x96xf32> to vector<16x96xbf16>
    %247 = vector.extract_strided_slice %246 {offsets = [0, 0], sizes = [16, 8], strides = [1, 1]} : vector<16x96xbf16> to vector<16x8xbf16>
    %248 = vector.shape_cast %247 : vector<16x8xbf16> to vector<2x8x8xbf16>
    %249 = vector.extract_strided_slice %246 {offsets = [0, 32], sizes = [16, 8], strides = [1, 1]} : vector<16x96xbf16> to vector<16x8xbf16>
    %250 = vector.shape_cast %249 : vector<16x8xbf16> to vector<2x8x8xbf16>
    %251 = vector.extract_strided_slice %246 {offsets = [0, 64], sizes = [16, 8], strides = [1, 1]} : vector<16x96xbf16> to vector<16x8xbf16>
    %252 = vector.shape_cast %251 : vector<16x8xbf16> to vector<2x8x8xbf16>
    "tpu.trace_start"() <{level = 10 : i32, message = "bqd,bkd->bqk"}> : () -> ()
    %cst_103 = arith.constant dense<0.000000e+00> : vector<2x8x8xf32>
    %253 = tpu.matmul %248, %250, %cst_103 {dimension_numbers = #tpu.dot_dimension_numbers<[2], [2], [1], [1], [0, 0, 0, 1, 1, 1], [0], [0]>} : vector<2x8x8xbf16>, vector<2x8x8xbf16>, vector<2x8x8xf32> -> vector<2x8x8xf32>
    "tpu.trace_stop"() : () -> ()
    %cst_104 = arith.constant 0.353553385 : f32
    %254 = vector.broadcast %cst_104 : f32 to vector<2x8x8xf32>
    %255 = arith.mulf %253, %254 : vector<2x8x8xf32>
    %256 = arith.addf %255, %25 : vector<2x8x8xf32>
    %cst_105 = arith.constant dense<0xFF800000> : vector<2x8xf32>
    %257 = vector.multi_reduction <maximumf>, %256, %cst_105 [2] : vector<2x8x8xf32> to vector<2x8xf32>
    %258 = vector.shape_cast %257 : vector<2x8xf32> to vector<2x8x1xf32>
    %259 = vector.broadcast %258 : vector<2x8x1xf32> to vector<2x8x8xf32>
    %260 = arith.subf %256, %259 : vector<2x8x8xf32>
    %261 = math.exp %260 : vector<2x8x8xf32>
    %cst_106 = arith.constant dense<0.000000e+00> : vector<2x8xf32>
    %262 = vector.multi_reduction <add>, %261, %cst_106 [2] : vector<2x8x8xf32> to vector<2x8xf32>
    %263 = vector.shape_cast %262 : vector<2x8xf32> to vector<2x8x1xf32>
    %264 = vector.broadcast %263 : vector<2x8x1xf32> to vector<2x8x8xf32>
    %265 = arith.divf %261, %264 : vector<2x8x8xf32>
    %266 = arith.truncf %265 : vector<2x8x8xf32> to vector<2x8x8xbf16>
    "tpu.trace_start"() <{level = 10 : i32, message = "bqk,bkd->bqd"}> : () -> ()
    %cst_107 = arith.constant dense<0.000000e+00> : vector<2x8x8xf32>
    %267 = tpu.matmul %266, %252, %cst_107 {dimension_numbers = #tpu.dot_dimension_numbers<[2], [1], [1], [2], [0, 0, 0, 1, 1, 2], [0], [0]>} : vector<2x8x8xbf16>, vector<2x8x8xbf16>, vector<2x8x8xf32> -> vector<2x8x8xf32>
    "tpu.trace_stop"() : () -> ()
    %268 = vector.shape_cast %267 : vector<2x8x8xf32> to vector<16x8xf32>
    %269 = vector.extract_strided_slice %246 {offsets = [0, 8], sizes = [16, 8], strides = [1, 1]} : vector<16x96xbf16> to vector<16x8xbf16>
    %270 = vector.shape_cast %269 : vector<16x8xbf16> to vector<2x8x8xbf16>
    %271 = vector.extract_strided_slice %246 {offsets = [0, 40], sizes = [16, 8], strides = [1, 1]} : vector<16x96xbf16> to vector<16x8xbf16>
    %272 = vector.shape_cast %271 : vector<16x8xbf16> to vector<2x8x8xbf16>
    %273 = vector.extract_strided_slice %246 {offsets = [0, 72], sizes = [16, 8], strides = [1, 1]} : vector<16x96xbf16> to vector<16x8xbf16>
    %274 = vector.shape_cast %273 : vector<16x8xbf16> to vector<2x8x8xbf16>
    "tpu.trace_start"() <{level = 10 : i32, message = "bqd,bkd->bqk"}> : () -> ()
    %cst_108 = arith.constant dense<0.000000e+00> : vector<2x8x8xf32>
    %275 = tpu.matmul %270, %272, %cst_108 {dimension_numbers = #tpu.dot_dimension_numbers<[2], [2], [1], [1], [0, 0, 0, 1, 1, 1], [0], [0]>} : vector<2x8x8xbf16>, vector<2x8x8xbf16>, vector<2x8x8xf32> -> vector<2x8x8xf32>
    "tpu.trace_stop"() : () -> ()
    %cst_109 = arith.constant 0.353553385 : f32
    %276 = vector.broadcast %cst_109 : f32 to vector<2x8x8xf32>
    %277 = arith.mulf %275, %276 : vector<2x8x8xf32>
    %278 = arith.addf %277, %25 : vector<2x8x8xf32>
    %cst_110 = arith.constant dense<0xFF800000> : vector<2x8xf32>
    %279 = vector.multi_reduction <maximumf>, %278, %cst_110 [2] : vector<2x8x8xf32> to vector<2x8xf32>
    %280 = vector.shape_cast %279 : vector<2x8xf32> to vector<2x8x1xf32>
    %281 = vector.broadcast %280 : vector<2x8x1xf32> to vector<2x8x8xf32>
    %282 = arith.subf %278, %281 : vector<2x8x8xf32>
    %283 = math.exp %282 : vector<2x8x8xf32>
    %cst_111 = arith.constant dense<0.000000e+00> : vector<2x8xf32>
    %284 = vector.multi_reduction <add>, %283, %cst_111 [2] : vector<2x8x8xf32> to vector<2x8xf32>
    %285 = vector.shape_cast %284 : vector<2x8xf32> to vector<2x8x1xf32>
    %286 = vector.broadcast %285 : vector<2x8x1xf32> to vector<2x8x8xf32>
    %287 = arith.divf %283, %286 : vector<2x8x8xf32>
    %288 = arith.truncf %287 : vector<2x8x8xf32> to vector<2x8x8xbf16>
    "tpu.trace_start"() <{level = 10 : i32, message = "bqk,bkd->bqd"}> : () -> ()
    %cst_112 = arith.constant dense<0.000000e+00> : vector<2x8x8xf32>
    %289 = tpu.matmul %288, %274, %cst_112 {dimension_numbers = #tpu.dot_dimension_numbers<[2], [1], [1], [2], [0, 0, 0, 1, 1, 2], [0], [0]>} : vector<2x8x8xbf16>, vector<2x8x8xbf16>, vector<2x8x8xf32> -> vector<2x8x8xf32>
    "tpu.trace_stop"() : () -> ()
    %290 = vector.shape_cast %289 : vector<2x8x8xf32> to vector<16x8xf32>
    %291 = vector.extract_strided_slice %246 {offsets = [0, 16], sizes = [16, 8], strides = [1, 1]} : vector<16x96xbf16> to vector<16x8xbf16>
    %292 = vector.shape_cast %291 : vector<16x8xbf16> to vector<2x8x8xbf16>
    %293 = vector.extract_strided_slice %246 {offsets = [0, 48], sizes = [16, 8], strides = [1, 1]} : vector<16x96xbf16> to vector<16x8xbf16>
    %294 = vector.shape_cast %293 : vector<16x8xbf16> to vector<2x8x8xbf16>
    %295 = vector.extract_strided_slice %246 {offsets = [0, 80], sizes = [16, 8], strides = [1, 1]} : vector<16x96xbf16> to vector<16x8xbf16>
    %296 = vector.shape_cast %295 : vector<16x8xbf16> to vector<2x8x8xbf16>
    "tpu.trace_start"() <{level = 10 : i32, message = "bqd,bkd->bqk"}> : () -> ()
    %cst_113 = arith.constant dense<0.000000e+00> : vector<2x8x8xf32>
    %297 = tpu.matmul %292, %294, %cst_113 {dimension_numbers = #tpu.dot_dimension_numbers<[2], [2], [1], [1], [0, 0, 0, 1, 1, 1], [0], [0]>} : vector<2x8x8xbf16>, vector<2x8x8xbf16>, vector<2x8x8xf32> -> vector<2x8x8xf32>
    "tpu.trace_stop"() : () -> ()
    %cst_114 = arith.constant 0.353553385 : f32
    %298 = vector.broadcast %cst_114 : f32 to vector<2x8x8xf32>
    %299 = arith.mulf %297, %298 : vector<2x8x8xf32>
    %300 = arith.addf %299, %25 : vector<2x8x8xf32>
    %cst_115 = arith.constant dense<0xFF800000> : vector<2x8xf32>
    %301 = vector.multi_reduction <maximumf>, %300, %cst_115 [2] : vector<2x8x8xf32> to vector<2x8xf32>
    %302 = vector.shape_cast %301 : vector<2x8xf32> to vector<2x8x1xf32>
    %303 = vector.broadcast %302 : vector<2x8x1xf32> to vector<2x8x8xf32>
    %304 = arith.subf %300, %303 : vector<2x8x8xf32>
    %305 = math.exp %304 : vector<2x8x8xf32>
    %cst_116 = arith.constant dense<0.000000e+00> : vector<2x8xf32>
    %306 = vector.multi_reduction <add>, %305, %cst_116 [2] : vector<2x8x8xf32> to vector<2x8xf32>
    %307 = vector.shape_cast %306 : vector<2x8xf32> to vector<2x8x1xf32>
    %308 = vector.broadcast %307 : vector<2x8x1xf32> to vector<2x8x8xf32>
    %309 = arith.divf %305, %308 : vector<2x8x8xf32>
    %310 = arith.truncf %309 : vector<2x8x8xf32> to vector<2x8x8xbf16>
    "tpu.trace_start"() <{level = 10 : i32, message = "bqk,bkd->bqd"}> : () -> ()
    %cst_117 = arith.constant dense<0.000000e+00> : vector<2x8x8xf32>
    %311 = tpu.matmul %310, %296, %cst_117 {dimension_numbers = #tpu.dot_dimension_numbers<[2], [1], [1], [2], [0, 0, 0, 1, 1, 2], [0], [0]>} : vector<2x8x8xbf16>, vector<2x8x8xbf16>, vector<2x8x8xf32> -> vector<2x8x8xf32>
    "tpu.trace_stop"() : () -> ()
    %312 = vector.shape_cast %311 : vector<2x8x8xf32> to vector<16x8xf32>
    %313 = vector.extract_strided_slice %246 {offsets = [0, 24], sizes = [16, 8], strides = [1, 1]} : vector<16x96xbf16> to vector<16x8xbf16>
    %314 = vector.shape_cast %313 : vector<16x8xbf16> to vector<2x8x8xbf16>
    %315 = vector.extract_strided_slice %246 {offsets = [0, 56], sizes = [16, 8], strides = [1, 1]} : vector<16x96xbf16> to vector<16x8xbf16>
    %316 = vector.shape_cast %315 : vector<16x8xbf16> to vector<2x8x8xbf16>
    %317 = vector.extract_strided_slice %246 {offsets = [0, 88], sizes = [16, 8], strides = [1, 1]} : vector<16x96xbf16> to vector<16x8xbf16>
    %318 = vector.shape_cast %317 : vector<16x8xbf16> to vector<2x8x8xbf16>
    "tpu.trace_start"() <{level = 10 : i32, message = "bqd,bkd->bqk"}> : () -> ()
    %cst_118 = arith.constant dense<0.000000e+00> : vector<2x8x8xf32>
    %319 = tpu.matmul %314, %316, %cst_118 {dimension_numbers = #tpu.dot_dimension_numbers<[2], [2], [1], [1], [0, 0, 0, 1, 1, 1], [0], [0]>} : vector<2x8x8xbf16>, vector<2x8x8xbf16>, vector<2x8x8xf32> -> vector<2x8x8xf32>
    "tpu.trace_stop"() : () -> ()
    %cst_119 = arith.constant 0.353553385 : f32
    %320 = vector.broadcast %cst_119 : f32 to vector<2x8x8xf32>
    %321 = arith.mulf %319, %320 : vector<2x8x8xf32>
    %322 = arith.addf %321, %25 : vector<2x8x8xf32>
    %cst_120 = arith.constant dense<0xFF800000> : vector<2x8xf32>
    %323 = vector.multi_reduction <maximumf>, %322, %cst_120 [2] : vector<2x8x8xf32> to vector<2x8xf32>
    %324 = vector.shape_cast %323 : vector<2x8xf32> to vector<2x8x1xf32>
    %325 = vector.broadcast %324 : vector<2x8x1xf32> to vector<2x8x8xf32>
    %326 = arith.subf %322, %325 : vector<2x8x8xf32>
    %327 = math.exp %326 : vector<2x8x8xf32>
    %cst_121 = arith.constant dense<0.000000e+00> : vector<2x8xf32>
    %328 = vector.multi_reduction <add>, %327, %cst_121 [2] : vector<2x8x8xf32> to vector<2x8xf32>
    %329 = vector.shape_cast %328 : vector<2x8xf32> to vector<2x8x1xf32>
    %330 = vector.broadcast %329 : vector<2x8x1xf32> to vector<2x8x8xf32>
    %331 = arith.divf %327, %330 : vector<2x8x8xf32>
    %332 = arith.truncf %331 : vector<2x8x8xf32> to vector<2x8x8xbf16>
    "tpu.trace_start"() <{level = 10 : i32, message = "bqk,bkd->bqd"}> : () -> ()
    %cst_122 = arith.constant dense<0.000000e+00> : vector<2x8x8xf32>
    %333 = tpu.matmul %332, %318, %cst_122 {dimension_numbers = #tpu.dot_dimension_numbers<[2], [1], [1], [2], [0, 0, 0, 1, 1, 2], [0], [0]>} : vector<2x8x8xbf16>, vector<2x8x8xbf16>, vector<2x8x8xf32> -> vector<2x8x8xf32>
    "tpu.trace_stop"() : () -> ()
    %334 = vector.shape_cast %333 : vector<2x8x8xf32> to vector<16x8xf32>
    %335 = tpu.concatenate %268, %290, %312, %334 in 1 : vector<16x8xf32>, vector<16x8xf32>, vector<16x8xf32>, vector<16x8xf32> -> vector<16x32xf32>
    %336 = arith.truncf %335 : vector<16x32xf32> to vector<16x32xbf16>
    %c1_123 = arith.constant 1 : index
    %c0_124 = arith.constant 0 : index
    %c0_125 = arith.constant 0 : index
    %337 = vector.load %arg7[%c1_123, %c0_124, %c0_125] : memref<2x32x32xbf16, #tpu.memory_space<vmem>>, vector<1x32x32xbf16>
    %338 = vector.shape_cast %337 : vector<1x32x32xbf16> to vector<32x32xbf16>
    %cst_126 = arith.constant dense<0.000000e+00> : vector<16x32xf32>
    %339 = tpu.matmul %336, %338, %cst_126 {dimension_numbers = #tpu.dot_dimension_numbers<[1], [0], [0], [1], [0, 0, 1, 1], [], []>} : vector<16x32xbf16>, vector<32x32xbf16>, vector<16x32xf32> -> vector<16x32xf32>
    %c1_127 = arith.constant 1 : index
    %c0_128 = arith.constant 0 : index
    %c0_129 = arith.constant 0 : index
    %340 = vector.load %arg8[%c1_127, %c0_128, %c0_129] : memref<2x1x32xf32, #tpu.memory_space<vmem>>, vector<1x1x32xf32>
    %341 = vector.shape_cast %340 : vector<1x1x32xf32> to vector<1x32xf32>
    %342 = vector.broadcast %341 : vector<1x32xf32> to vector<16x32xf32>
    %343 = arith.addf %339, %342 : vector<16x32xf32>
    %344 = arith.addf %343, %237 : vector<16x32xf32>
    %c1_130 = arith.constant 1 : index
    %c0_131 = arith.constant 0 : index
    %c0_132 = arith.constant 0 : index
    %345 = vector.load %arg9[%c1_130, %c0_131, %c0_132] : memref<2x1x32xf32, #tpu.memory_space<vmem>>, vector<1x1x32xf32>
    %346 = vector.shape_cast %345 : vector<1x1x32xf32> to vector<1x32xf32>
    %c1_133 = arith.constant 1 : index
    %c0_134 = arith.constant 0 : index
    %c0_135 = arith.constant 0 : index
    %347 = vector.load %arg10[%c1_133, %c0_134, %c0_135] : memref<2x1x32xf32, #tpu.memory_space<vmem>>, vector<1x1x32xf32>
    %348 = vector.shape_cast %347 : vector<1x1x32xf32> to vector<1x32xf32>
    %cst_136 = arith.constant dense<0.000000e+00> : vector<16xf32>
    %349 = vector.multi_reduction <add>, %344, %cst_136 [1] : vector<16x32xf32> to vector<16xf32>
    %350 = vector.shape_cast %349 : vector<16xf32> to vector<16x1xf32>
    %cst_137 = arith.constant 3.200000e+01 : f32
    %351 = vector.broadcast %cst_137 : f32 to vector<16x1xf32>
    %352 = arith.divf %350, %351 : vector<16x1xf32>
    %353 = vector.broadcast %352 : vector<16x1xf32> to vector<16x32xf32>
    %354 = arith.subf %344, %353 : vector<16x32xf32>
    %355 = arith.mulf %354, %354 : vector<16x32xf32>
    %cst_138 = arith.constant dense<0.000000e+00> : vector<16xf32>
    %356 = vector.multi_reduction <add>, %355, %cst_138 [1] : vector<16x32xf32> to vector<16xf32>
    %357 = vector.shape_cast %356 : vector<16xf32> to vector<16x1xf32>
    %cst_139 = arith.constant 3.200000e+01 : f32
    %358 = vector.broadcast %cst_139 : f32 to vector<16x1xf32>
    %359 = arith.divf %357, %358 : vector<16x1xf32>
    %cst_140 = arith.constant 9.99999996E-13 : f32
    %360 = vector.broadcast %cst_140 : f32 to vector<16x1xf32>
    %361 = arith.addf %359, %360 : vector<16x1xf32>
    %362 = math.rsqrt %361 : vector<16x1xf32>
    %363 = vector.broadcast %362 : vector<16x1xf32> to vector<16x32xf32>
    %364 = arith.mulf %354, %363 : vector<16x32xf32>
    %365 = vector.broadcast %346 : vector<1x32xf32> to vector<16x32xf32>
    %366 = arith.mulf %364, %365 : vector<16x32xf32>
    %367 = vector.broadcast %348 : vector<1x32xf32> to vector<16x32xf32>
    %368 = arith.addf %366, %367 : vector<16x32xf32>
    %369 = arith.truncf %368 : vector<16x32xf32> to vector<16x32xbf16>
    %c1_141 = arith.constant 1 : index
    %c0_142 = arith.constant 0 : index
    %c0_143 = arith.constant 0 : index
    %370 = vector.load %arg11[%c1_141, %c0_142, %c0_143] : memref<2x32x64xbf16, #tpu.memory_space<vmem>>, vector<1x32x64xbf16>
    %371 = vector.shape_cast %370 : vector<1x32x64xbf16> to vector<32x64xbf16>
    %cst_144 = arith.constant dense<0.000000e+00> : vector<16x64xf32>
    %372 = tpu.matmul %369, %371, %cst_144 {dimension_numbers = #tpu.dot_dimension_numbers<[1], [0], [0], [1], [0, 0, 1, 1], [], []>} : vector<16x32xbf16>, vector<32x64xbf16>, vector<16x64xf32> -> vector<16x64xf32>
    %c1_145 = arith.constant 1 : index
    %c0_146 = arith.constant 0 : index
    %c0_147 = arith.constant 0 : index
    %373 = vector.load %arg12[%c1_145, %c0_146, %c0_147] : memref<2x1x64xf32, #tpu.memory_space<vmem>>, vector<1x1x64xf32>
    %374 = vector.shape_cast %373 : vector<1x1x64xf32> to vector<1x64xf32>
    %375 = vector.broadcast %374 : vector<1x64xf32> to vector<16x64xf32>
    %376 = arith.addf %372, %375 : vector<16x64xf32>
    %cst_148 = arith.constant 5.000000e-01 : f32
    %377 = vector.broadcast %cst_148 : f32 to vector<16x64xf32>
    %378 = arith.mulf %377, %376 : vector<16x64xf32>
    %cst_149 = arith.constant 0.707106769 : f32
    %379 = vector.broadcast %cst_149 : f32 to vector<16x64xf32>
    %380 = arith.mulf %376, %379 : vector<16x64xf32>
    %381 = math.absf %380 : vector<16x64xf32>
    %cst_150 = arith.constant 0.327591091 : f32
    %382 = vector.broadcast %cst_150 : f32 to vector<16x64xf32>
    %383 = arith.mulf %382, %381 : vector<16x64xf32>
    %cst_151 = arith.constant 1.000000e+00 : f32
    %384 = vector.broadcast %cst_151 : f32 to vector<16x64xf32>
    %385 = arith.addf %384, %383 : vector<16x64xf32>
    %cst_152 = arith.constant 1.000000e+00 : f32
    %386 = vector.broadcast %cst_152 : f32 to vector<16x64xf32>
    %387 = arith.divf %386, %385 : vector<16x64xf32>
    %cst_153 = arith.constant 1.06140542 : f32
    %388 = vector.broadcast %cst_153 : f32 to vector<16x64xf32>
    %389 = arith.mulf %388, %387 : vector<16x64xf32>
    %cst_154 = arith.constant -1.45315206 : f32
    %390 = vector.broadcast %cst_154 : f32 to vector<16x64xf32>
    %391 = arith.addf %389, %390 : vector<16x64xf32>
    %392 = arith.mulf %391, %387 : vector<16x64xf32>
    %cst_155 = arith.constant 1.42141378 : f32
    %393 = vector.broadcast %cst_155 : f32 to vector<16x64xf32>
    %394 = arith.addf %392, %393 : vector<16x64xf32>
    %395 = arith.mulf %394, %387 : vector<16x64xf32>
    %cst_156 = arith.constant -0.284496725 : f32
    %396 = vector.broadcast %cst_156 : f32 to vector<16x64xf32>
    %397 = arith.addf %395, %396 : vector<16x64xf32>
    %398 = arith.mulf %397, %387 : vector<16x64xf32>
    %cst_157 = arith.constant 0.254829586 : f32
    %399 = vector.broadcast %cst_157 : f32 to vector<16x64xf32>
    %400 = arith.addf %398, %399 : vector<16x64xf32>
    %401 = arith.mulf %400, %387 : vector<16x64xf32>
    %402 = arith.mulf %381, %381 : vector<16x64xf32>
    %cst_158 = arith.constant 0.000000e+00 : f32
    %403 = vector.broadcast %cst_158 : f32 to vector<16x64xf32>
    %404 = arith.subf %403, %402 : vector<16x64xf32>
    %405 = math.exp %404 : vector<16x64xf32>
    %406 = arith.mulf %401, %405 : vector<16x64xf32>
    %cst_159 = arith.constant 1.000000e+00 : f32
    %407 = vector.broadcast %cst_159 : f32 to vector<16x64xf32>
    %408 = arith.subf %407, %406 : vector<16x64xf32>
    %cst_160 = arith.constant 0.000000e+00 : f32
    %409 = vector.broadcast %cst_160 : f32 to vector<16x64xf32>
    %410 = arith.cmpf oge, %380, %409 : vector<16x64xf32>
    %cst_161 = arith.constant 0.000000e+00 : f32
    %411 = vector.broadcast %cst_161 : f32 to vector<16x64xf32>
    %412 = arith.subf %411, %408 : vector<16x64xf32>
    %413 = arith.select %410, %408, %412 : vector<16x64xi1>, vector<16x64xf32>
    %cst_162 = arith.constant 1.000000e+00 : f32
    %414 = vector.broadcast %cst_162 : f32 to vector<16x64xf32>
    %415 = arith.addf %414, %413 : vector<16x64xf32>
    %416 = arith.mulf %378, %415 : vector<16x64xf32>
    %417 = arith.truncf %416 : vector<16x64xf32> to vector<16x64xbf16>
    %c1_163 = arith.constant 1 : index
    %c0_164 = arith.constant 0 : index
    %c0_165 = arith.constant 0 : index
    %418 = vector.load %arg13[%c1_163, %c0_164, %c0_165] : memref<2x64x32xbf16, #tpu.memory_space<vmem>>, vector<1x64x32xbf16>
    %419 = vector.shape_cast %418 : vector<1x64x32xbf16> to vector<64x32xbf16>
    %cst_166 = arith.constant dense<0.000000e+00> : vector<16x32xf32>
    %420 = tpu.matmul %417, %419, %cst_166 {dimension_numbers = #tpu.dot_dimension_numbers<[1], [0], [0], [1], [0, 0, 1, 1], [], []>} : vector<16x64xbf16>, vector<64x32xbf16>, vector<16x32xf32> -> vector<16x32xf32>
    %c1_167 = arith.constant 1 : index
    %c0_168 = arith.constant 0 : index
    %c0_169 = arith.constant 0 : index
    %421 = vector.load %arg14[%c1_167, %c0_168, %c0_169] : memref<2x1x32xf32, #tpu.memory_space<vmem>>, vector<1x1x32xf32>
    %422 = vector.shape_cast %421 : vector<1x1x32xf32> to vector<1x32xf32>
    %423 = vector.broadcast %422 : vector<1x32xf32> to vector<16x32xf32>
    %424 = arith.addf %420, %423 : vector<16x32xf32>
    %425 = arith.addf %424, %368 : vector<16x32xf32>
    %c1_170 = arith.constant 1 : index
    %c0_171 = arith.constant 0 : index
    %c0_172 = arith.constant 0 : index
    %426 = vector.load %arg15[%c1_170, %c0_171, %c0_172] : memref<2x1x32xf32, #tpu.memory_space<vmem>>, vector<1x1x32xf32>
    %427 = vector.shape_cast %426 : vector<1x1x32xf32> to vector<1x32xf32>
    %c1_173 = arith.constant 1 : index
    %c0_174 = arith.constant 0 : index
    %c0_175 = arith.constant 0 : index
    %428 = vector.load %arg16[%c1_173, %c0_174, %c0_175] : memref<2x1x32xf32, #tpu.memory_space<vmem>>, vector<1x1x32xf32>
    %429 = vector.shape_cast %428 : vector<1x1x32xf32> to vector<1x32xf32>
    %cst_176 = arith.constant dense<0.000000e+00> : vector<16xf32>
    %430 = vector.multi_reduction <add>, %425, %cst_176 [1] : vector<16x32xf32> to vector<16xf32>
    %431 = vector.shape_cast %430 : vector<16xf32> to vector<16x1xf32>
    %cst_177 = arith.constant 3.200000e+01 : f32
    %432 = vector.broadcast %cst_177 : f32 to vector<16x1xf32>
    %433 = arith.divf %431, %432 : vector<16x1xf32>
    %434 = vector.broadcast %433 : vector<16x1xf32> to vector<16x32xf32>
    %435 = arith.subf %425, %434 : vector<16x32xf32>
    %436 = arith.mulf %435, %435 : vector<16x32xf32>
    %cst_178 = arith.constant dense<0.000000e+00> : vector<16xf32>
    %437 = vector.multi_reduction <add>, %436, %cst_178 [1] : vector<16x32xf32> to vector<16xf32>
    %438 = vector.shape_cast %437 : vector<16xf32> to vector<16x1xf32>
    %cst_179 = arith.constant 3.200000e+01 : f32
    %439 = vector.broadcast %cst_179 : f32 to vector<16x1xf32>
    %440 = arith.divf %438, %439 : vector<16x1xf32>
    %cst_180 = arith.constant 9.99999996E-13 : f32
    %441 = vector.broadcast %cst_180 : f32 to vector<16x1xf32>
    %442 = arith.addf %440, %441 : vector<16x1xf32>
    %443 = math.rsqrt %442 : vector<16x1xf32>
    %444 = vector.broadcast %443 : vector<16x1xf32> to vector<16x32xf32>
    %445 = arith.mulf %435, %444 : vector<16x32xf32>
    %446 = vector.broadcast %427 : vector<1x32xf32> to vector<16x32xf32>
    %447 = arith.mulf %445, %446 : vector<16x32xf32>
    %448 = vector.broadcast %429 : vector<1x32xf32> to vector<16x32xf32>
    %449 = arith.addf %447, %448 : vector<16x32xf32>
    %450 = vector.extract_strided_slice %449 {offsets = [0, 0], sizes = [1, 32], strides = [1, 1]} : vector<16x32xf32> to vector<1x32xf32>
    %451 = vector.extract_strided_slice %449 {offsets = [8, 0], sizes = [1, 32], strides = [1, 1]} : vector<16x32xf32> to vector<1x32xf32>
    %452 = tpu.concatenate %450, %451 in 0 : vector<1x32xf32>, vector<1x32xf32> -> vector<2x32xf32>
    %453 = arith.truncf %452 : vector<2x32xf32> to vector<2x32xbf16>
    %c0_181 = arith.constant 0 : index
    %c0_182 = arith.constant 0 : index
    %454 = vector.load %arg17[%c0_181, %c0_182] : memref<32x32xbf16, #tpu.memory_space<vmem>>, vector<32x32xbf16>
    %cst_183 = arith.constant dense<0.000000e+00> : vector<2x32xf32>
    %455 = tpu.matmul %453, %454, %cst_183 {dimension_numbers = #tpu.dot_dimension_numbers<[1], [0], [0], [1], [0, 0, 1, 1], [], []>} : vector<2x32xbf16>, vector<32x32xbf16>, vector<2x32xf32> -> vector<2x32xf32>
    %c0_184 = arith.constant 0 : index
    %c0_185 = arith.constant 0 : index
    %456 = vector.load %arg18[%c0_184, %c0_185] : memref<1x32xf32, #tpu.memory_space<vmem>>, vector<1x32xf32>
    %457 = vector.broadcast %456 : vector<1x32xf32> to vector<2x32xf32>
    %458 = arith.addf %455, %457 : vector<2x32xf32>
    %459 = math.tanh %458 : vector<2x32xf32>
    %c0_186 = arith.constant 0 : index
    %c0_187 = arith.constant 0 : index
    %460 = vector.load %arg19[%c0_186, %c0_187] : memref<2x32xf32, #tpu.memory_space<vmem>>, vector<2x32xf32>
    tpu.vector_store %arg19[%c0_186, %c0_187], %459 {strides = array<i32>} : memref<2x32xf32, #tpu.memory_space<vmem>>, vector<2x32xf32>,
    return
  }
  func.func @transform_0(%arg0: i32) -> (i32, i32) {
    %c0_i32 = arith.constant 0 : i32
    %c0_i32_0 = arith.constant 0 : i32
    %c0_i32_1 = arith.constant 0 : i32
    return %c0_i32, %c0_i32_0 : i32, i32
  }
  func.func @transform_1(%arg0: i32) -> (i32, i32, i32) {
    %c0_i32 = arith.constant 0 : i32
    %c0_i32_0 = arith.constant 0 : i32
    %c0_i32_1 = arith.constant 0 : i32
    %c0_i32_2 = arith.constant 0 : i32
    return %c0_i32, %c0_i32_0, %c0_i32_1 : i32, i32, i32
  }
  func.func @transform_2(%arg0: i32) -> (i32, i32) {
    %c0_i32 = arith.constant 0 : i32
    %c0_i32_0 = arith.constant 0 : i32
    %c0_i32_1 = arith.constant 0 : i32
    return %c0_i32, %c0_i32_0 : i32, i32
  }
  func.func @transform_3(%arg0: i32) -> (i32, i32) {
    %c0_i32 = arith.constant 0 : i32
    %c0_i32_0 = arith.constant 0 : i32
    %c0_i32_1 = arith.constant 0 : i32
    return %c0_i32, %c0_i32_0 : i32, i32
  }
  func.func @transform_4(%arg0: i32) -> (i32, i32, i32) {
    %c0_i32 = arith.constant 0 : i32
    %c0_i32_0 = arith.constant 0 : i32
    %c0_i32_1 = arith.constant 0 : i32
    %c0_i32_2 = arith.constant 0 : i32
    return %c0_i32, %c0_i32_0, %c0_i32_1 : i32, i32, i32
  }
  func.func @transform_5(%arg0: i32) -> (i32, i32, i32) {
    %c0_i32 = arith.constant 0 : i32
    %c0_i32_0 = arith.constant 0 : i32
    %c0_i32_1 = arith.constant 0 : i32
    %c0_i32_2 = arith.constant 0 : i32
    return %c0_i32, %c0_i32_0, %c0_i32_1 : i32, i32, i32
  }
  func.func @transform_6(%arg0: i32) -> (i32, i32, i32) {
    %c0_i32 = arith.constant 0 : i32
    %c0_i32_0 = arith.constant 0 : i32
    %c0_i32_1 = arith.constant 0 : i32
    %c0_i32_2 = arith.constant 0 : i32
    return %c0_i32, %c0_i32_0, %c0_i32_1 : i32, i32, i32
  }
  func.func @transform_7(%arg0: i32) -> (i32, i32, i32) {
    %c0_i32 = arith.constant 0 : i32
    %c0_i32_0 = arith.constant 0 : i32
    %c0_i32_1 = arith.constant 0 : i32
    %c0_i32_2 = arith.constant 0 : i32
    return %c0_i32, %c0_i32_0, %c0_i32_1 : i32, i32, i32
  }
  func.func @transform_8(%arg0: i32) -> (i32, i32, i32) {
    %c0_i32 = arith.constant 0 : i32
    %c0_i32_0 = arith.constant 0 : i32
    %c0_i32_1 = arith.constant 0 : i32
    %c0_i32_2 = arith.constant 0 : i32
    return %c0_i32, %c0_i32_0, %c0_i32_1 : i32, i32, i32
  }
  func.func @transform_9(%arg0: i32) -> (i32, i32, i32) {
    %c0_i32 = arith.constant 0 : i32
    %c0_i32_0 = arith.constant 0 : i32
    %c0_i32_1 = arith.constant 0 : i32
    %c0_i32_2 = arith.constant 0 : i32
    return %c0_i32, %c0_i32_0, %c0_i32_1 : i32, i32, i32
  }
  func.func @transform_10(%arg0: i32) -> (i32, i32, i32) {
    %c0_i32 = arith.constant 0 : i32
    %c0_i32_0 = arith.constant 0 : i32
    %c0_i32_1 = arith.constant 0 : i32
    %c0_i32_2 = arith.constant 0 : i32
    return %c0_i32, %c0_i32_0, %c0_i32_1 : i32, i32, i32
  }
  func.func @transform_11(%arg0: i32) -> (i32, i32, i32) {
    %c0_i32 = arith.constant 0 : i32
    %c0_i32_0 = arith.constant 0 : i32
    %c0_i32_1 = arith.constant 0 : i32
    %c0_i32_2 = arith.constant 0 : i32
    return %c0_i32, %c0_i32_0, %c0_i32_1 : i32, i32, i32
  }
  func.func @transform_12(%arg0: i32) -> (i32, i32, i32) {
    %c0_i32 = arith.constant 0 : i32
    %c0_i32_0 = arith.constant 0 : i32
    %c0_i32_1 = arith.constant 0 : i32
    %c0_i32_2 = arith.constant 0 : i32
    return %c0_i32, %c0_i32_0, %c0_i32_1 : i32, i32, i32
  }
  func.func @transform_13(%arg0: i32) -> (i32, i32, i32) {
    %c0_i32 = arith.constant 0 : i32
    %c0_i32_0 = arith.constant 0 : i32
    %c0_i32_1 = arith.constant 0 : i32
    %c0_i32_2 = arith.constant 0 : i32
    return %c0_i32, %c0_i32_0, %c0_i32_1 : i32, i32, i32
  }
  func.func @transform_14(%arg0: i32) -> (i32, i32, i32) {
    %c0_i32 = arith.constant 0 : i32
    %c0_i32_0 = arith.constant 0 : i32
    %c0_i32_1 = arith.constant 0 : i32
    %c0_i32_2 = arith.constant 0 : i32
    return %c0_i32, %c0_i32_0, %c0_i32_1 : i32, i32, i32
  }
  func.func @transform_15(%arg0: i32) -> (i32, i32, i32) {
    %c0_i32 = arith.constant 0 : i32
    %c0_i32_0 = arith.constant 0 : i32
    %c0_i32_1 = arith.constant 0 : i32
    %c0_i32_2 = arith.constant 0 : i32
    return %c0_i32, %c0_i32_0, %c0_i32_1 : i32, i32, i32
  }
  func.func @transform_16(%arg0: i32) -> (i32, i32) {
    %c0_i32 = arith.constant 0 : i32
    %c0_i32_0 = arith.constant 0 : i32
    %c0_i32_1 = arith.constant 0 : i32
    return %c0_i32, %c0_i32_0 : i32, i32
  }
  func.func @transform_17(%arg0: i32) -> (i32, i32) {
    %c0_i32 = arith.constant 0 : i32
    %c0_i32_0 = arith.constant 0 : i32
    %c0_i32_1 = arith.constant 0 : i32
    return %c0_i32, %c0_i32_0 : i32, i32
  }
  func.func @transform_18(%arg0: i32) -> (i32, i32) {
    %c0_i32 = arith.constant 0 : i32
    %c0_i32_0 = arith.constant 0 : i32
    %c0_i32_1 = arith.constant 0 : i32
    return %c0_i32, %c0_i32_0 : i32, i32
  }
}

</mosaic_0001>

<bundles_post_ra>
// kernel: bert_encoder_forward.1
= control target key start
LH: loop header
LB: loop body
LE: loop exit
PB: predicated region body
PF: predicated region fallthrough
CT: control target
= control target key end

     0   :  { %s5163_s0 = inlined_call_operand.hbm [shape: f32[16,32], index: 0, kind: input, shape index: {}]   ;;  %s5164_s1 = inlined_call_operand.hbm [shape: f32[2,1,8], index: 1, kind: input, shape index: {}]   ;;  %s5165_s2 = inlined_call_operand.hbm [shape: f32[1,32], index: 2, kind: input, shape index: {}]   ;;  %s5166_s3 = inlined_call_operand.hbm [shape: f32[1,32], index: 3, kind: input, shape index: {}]   ;;  %s5167_s4 = inlined_call_operand.hbm [shape: bf16[2,32,96], index: 4, kind: input, shape index: {}]   ;;  %s5168_s5 = inlined_call_operand.hbm [shape: f32[2,1,96], index: 5, kind: input, shape index: {}]   ;;  %s5169_s6 = inlined_call_operand.hbm [shape: bf16[2,32,32], index: 6, kind: input, shape index: {}]   ;;  %s5170_s7 = inlined_call_operand.hbm [shape: f32[2,1,32], index: 7, kind: input, shape index: {}]   ;;  %s5171_s8 = inlined_call_operand.hbm [shape: f32[2,1,32], index: 8, kind: input, shape index: {}]   ;;  %s5172_s9 = inlined_call_operand.hbm [shape: f32[2,1,32], index: 9, kind: input, shape index: {}]   ;;  %s5173_s10 = inlined_call_operand.hbm [shape: bf16[2,32,64], index: 10, kind: input, shape index: {}]   ;;  %s5174_s11 = inlined_call_operand.hbm [shape: f32[2,1,64], index: 11, kind: input, shape index: {}]   ;;  %s5175_s12 = inlined_call_operand.hbm [shape: bf16[2,64,32], index: 12, kind: input, shape index: {}]   ;;  %s5176_s13 = inlined_call_operand.hbm [shape: f32[2,1,32], index: 13, kind: input, shape index: {}]   ;;  %s5177_s14 = inlined_call_operand.hbm [shape: f32[2,1,32], index: 14, kind: input, shape index: {}]   ;;  %s5178_s15 = inlined_call_operand.hbm [shape: f32[2,1,32], index: 15, kind: input, shape index: {}]   ;;  %s5179_s16 = inlined_call_operand.hbm [shape: bf16[32,32], index: 16, kind: input, shape index: {}]   ;;  %s5180_s17 = inlined_call_operand.hbm [shape: f32[1,32], index: 17, kind: input, shape index: {}]   ;;  %s5181_s18 = inlined_call_operand.hbm [shape: f32[2,32], index: 18, kind: output, shape index: {}]  }
   0x1   :  { %5187 = sst [smem:[#allocation43_spill]] %s5163_s0 }
   0x2   :  { %5188 = sst [smem:[#allocation44_spill]] %s5164_s1 }
   0x3   :  { %5189 = sst [smem:[#allocation45_spill]] %s5165_s2 }
   0x4   :  { %5190 = sst [smem:[#allocation46_spill]] %s5180_s17 }
   0x5   :  { %5191 = sst [smem:[#allocation47_spill]] %s5181_s18 }
   0x6   :  { %23 = vsyncpa [#allocation3], 0 }
   0x7   :  { %24 = vsyncpa [#allocation6], 0 }
   0x8   :  { %25 = vsyncpa [#allocation9], 0 }
   0x9   :  { %26 = vsyncpa [#allocation12], 0 }
   0xa   :  { %27 = vsyncpa [#allocation15], 0 }
   0xb   :  { %28 = vsyncpa [#allocation18], 0 }
   0xc   :  { %29 = vsyncpa [#allocation21], 0 }
   0xd   :  { %30 = vsyncpa [#allocation24], 0 }
   0xe   :  { %31 = vsyncpa [#allocation27], 0 }
   0xf   :  { %32 = vsyncpa [#allocation30], 0 }
  0x10   :  { %33 = vsyncpa [#allocation4], 0  ;;  %s4294_s27 = smov [#allocation5]   ;;  %s5192_s0 = sld [smem:[#allocation44_spill]] }
  0x11   :  { %s51_s28 = sshll.u32 %s4294_s27, 4  ;;  %s52_s28 = int_to_ptr.vmem [resolvable:$true] %s51_s28 }
  0x16   :  { %s3854_s19 = scalar_lea.hbm %s5192_s0, 32 }
  0x17   :  { %p3855_p0 = scmp.ne.s32.totalorder %s5192_s0, %s3854_s19  ;;  %p3858_p1 = scmp.lt.u32.totalorder %s3854_s19, %s5192_s0 }
  0x19   :  { %p3860_p2 = pnand %p3858_p1, %p3855_p0 }
  0x1b   :  { %3863 = shalt.err (!%p3860_p2)
}
  0x1c   :  { %s3864_s2 = scalar_lea.vmem %s52_s28, 32  ;;  %p3869_p4 = scmp.lt.s32.totalorder %s52_s28, %s52_s28 }
  0x1d   :  { %p3865_p3 = scmp.ne.s32.totalorder %s52_s28, %s3864_s2  ;;  %p3870_p5 = scmp.lt.s32.totalorder %s3864_s2, %s3864_s2 }
  0x1f   :  { %p3871_p6 = por %p3870_p5, %p3869_p4 }
  0x21   :  { %p3872_p7 = pnand %p3871_p6, %p3865_p3 }
  0x23   :  { %3875 = shalt.err (!%p3872_p7)
}
  0x24   :  { %s4295_s23 = smov 16   ;;  %s4296_s24 = smov 1  }
  0x25   :  { %57 = dma.hbm_to_vmem [thread:$0]  %s5192_s0, 32, %s52_s28, [#allocation6], %s4295_s23, %s4295_s23, %s4296_s24  }
  0x26   :  { %s4297_s27 = smov [#allocation8]   ;;  %s4298_s30 = smov [#allocation11]  }
  0x27   :  { %s74_s29 = sshll.u32 %s4297_s27, 4  ;;  %s95_s19 = sshll.u32 %s4298_s30, 4  ;;  %s75_s29 = int_to_ptr.vmem [resolvable:$true] %s74_s29  ;;  %s96_s19 = int_to_ptr.vmem [resolvable:$true] %s95_s19 }
  0x28   :  { %s3876_s21 = scalar_lea.hbm %s5166_s3, 16 }
  0x29   :  { %p3877_p8 = scmp.ne.s32.totalorder %s5166_s3, %s3876_s21  ;;  %p3880_p9 = scmp.lt.u32.totalorder %s3876_s21, %s5166_s3 }
  0x2b   :  { %p3882_p10 = pnand %p3880_p9, %p3877_p8 }
  0x2d   :  { %3885 = shalt.err (!%p3882_p10)
}
  0x2e   :  { %s3886_s28 = scalar_lea.vmem %s75_s29, 16  ;;  %s3890_s0 = scalar_lea.vmem %s75_s29, 32 }
  0x2f   :  { %p3887_p11 = scmp.ne.s32.totalorder %s75_s29, %s3886_s28  ;;  %p3891_p12 = scmp.lt.s32.totalorder %s75_s29, %s75_s29 }
  0x30   :  { %p3892_p13 = scmp.lt.s32.totalorder %s3890_s0, %s3886_s28 }
  0x32   :  { %p3893_p0 = por %p3892_p13, %p3891_p12 }
  0x34   :  { %p3894_p1 = pnand %p3893_p0, %p3887_p11 }
  0x36   :  { %3897 = shalt.err (!%p3894_p1)
}
  0x37   :  { %77 = dma.hbm_to_vmem [thread:$0]  %s5166_s3, 16, %s75_s29, [#allocation9]  }
  0x38   :  { %s3898_s17 = scalar_lea.hbm %s5168_s5, 32 }
  0x39   :  { %p3899_p2 = scmp.ne.s32.totalorder %s5168_s5, %s3898_s17  ;;  %p3902_p3 = scmp.lt.u32.totalorder %s3898_s17, %s5168_s5 }
  0x3b   :  { %p3904_p4 = pnand %p3902_p3, %p3899_p2 }
  0x3d   :  { %3907 = shalt.err (!%p3904_p4)
}
  0x3e   :  { %s3908_s22 = scalar_lea.vmem %s96_s19, 32  ;;  %p3913_p6 = scmp.lt.s32.totalorder %s96_s19, %s96_s19 }
  0x3f   :  { %p3909_p5 = scmp.ne.s32.totalorder %s96_s19, %s3908_s22  ;;  %p3914_p7 = scmp.lt.s32.totalorder %s3908_s22, %s3908_s22 }
  0x41   :  { %p3915_p8 = por %p3914_p7, %p3913_p6 }
  0x43   :  { %p3916_p9 = pnand %p3915_p8, %p3909_p5 }
  0x45   :  { %3919 = shalt.err (!%p3916_p9)
}
  0x46   :  { %101 = dma.hbm_to_vmem [thread:$0]  %s5168_s5, 32, %s96_s19, [#allocation12], %s4295_s23, %s4295_s23, %s4296_s24  }
  0x47   :  { %s4299_s2 = smov [#allocation14]   ;;  %s4300_s0 = smov [#allocation17]  }
  0x48   :  { %s119_s28 = sshll.u32 %s4299_s2, 4  ;;  %s143_s25 = sshll.u32 %s4300_s0, 4  ;;  %s120_s28 = int_to_ptr.vmem [resolvable:$true] %s119_s28  ;;  %s144_s25 = int_to_ptr.vmem [resolvable:$true] %s143_s25 }
  0x49   :  { %s3920_s30 = scalar_lea.hbm %s5170_s7, 32 }
  0x4a   :  { %p3921_p10 = scmp.ne.s32.totalorder %s5170_s7, %s3920_s30  ;;  %p3924_p11 = scmp.lt.u32.totalorder %s3920_s30, %s5170_s7 }
  0x4c   :  { %p3926_p12 = pnand %p3924_p11, %p3921_p10 }
  0x4e   :  { %3929 = shalt.err (!%p3926_p12)
}
  0x4f   :  { %s3930_s5 = scalar_lea.vmem %s120_s28, 32  ;;  %p3935_p0 = scmp.lt.s32.totalorder %s120_s28, %s120_s28 }
  0x50   :  { %p3931_p13 = scmp.ne.s32.totalorder %s120_s28, %s3930_s5  ;;  %p3936_p1 = scmp.lt.s32.totalorder %s3930_s5, %s3930_s5 }
  0x52   :  { %p3937_p2 = por %p3936_p1, %p3935_p0 }
  0x54   :  { %p3938_p3 = pnand %p3937_p2, %p3931_p13 }
  0x56   :  { %3941 = shalt.err (!%p3938_p3)
}
  0x57   :  { %125 = dma.hbm_to_vmem [thread:$0]  %s5170_s7, 32, %s120_s28, [#allocation15], %s4295_s23, %s4295_s23, %s4296_s24  }
  0x58   :  { %s3942_s29 = scalar_lea.hbm %s5172_s9, 32 }
  0x59   :  { %p3943_p4 = scmp.ne.s32.totalorder %s5172_s9, %s3942_s29  ;;  %p3946_p5 = scmp.lt.u32.totalorder %s3942_s29, %s5172_s9 }
  0x5b   :  { %p3948_p6 = pnand %p3946_p5, %p3943_p4 }
  0x5d   :  { %3951 = shalt.err (!%p3948_p6)
}
  0x5e   :  { %s3952_s30 = scalar_lea.vmem %s144_s25, 32  ;;  %p3957_p8 = scmp.lt.s32.totalorder %s144_s25, %s144_s25 }
  0x5f   :  { %p3953_p7 = scmp.ne.s32.totalorder %s144_s25, %s3952_s30  ;;  %p3958_p9 = scmp.lt.s32.totalorder %s3952_s30, %s3952_s30 }
  0x61   :  { %p3959_p10 = por %p3958_p9, %p3957_p8 }
  0x63   :  { %p3960_p11 = pnand %p3959_p10, %p3953_p7 }
  0x65   :  { %3963 = shalt.err (!%p3960_p11)
}
  0x66   :  { %149 = dma.hbm_to_vmem [thread:$0]  %s5172_s9, 32, %s144_s25, [#allocation18], %s4295_s23, %s4295_s23, %s4296_s24  }
  0x67   :  { %s4301_s17 = smov [#allocation20]   ;;  %s4302_s1 = smov [#allocation23]  }
  0x68   :  { %s167_s18 = sshll.u32 %s4301_s17, 4  ;;  %s191_s20 = sshll.u32 %s4302_s1, 4  ;;  %s168_s18 = int_to_ptr.vmem [resolvable:$true] %s167_s18  ;;  %s192_s20 = int_to_ptr.vmem [resolvable:$true] %s191_s20 }
  0x69   :  { %s3964_s21 = scalar_lea.hbm %s5174_s11, 32 }
  0x6a   :  { %p3965_p12 = scmp.ne.s32.totalorder %s5174_s11, %s3964_s21  ;;  %p3968_p13 = scmp.lt.u32.totalorder %s3964_s21, %s5174_s11 }
  0x6c   :  { %p3970_p0 = pnand %p3968_p13, %p3965_p12 }
  0x6e   :  { %3973 = shalt.err (!%p3970_p0)
}
  0x6f   :  { %s3974_s9 = scalar_lea.vmem %s168_s18, 32  ;;  %p3979_p2 = scmp.lt.s32.totalorder %s168_s18, %s168_s18 }
  0x70   :  { %p3975_p1 = scmp.ne.s32.totalorder %s168_s18, %s3974_s9  ;;  %p3980_p3 = scmp.lt.s32.totalorder %s3974_s9, %s3974_s9 }
  0x72   :  { %p3981_p4 = por %p3980_p3, %p3979_p2 }
  0x74   :  { %p3982_p5 = pnand %p3981_p4, %p3975_p1 }
  0x76   :  { %3985 = shalt.err (!%p3982_p5)
}
  0x77   :  { %173 = dma.hbm_to_vmem [thread:$0]  %s5174_s11, 32, %s168_s18, [#allocation21], %s4295_s23, %s4295_s23, %s4296_s24  }
  0x78   :  { %s3986_s30 = scalar_lea.hbm %s5176_s13, 32 }
  0x79   :  { %p3987_p6 = scmp.ne.s32.totalorder %s5176_s13, %s3986_s30  ;;  %p3990_p7 = scmp.lt.u32.totalorder %s3986_s30, %s5176_s13 }
  0x7b   :  { %p3992_p8 = pnand %p3990_p7, %p3987_p6 }
  0x7d   :  { %3995 = shalt.err (!%p3992_p8)
}
  0x7e   :  { %s3996_s5 = scalar_lea.vmem %s192_s20, 32  ;;  %p4001_p10 = scmp.lt.s32.totalorder %s192_s20, %s192_s20 }
  0x7f   :  { %p3997_p9 = scmp.ne.s32.totalorder %s192_s20, %s3996_s5  ;;  %p4002_p11 = scmp.lt.s32.totalorder %s3996_s5, %s3996_s5 }
  0x81   :  { %p4003_p12 = por %p4002_p11, %p4001_p10 }
  0x83   :  { %p4004_p13 = pnand %p4003_p12, %p3997_p9 }
  0x85   :  { %4007 = shalt.err (!%p4004_p13)
}
  0x86   :  { %197 = dma.hbm_to_vmem [thread:$0]  %s5176_s13, 32, %s192_s20, [#allocation24], %s4295_s23, %s4295_s23, %s4296_s24  }
  0x87   :  { %s4303_s19 = smov [#allocation26]   ;;  %s4304_s22 = smov [#allocation2]  }
  0x88   :  { %s215_s21 = sshll.u32 %s4303_s19, 4  ;;  %s39_s3 = sshll.u32 %s4304_s22, 4  ;;  %s216_s21 = int_to_ptr.vmem [resolvable:$true] %s215_s21  ;;  %s40_s3 = int_to_ptr.vmem [resolvable:$true] %s39_s3 }
  0x89   :  { %s4008_s9 = scalar_lea.hbm %s5178_s15, 32 }
  0x8a   :  { %p4009_p0 = scmp.ne.s32.totalorder %s5178_s15, %s4008_s9  ;;  %p4012_p1 = scmp.lt.u32.totalorder %s4008_s9, %s5178_s15 }
  0x8c   :  { %p4014_p2 = pnand %p4012_p1, %p4009_p0 }
  0x8e   :  { %4017 = shalt.err (!%p4014_p2)
}
  0x8f   :  { %s4018_s13 = scalar_lea.vmem %s216_s21, 32  ;;  %p4023_p4 = scmp.lt.s32.totalorder %s216_s21, %s216_s21 }
  0x90   :  { %p4019_p3 = scmp.ne.s32.totalorder %s216_s21, %s4018_s13  ;;  %p4024_p5 = scmp.lt.s32.totalorder %s4018_s13, %s4018_s13 }
  0x92   :  { %p4025_p6 = por %p4024_p5, %p4023_p4 }
  0x94   :  { %p4026_p7 = pnand %p4025_p6, %p4019_p3 }
  0x96   :  { %4029 = shalt.err (!%p4026_p7)
}
  0x97   :  { %221 = dma.hbm_to_vmem [thread:$0]  %s5178_s15, 32, %s216_s21, [#allocation27], %s4295_s23, %s4295_s23, %s4296_s24  }
  0x98   :  { %s5193_s17 = sld [smem:[#allocation43_spill]] }
  0x9e   :  { %s4030_s1 = scalar_lea.hbm %s5193_s17, 256 }
  0x9f   :  { %p4031_p8 = scmp.ne.s32.totalorder %s5193_s17, %s4030_s1  ;;  %p4034_p9 = scmp.lt.u32.totalorder %s4030_s1, %s5193_s17 }
  0xa1   :  { %p4036_p10 = pnand %p4034_p9, %p4031_p8 }
  0xa3   :  { %4039 = shalt.err (!%p4036_p10)
}
  0xa4   :  { %s4040_s22 = scalar_lea.vmem %s40_s3, 256  ;;  %p4045_p12 = scmp.lt.s32.totalorder %s40_s3, %s40_s3 }
  0xa5   :  { %p4041_p11 = scmp.ne.s32.totalorder %s40_s3, %s4040_s22  ;;  %p4046_p13 = scmp.lt.s32.totalorder %s4040_s22, %s4040_s22 }
  0xa7   :  { %p4047_p0 = por %p4046_p13, %p4045_p12 }
  0xa9   :  { %p4048_p1 = pnand %p4047_p0, %p4041_p11 }
  0xab   :  { %4051 = shalt.err (!%p4048_p1)
}
  0xac   :  { %s4305_s15 = smov 128   ;;  %s4306_s21 = smov 8  }
  0xad   :  { %45 = dma.hbm_to_vmem [thread:$0]  %s5193_s17, 256, %s40_s3, [#allocation3], %s4305_s15, %s4305_s15, %s4306_s21  }
  0xae   :  { %s4307_s9 = smov [#allocation7]   ;;  %s4308_s0 = smov [#allocation10]  }
  0xaf   :  { %s64_s25 = sshll.u32 %s4307_s9, 4  ;;  %s83_s26 = sshll.u32 %s4308_s0, 4  ;;  %s65_s25 = int_to_ptr.vmem [resolvable:$true] %s64_s25  ;;  %s84_s26 = int_to_ptr.vmem [resolvable:$true] %s83_s26 }
  0xb0   :  { %s5194_s20 = sld [smem:[#allocation45_spill]] }
  0xb6   :  { %s4052_s30 = scalar_lea.hbm %s5194_s20, 16 }
  0xb7   :  { %p4053_p2 = scmp.ne.s32.totalorder %s5194_s20, %s4052_s30  ;;  %p4056_p3 = scmp.lt.u32.totalorder %s4052_s30, %s5194_s20 }
  0xb9   :  { %p4058_p4 = pnand %p4056_p3, %p4053_p2 }
  0xbb   :  { %4061 = shalt.err (!%p4058_p4)
}
  0xbc   :  { %s4062_s3 = scalar_lea.vmem %s65_s25, 16  ;;  %s4066_s17 = scalar_lea.vmem %s65_s25, 32 }
  0xbd   :  { %p4063_p5 = scmp.ne.s32.totalorder %s65_s25, %s4062_s3  ;;  %p4067_p6 = scmp.lt.s32.totalorder %s65_s25, %s65_s25 }
  0xbe   :  { %p4068_p7 = scmp.lt.s32.totalorder %s4066_s17, %s4062_s3 }
  0xc0   :  { %p4069_p8 = por %p4068_p7, %p4067_p6 }
  0xc2   :  { %p4070_p9 = pnand %p4069_p8, %p4063_p5 }
  0xc4   :  { %4073 = shalt.err (!%p4070_p9)
}
  0xc5   :  { %67 = dma.hbm_to_vmem [thread:$0]  %s5194_s20, 16, %s65_s25, [#allocation6]  }
  0xc6   :  { %s4074_s15 = scalar_lea.hbm %s5167_s4, 512 }
  0xc7   :  { %p4075_p10 = scmp.ne.s32.totalorder %s5167_s4, %s4074_s15  ;;  %p4078_p11 = scmp.lt.u32.totalorder %s4074_s15, %s5167_s4 }
  0xc9   :  { %p4080_p12 = pnand %p4078_p11, %p4075_p10 }
  0xcb   :  { %4083 = shalt.err (!%p4080_p12)
}
  0xcc   :  { %s4084_s27 = scalar_lea.vmem %s84_s26, 512  ;;  %p4089_p0 = scmp.lt.s32.totalorder %s84_s26, %s84_s26 }
  0xcd   :  { %p4085_p13 = scmp.ne.s32.totalorder %s84_s26, %s4084_s27  ;;  %p4090_p1 = scmp.lt.s32.totalorder %s4084_s27, %s4084_s27 }
  0xcf   :  { %p4091_p2 = por %p4090_p1, %p4089_p0 }
  0xd1   :  { %p4092_p3 = pnand %p4091_p2, %p4085_p13 }
  0xd3   :  { %4095 = shalt.err (!%p4092_p3)
}
  0xd4   :  { %s4309_s25 = smov 64   ;;  %s4310_s13 = smov 4  }
  0xd5   :  { %89 = dma.hbm_to_vmem [thread:$0]  %s5167_s4, 512, %s84_s26, [#allocation9], %s4309_s25, %s4309_s25, %s4310_s13  }
  0xd6   :  { %s4311_s7 = smov [#allocation13]   ;;  %s4312_s1 = smov [#allocation16]  }
  0xd7   :  { %s107_s28 = sshll.u32 %s4311_s7, 4  ;;  %s131_s5 = sshll.u32 %s4312_s1, 4  ;;  %s108_s28 = int_to_ptr.vmem [resolvable:$true] %s107_s28  ;;  %s132_s5 = int_to_ptr.vmem [resolvable:$true] %s131_s5 }
  0xd8   :  { %s4096_s11 = scalar_lea.hbm %s5169_s6, 512 }
  0xd9   :  { %p4097_p4 = scmp.ne.s32.totalorder %s5169_s6, %s4096_s11  ;;  %p4100_p5 = scmp.lt.u32.totalorder %s4096_s11, %s5169_s6 }
  0xdb   :  { %p4102_p6 = pnand %p4100_p5, %p4097_p4 }
  0xdd   :  { %4105 = shalt.err (!%p4102_p6)
}
  0xde   :  { %s4106_s4 = scalar_lea.vmem %s108_s28, 512  ;;  %p4111_p8 = scmp.lt.s32.totalorder %s108_s28, %s108_s28 }
  0xdf   :  { %p4107_p7 = scmp.ne.s32.totalorder %s108_s28, %s4106_s4  ;;  %p4112_p9 = scmp.lt.s32.totalorder %s4106_s4, %s4106_s4 }
  0xe1   :  { %p4113_p10 = por %p4112_p9, %p4111_p8 }
  0xe3   :  { %p4114_p11 = pnand %p4113_p10, %p4107_p7 }
  0xe5   :  { %4117 = shalt.err (!%p4114_p11)
}
  0xe6   :  { %113 = dma.hbm_to_vmem [thread:$0]  %s5169_s6, 512, %s108_s28, [#allocation12], %s4309_s25, %s4309_s25, %s4310_s13  }
  0xe7   :  { %s4118_s0 = scalar_lea.hbm %s5171_s8, 32 }
  0xe8   :  { %p4119_p12 = scmp.ne.s32.totalorder %s5171_s8, %s4118_s0  ;;  %p4122_p13 = scmp.lt.u32.totalorder %s4118_s0, %s5171_s8 }
  0xea   :  { %p4124_p0 = pnand %p4122_p13, %p4119_p12 }
  0xec   :  { %4127 = shalt.err (!%p4124_p0)
}
  0xed   :  { %s4128_s1 = scalar_lea.vmem %s132_s5, 32  ;;  %p4133_p2 = scmp.lt.s32.totalorder %s132_s5, %s132_s5 }
  0xee   :  { %p4129_p1 = scmp.ne.s32.totalorder %s132_s5, %s4128_s1  ;;  %p4134_p3 = scmp.lt.s32.totalorder %s4128_s1, %s4128_s1 }
  0xf0   :  { %p4135_p4 = por %p4134_p3, %p4133_p2 }
  0xf2   :  { %p4136_p5 = pnand %p4135_p4, %p4129_p1 }
  0xf4   :  { %4139 = shalt.err (!%p4136_p5)
}
  0xf5   :  { %137 = dma.hbm_to_vmem [thread:$0]  %s5171_s8, 32, %s132_s5, [#allocation15], %s4295_s23, %s4295_s23, %s4296_s24  }
  0xf6   :  { %s4313_s3 = smov [#allocation19]   ;;  %s4314_s11 = smov [#allocation22]  }
  0xf7   :  { %s155_s17 = sshll.u32 %s4313_s3, 4  ;;  %s179_s18 = sshll.u32 %s4314_s11, 4  ;;  %s156_s17 = int_to_ptr.vmem [resolvable:$true] %s155_s17  ;;  %s180_s18 = int_to_ptr.vmem [resolvable:$true] %s179_s18 }
  0xf8   :  { %s4140_s15 = scalar_lea.hbm %s5173_s10, 512 }
  0xf9   :  { %p4141_p6 = scmp.ne.s32.totalorder %s5173_s10, %s4140_s15  ;;  %p4144_p7 = scmp.lt.u32.totalorder %s4140_s15, %s5173_s10 }
  0xfb   :  { %p4146_p8 = pnand %p4144_p7, %p4141_p6 }
  0xfd   :  { %4149 = shalt.err (!%p4146_p8)
}
  0xfe   :  { %s4150_s8 = scalar_lea.vmem %s156_s17, 512  ;;  %p4155_p10 = scmp.lt.s32.totalorder %s156_s17, %s156_s17 }
  0xff   :  { %p4151_p9 = scmp.ne.s32.totalorder %s156_s17, %s4150_s8  ;;  %p4156_p11 = scmp.lt.s32.totalorder %s4150_s8, %s4150_s8 }
 0x101   :  { %p4157_p12 = por %p4156_p11, %p4155_p10 }
 0x103   :  { %p4158_p13 = pnand %p4157_p12, %p4151_p9 }
 0x105   :  { %4161 = shalt.err (!%p4158_p13)
}
 0x106   :  { %161 = dma.hbm_to_vmem [thread:$0]  %s5173_s10, 512, %s156_s17, [#allocation18], %s4309_s25, %s4309_s25, %s4310_s13  }
 0x107   :  { %s4162_s20 = scalar_lea.hbm %s5175_s12, 1024 }
 0x108   :  { %p4163_p0 = scmp.ne.s32.totalorder %s5175_s12, %s4162_s20  ;;  %p4166_p1 = scmp.lt.u32.totalorder %s4162_s20, %s5175_s12 }
 0x10a   :  { %p4168_p2 = pnand %p4166_p1, %p4163_p0 }
 0x10c   :  { %4171 = shalt.err (!%p4168_p2)
}
 0x10d   :  { %s4172_s28 = scalar_lea.vmem %s180_s18, 1024  ;;  %p4177_p4 = scmp.lt.s32.totalorder %s180_s18, %s180_s18 }
 0x10e   :  { %p4173_p3 = scmp.ne.s32.totalorder %s180_s18, %s4172_s28  ;;  %p4178_p5 = scmp.lt.s32.totalorder %s4172_s28, %s4172_s28 }
 0x110   :  { %p4179_p6 = por %p4178_p5, %p4177_p4 }
 0x112   :  { %p4180_p7 = pnand %p4179_p6, %p4173_p3 }
 0x114   :  { %4183 = shalt.err (!%p4180_p7)
}
 0x115   :  { %185 = dma.hbm_to_vmem [thread:$0]  %s5175_s12, 1024, %s180_s18, [#allocation21], %s4309_s25, %s4309_s25, %s4310_s13  }
 0x116   :  { %s4315_s17 = smov [#allocation25]   ;;  %s4316_s19 = smov [#allocation28]  }
 0x117   :  { %s203_s11 = sshll.u32 %s4315_s17, 4  ;;  %s227_s22 = sshll.u32 %s4316_s19, 4  ;;  %s204_s11 = int_to_ptr.vmem [resolvable:$true] %s203_s11  ;;  %s228_s22 = int_to_ptr.vmem [resolvable:$true] %s227_s22 }
 0x118   :  { %s4184_s26 = scalar_lea.hbm %s5177_s14, 32 }
 0x119   :  { %p4185_p8 = scmp.ne.s32.totalorder %s5177_s14, %s4184_s26  ;;  %p4188_p9 = scmp.lt.u32.totalorder %s4184_s26, %s5177_s14 }
 0x11b   :  { %p4190_p10 = pnand %p4188_p9, %p4185_p8 }
 0x11d   :  { %4193 = shalt.err (!%p4190_p10)
}
 0x11e   :  { %s4194_s12 = scalar_lea.vmem %s204_s11, 32  ;;  %p4199_p12 = scmp.lt.s32.totalorder %s204_s11, %s204_s11 }
 0x11f   :  { %p4195_p11 = scmp.ne.s32.totalorder %s204_s11, %s4194_s12  ;;  %p4200_p13 = scmp.lt.s32.totalorder %s4194_s12, %s4194_s12 }
 0x121   :  { %p4201_p0 = por %p4200_p13, %p4199_p12 }
 0x123   :  { %p4202_p1 = pnand %p4201_p0, %p4195_p11 }
 0x125   :  { %4205 = shalt.err (!%p4202_p1)
}
 0x126   :  { %209 = dma.hbm_to_vmem [thread:$0]  %s5177_s14, 32, %s204_s11, [#allocation24], %s4295_s23, %s4295_s23, %s4296_s24  }
 0x127   :  { %s4206_s20 = scalar_lea.hbm %s5179_s16, 256 }
 0x128   :  { %p4207_p2 = scmp.ne.s32.totalorder %s5179_s16, %s4206_s20  ;;  %p4210_p3 = scmp.lt.u32.totalorder %s4206_s20, %s5179_s16 }
 0x12a   :  { %p4212_p4 = pnand %p4210_p3, %p4207_p2 }
 0x12c   :  { %4215 = shalt.err (!%p4212_p4)
}
 0x12d   :  { %s4216_s28 = scalar_lea.vmem %s228_s22, 256  ;;  %p4221_p6 = scmp.lt.s32.totalorder %s228_s22, %s228_s22 }
 0x12e   :  { %p4217_p5 = scmp.ne.s32.totalorder %s228_s22, %s4216_s28  ;;  %p4222_p7 = scmp.lt.s32.totalorder %s4216_s28, %s4216_s28 }
 0x130   :  { %p4223_p8 = por %p4222_p7, %p4221_p6 }
 0x132   :  { %p4224_p9 = pnand %p4223_p8, %p4217_p5 }
 0x134   :  { %4227 = shalt.err (!%p4224_p9)
}
 0x135   :  { %233 = dma.hbm_to_vmem [thread:$0]  %s5179_s16, 256, %s228_s22, [#allocation27], %s4309_s25, %s4309_s25, %s4310_s13  }
 0x136   :  { %s4317_s10 = smov [#allocation29]   ;;  %s5195_s19 = sld [smem:[#allocation46_spill]] }
 0x137   :  { %s240_s3 = sshll.u32 %s4317_s10, 4  ;;  %s241_s3 = int_to_ptr.vmem [resolvable:$true] %s240_s3 }
 0x13c   :  { %s4228_s15 = scalar_lea.hbm %s5195_s19, 16 }
 0x13d   :  { %p4229_p10 = scmp.ne.s32.totalorder %s5195_s19, %s4228_s15  ;;  %p4232_p11 = scmp.lt.u32.totalorder %s4228_s15, %s5195_s19 }
 0x13f   :  { %p4234_p12 = pnand %p4232_p11, %p4229_p10 }
 0x141   :  { %4237 = shalt.err (!%p4234_p12)
}
 0x142   :  { %s4238_s8 = scalar_lea.vmem %s241_s3, 16  ;;  %s4242_s16 = scalar_lea.vmem %s241_s3, 32 }
 0x143   :  { %p4239_p13 = scmp.ne.s32.totalorder %s241_s3, %s4238_s8  ;;  %p4243_p0 = scmp.lt.s32.totalorder %s241_s3, %s241_s3 }
 0x144   :  { %p4244_p1 = scmp.lt.s32.totalorder %s4242_s16, %s4238_s8 }
 0x146   :  { %p4245_p2 = por %p4244_p1, %p4243_p0 }
 0x148   :  { %p4246_p3 = pnand %p4245_p2, %p4239_p13 }
 0x14a   :  { %4249 = shalt.err (!%p4246_p3)
}
 0x14b   :  { %243 = dma.hbm_to_vmem [thread:$0]  %s5195_s19, 16, %s241_s3, [#allocation30]  }
 0x14c   :  { %4272 = dma.done.wait [#allocation3], 256  }
 0x14d   :  { %4273 = vsyncadd [#allocation3], 4294967040 }
 0x14e   :  { %4274 = dma.done.wait [#allocation6], 48  }
 0x14f   :  { %4275 = vsyncadd [#allocation6], 4294967248 }
 0x150   :  { %4276 = dma.done.wait [#allocation9], 528  }
 0x151   :  { %4277 = vsyncadd [#allocation9], 4294966768 }
 0x152   :  { %4278 = dma.done.wait [#allocation12], 544  }
 0x153   :  { %4279 = vsyncadd [#allocation12], 4294966752 }
 0x154   :  { %4280 = dma.done.wait [#allocation15], 64  }
 0x155   :  { %4281 = vsyncadd [#allocation15], 4294967232 }
 0x156   :  { %4282 = dma.done.wait [#allocation18], 544  }
 0x157   :  { %4283 = vsyncadd [#allocation18], 4294966752 }
 0x158   :  { %4284 = dma.done.wait [#allocation21], 1056  }
 0x159   :  { %4285 = vsyncadd [#allocation21], 4294966240 }
 0x15a   :  { %4286 = dma.done.wait [#allocation24], 64  }
 0x15b   :  { %4287 = vsyncadd [#allocation24], 4294967232 }
 0x15c   :  { %4288 = dma.done.wait [#allocation27], 288  }
 0x15d   :  { %4289 = vsyncadd [#allocation27], 4294967008 }
 0x15e   :  { %4290 = dma.done.wait [#allocation30], 16  }
 0x15f   :  { %4291 = vsyncadd [#allocation30], 4294967280  ;;  %vm303_vm0 = vcmask 261120   ;;  %v299_v0 = vld [vmem:[#allocation2] sm:$0xff]  ;;  %v300_v1 = vld [vmem:[#allocation2 + $0x8] sm:$0xff]  ;;  %v4318_v15 = vmov 0.0  }
 0x160   :  { %v304_v2 = vsel %vm303_vm0, %v299_v0, 0.0  ;;  %v307_v3 = vsel %vm303_vm0, %v300_v1, 0.0  ;;  %v3728_v14 = vld [vmem:[#allocation10] sm:$0xff]   ;;  %3388 = vmatprep.subr.bf16.mxu0 %v4318_v15  ;;  %vm4319_vm1 = vmmov 0   ;;  %v3729_v16 = vld [vmem:[#allocation10 + $0x8] sm:$0xff]   ;;  %3396 = vmatprep.subr.bf16.mxu1 %v4318_v15  ;;  %s4320_s5 = smov 96  }
 0x161   :  { %305 = vadd.xlane.f32.xlu0 %v304_v2  ;;  %3392 = vmatprep.mubr.msk.bf16.mxu0 %vm4319_vm1, %v4318_v15  ;;  %v3201_v25 = vld [vmem:[#allocation7] ss:$0 sm:$0xff]  ;;  %v3202_v29 = vld [vmem:[#allocation8] ss:$0 sm:$0xff]  ;;  %v3205_v34 = vld [vmem:[#allocation11] ss:$0 sm:$0xff] }
 0x162   :  { %3389 = vmatpush3.bf16.msra.mxu0 %v3728_v14  ;;  %3398 = vmatprep.mubr.msk.bf16.mxu1 %vm4319_vm1, %v4318_v15  ;;  %vm437_vm2 = vcmask 64512   ;;  %v4727_v48 = vld [vmem:[#allocation5] ss:$0 sm:$0xff]  ;;  %v4729_v53 = vld [vmem:[#allocation5 + $0x1] ss:$0 sm:$0xff]  ;;  %s4321_s12 = smov 88  }
 0x163   :  { %3390 = vmatprep.subr.bf16.mxu0 %v4318_v15  ;;  %vm565_vm3 = vcmask 1043456   ;;  %s4322_s18 = smov 120   ;;  %s4323_s9 = smov 56   ;;  %vm1355_vm4 = vcmask 130048   ;;  %vm1358_vm5 = vcmask 195584   ;;  %vm1637_vm8 = vcmask 523264  }
 0x164   :  { %s4324_s0 = smov 80   ;;  %s4325_s27 = smov 112   ;;  %vm3105_vm11 = vcmask 1040384   ;;  %vm3175_vm12 = vcmask 254976  }
 0x165   :  { %308 = vadd.xlane.f32.xlu0 %v307_v3  ;;  %s4326_s20 = smov 48   ;;  %s4327_s30 = smov 72  }
 0x166   :  { %3391 = vmatpush3.bf16.msra.mxu0 %v3729_v16  ;;  %s4328_s7 = smov 104   ;;  %s4329_s1 = smov 40  }
 0x167   :  { %3402 = vmatprep.subr.bf16.mxu0 %v4318_v15  ;;  %s4330_s6 = smov 24  }
 0x1ee   :  { %v306_v4 = vpop.xlane.xlu0 %305 }
 0x1ef   :  { %v311_v5 = vmul.f32 0.03125, %v306_v4 }
 0x1f1   :  { %v313_v6 = vsub.f32 %v299_v0, %v311_v5 }
 0x1f2   :  { %v309_v7 = vpop.xlane.xlu0 %308 }
 0x1f3   :  { %v312_v8 = vmul.f32 0.03125, %v309_v7  ;;  %v315_v9 = vmul.f32 %v313_v6, %v313_v6 }
 0x1f5   :  { %v314_v10 = vsub.f32 %v300_v1, %v312_v8  ;;  %v317_v11 = vsel %vm303_vm0, %v315_v9, 0.0 }
 0x1f6   :  { %318 = vadd.xlane.f32.xlu1 %v317_v11 }
 0x1f7   :  { %v316_v12 = vmul.f32 %v314_v10, %v314_v10 }
 0x1f9   :  { %v320_v13 = vsel %vm303_vm0, %v316_v12, 0.0 }
 0x1fa   :  { %321 = vadd.xlane.f32.xlu1 %v320_v13 }
 0x283   :  { %v319_v17 = vpop.xlane.xlu1 %318 }
 0x284   :  { %v323_v18 = vmul.f32 0.03125, %v319_v17 }
 0x286   :  { %v325_v19 = vadd.f32 1e-12, %v323_v18 }
 0x287   :  { %v322_v20 = vpop.xlane.xlu1 %321 }
 0x288   :  { %3750 = vrsqrt.f32 %v325_v19  ;;  %v324_v21 = vmul.f32 0.03125, %v322_v20 }
 0x28a   :  { %v326_v22 = vadd.f32 1e-12, %v324_v21 }
 0x28c   :  { %3752 = vrsqrt.f32 %v326_v22 }
 0x292   :  { %v3751_v23 = vpop.eup %3750 }
 0x293   :  { %v329_v24 = vmul.f32 %v3751_v23, %v313_v6 }
 0x295   :  { %v337_v28 = vmul.f32 %v3201_v25, %v329_v24 }
 0x296   :  { %v3753_v26 = vpop.eup %3752 }
 0x297   :  { %v330_v27 = vmul.f32 %v3753_v26, %v314_v10  ;;  %v4698_v31 = vadd.f32 %v3202_v29, %v337_v28 }
 0x299   :  { %v338_v30 = vmul.f32 %v3201_v25, %v330_v27 }
 0x29b   :  { %v4700_v32 = vadd.f32 %v3202_v29, %v338_v30 }
 0x29d   :  { %v361_v33 = vpack.c.bf16 %v4700_v32, %v4698_v31 }
 0x29f   :  { %3393 = vmatmul.mubr.msk.bf16.vlgmr.msra.gmra.mrb[0].mxu0 %vm303_vm0, %v361_v33 }
 0x2a0   :  { %3404 = vmatprep.mubr.msk.bf16.mxu0 %vm4319_vm1, %v4318_v15 }
 0x372   :  { %v422_v35 = vpop.f32.mrb[0].mxu0 }
 0x373   :  { %v423_v36 = vadd.f32 %v3205_v34, %v422_v35  ;;  %v3394_v37 = vpop.f32.mrb[1].mxu0 }
 0x374   :  { %v425_v38 = vpop.f32.mrb[2].mxu0 }
 0x375   :  { %v4707_v39 = vpack.c.bf16 %v423_v36, %v423_v36  ;;  %v426_v40 = vadd.f32 %v3205_v34, %v425_v38  ;;  %v3395_v41 = vpop.f32.mrb[3].mxu0 }
 0x377   :  { %v4709_v42 = vpack.c.bf16 %v426_v40, %v426_v40  ;;  %435 = vrot.lane.b32.xlu0 %v4707_v39, %s4320_s5 }
 0x379   :  { %484 = vrot.lane.b32.xlu1 %v4709_v42, %s4320_s5 }
 0x3e9   :  { %v436_v43 = vpop.permute.xlu0 %435 }
 0x3ea   :  { %v442_v44 = vsel %vm437_vm2, %v436_v43, 0 }
 0x3eb   :  { %3397 = vmatpush3.bf16.xpose.msra.mxu1 %v442_v44  ;;  %v485_v45 = vpop.permute.xlu1 %484 }
 0x3ec   :  { %v490_v46 = vsel %vm437_vm2, %v485_v45, 0  ;;  %3408 = vmatprep.subr.bf16.mxu1 %v4318_v15 }
 0x3ed   :  { %3403 = vmatpush3.bf16.xpose.msra.mxu0 %v490_v46 }
 0x3ee   :  { %3414 = vmatprep.subr.bf16.mxu0 %v4318_v15 }
 0x3f2   :  { %3399 = vmatmul.mubr.msk.bf16.vlgmr.msra.gmra.mrb[0].mxu1 %vm437_vm2, %v4707_v39 }
 0x3f3   :  { %3410 = vmatprep.mubr.msk.bf16.mxu1 %vm4319_vm1, %v4318_v15 }
 0x3f4   :  { %3405 = vmatmul.mubr.msk.bf16.vlgmr.msra.gmra.mrb[4].mxu0 %vm437_vm2, %v4709_v42 }
 0x3f5   :  { %3416 = vmatprep.mubr.msk.bf16.mxu0 %vm4319_vm1, %v4318_v15 }
 0x4c5   :  { %v478_v47 = vpop.f32.mrb[0].mxu1 }
 0x4c6   :  { %v532_v49 = vmul.f32 0.35355338, %v478_v47  ;;  %v3400_v50 = vpop.f32.mrb[1].mxu1 }
 0x4c7   :  { %v481_v51 = vpop.f32.mrb[2].mxu1  ;;  %v526_v52 = vpop.f32.mrb[4].mxu0 }
 0x4c8   :  { %v533_v54 = vmul.f32 0.35355338, %v526_v52  ;;  %v3401_v55 = vpop.f32.mrb[3].mxu1  ;;  %v3406_v56 = vpop.f32.mrb[5].mxu0  ;;  %v534_v57 = vadd.f32 %v4727_v48, %v532_v49 }
 0x4c9   :  { %v529_v58 = vpop.f32.mrb[6].mxu0 }
 0x4ca   :  { %v3407_v59 = vpop.f32.mrb[7].mxu0  ;;  %v536_v60 = vsel %vm437_vm2, %v534_v57, -inf  ;;  %v535_v61 = vadd.f32 %v4729_v53, %v533_v54 }
 0x4cb   :  { %537 = vmax.xlane.f32.xlu1 %v536_v60 }
 0x4cc   :  { %v539_v62 = vsel %vm437_vm2, %v535_v61, -inf }
 0x4cd   :  { %540 = vmax.xlane.f32.xlu0 %v539_v62 }
 0x4dc   :  { %609 = vrot.lane.b32.xlu1 %v4709_v42, %s4309_s25 }
 0x4e0   :  { %659 = vrot.lane.b32.xlu1 %v4707_v39, %s4321_s12 }
 0x558   :  { %v538_v63 = vpop.xlane.xlu1 %537 }
 0x559   :  { %v542_v0 = vsub.f32 %v534_v57, %v538_v63 }
 0x55a   :  { %v541_v1 = vpop.xlane.xlu0 %540 }
 0x55b   :  { %v544_v2 = vmul.f32 1.442695, %v542_v0  ;;  %v543_v3 = vsub.f32 %v535_v61, %v541_v1 }
 0x55c   :  { %v610_v4 = vpop.permute.xlu1 %609 }
 0x55d   :  { %3754 = vpow2.f32 %v544_v2  ;;  %v546_v5 = vmul.f32 1.442695, %v543_v3  ;;  %v615_v6 = vsel %vm565_vm3, %v610_v4, 0 }
 0x55e   :  { %3415 = vmatpush3.bf16.msra.mxu0 %v615_v6 }
 0x55f   :  { %3756 = vpow2.f32 %v546_v5  ;;  %3426 = vmatprep.subr.bf16.mxu0 %v4318_v15 }
 0x560   :  { %v660_v11 = vpop.permute.xlu1 %659 }
 0x561   :  { %v665_v23 = vsel %vm437_vm2, %v660_v11, 0 }
 0x567   :  { %v3755_v7 = vpop.eup %3754 }
 0x568   :  { %v548_v8 = vsel %vm437_vm2, %v3755_v7, 0.0 }
 0x569   :  { %v3757_v9 = vpop.eup %3756  ;;  %549 = vadd.xlane.f32.xlu0 %v548_v8 }
 0x56a   :  { %v551_v10 = vsel %vm437_vm2, %v3757_v9, 0.0 }
 0x56b   :  { %552 = vadd.xlane.f32.xlu1 %v551_v10 }
 0x57c   :  { %709 = vrot.lane.b32.xlu1 %v4709_v42, %s4321_s12 }
 0x57f   :  { %560 = vrot.lane.b32.xlu0 %v4707_v39, %s4309_s25 }
 0x580   :  { %707 = vrot.lane.b32.xlu1 %v4709_v42, %s4322_s18 }
 0x583   :  { %657 = vrot.lane.b32.xlu0 %v4707_v39, %s4322_s18 }
 0x5f6   :  { %v550_v12 = vpop.xlane.xlu0 %549 }
 0x5f7   :  { %3758 = vrcp.f32 %v550_v12 }
 0x5f8   :  { %v553_v13 = vpop.xlane.xlu1 %552 }
 0x5f9   :  { %3760 = vrcp.f32 %v553_v13 }
 0x5fa   :  { %v561_v14 = vpop.permute.xlu0 %560 }
 0x5fb   :  { %v567_v16 = vsel %vm565_vm3, %v561_v14, 0 }
 0x5fc   :  { %3409 = vmatpush3.bf16.msra.mxu1 %v567_v16  ;;  %v710_v22 = vpop.permute.xlu1 %709 }
 0x5fd   :  { %3420 = vmatprep.subr.bf16.mxu1 %v4318_v15  ;;  %v715_v25 = vsel %vm437_vm2, %v710_v22, 0 }
 0x5fe   :  { %v658_v26 = vpop.permute.xlu0 %657 }
 0x600   :  { %v708_v27 = vpop.permute.xlu1 %707 }
 0x601   :  { %v3759_v17 = vpop.eup %3758 }
 0x602   :  { %v555_v18 = vmul.f32 %v3759_v17, %v3755_v7 }
 0x603   :  { %v3761_v19 = vpop.eup %3760 }
 0x604   :  { %v557_v20 = vmul.f32 %v3761_v19, %v3757_v9  ;;  %v558_v21 = vpack.c.bf16 %v555_v18, %v555_v18 }
 0x606   :  { %3411 = vmatmul.mubr.msk.bf16.vlgmr.msra.gmra.mrb[4].mxu1 %vm437_vm2, %v558_v21  ;;  %v559_v24 = vpack.c.bf16 %v557_v20, %v557_v20 }
 0x607   :  { %3421 = vmatpush3.bf16.xpose.msra.mxu1 %v665_v23  ;;  %3422 = vmatprep.mubr.msk.bf16.mxu1 %vm4319_vm1, %v4318_v15 }
 0x608   :  { %3417 = vmatmul.mubr.msk.bf16.vlgmr.msra.gmra.mrb[8].mxu0 %vm437_vm2, %v559_v24  ;;  %3432 = vmatprep.subr.bf16.mxu1 %v4318_v15 }
 0x609   :  { %3427 = vmatpush3.bf16.xpose.msra.mxu0 %v715_v25  ;;  %3428 = vmatprep.mubr.msk.bf16.mxu0 %vm4319_vm1, %v4318_v15 }
 0x60a   :  { %3438 = vmatprep.subr.bf16.mxu0 %v4318_v15 }
 0x60e   :  { %3423 = vmatmul.mubr.msk.bf16.vlgmr.msra.gmra.mrb[8].mxu1 %vm437_vm2, %v658_v26 }
 0x60f   :  { %3434 = vmatprep.mubr.msk.bf16.mxu1 %vm4319_vm1, %v4318_v15 }
 0x610   :  { %3429 = vmatmul.mubr.msk.bf16.vlgmr.msra.gmra.mrb[12].mxu0 %vm437_vm2, %v708_v27 }
 0x611   :  { %3440 = vmatprep.mubr.msk.bf16.mxu0 %vm4319_vm1, %v4318_v15 }
 0x6d9   :  { %v4769_v28 = vpop.f32.mrb[4].mxu1 }
 0x6da   :  { %v3412_v29 = vpop.f32.mrb[5].mxu1 }
 0x6db   :  { %v606_v30 = vpop.f32.mrb[6].mxu1  ;;  %v4771_v33 = vpop.f32.mrb[8].mxu0 }
 0x6dc   :  { %v3413_v34 = vpop.f32.mrb[7].mxu1  ;;  %v3418_v35 = vpop.f32.mrb[9].mxu0 }
 0x6dd   :  { %v654_v36 = vpop.f32.mrb[10].mxu0 }
 0x6de   :  { %v3419_v37 = vpop.f32.mrb[11].mxu0 }
 0x6e1   :  { %v701_v38 = vpop.f32.mrb[8].mxu1 }
 0x6e2   :  { %v757_v40 = vmul.f32 0.35355338, %v701_v38  ;;  %v3424_v41 = vpop.f32.mrb[9].mxu1 }
 0x6e3   :  { %v704_v43 = vpop.f32.mrb[10].mxu1  ;;  %v751_v44 = vpop.f32.mrb[12].mxu0 }
 0x6e4   :  { %v758_v45 = vmul.f32 0.35355338, %v751_v44  ;;  %v3425_v46 = vpop.f32.mrb[11].mxu1  ;;  %v3430_v47 = vpop.f32.mrb[13].mxu0  ;;  %v759_v49 = vadd.f32 %v4727_v48, %v757_v40 }
 0x6e5   :  { %v754_v50 = vpop.f32.mrb[14].mxu0 }
 0x6e6   :  { %v3431_v51 = vpop.f32.mrb[15].mxu0  ;;  %v761_v52 = vsel %vm437_vm2, %v759_v49, -inf  ;;  %v760_v54 = vadd.f32 %v4729_v53, %v758_v45 }
 0x6e7   :  { %762 = vmax.xlane.f32.xlu0 %v761_v52 }
 0x6e8   :  { %v764_v55 = vsel %vm437_vm2, %v760_v54, -inf }
 0x6e9   :  { %765 = vmax.xlane.f32.xlu1 %v764_v55 }
 0x6fa   :  { %833 = vrot.lane.b32.xlu1 %v4709_v42, %s4323_s9 }
 0x6fe   :  { %883 = vrot.lane.b32.xlu1 %v4707_v39, %s4324_s0 }
 0x702   :  { %933 = vrot.lane.b32.xlu1 %v4709_v42, %s4324_s0 }
 0x706   :  { %931 = vrot.lane.b32.xlu1 %v4709_v42, %s4325_s27 }
 0x774   :  { %v763_v56 = vpop.xlane.xlu0 %762 }
 0x775   :  { %v767_v57 = vsub.f32 %v759_v49, %v763_v56 }
 0x776   :  { %v766_v58 = vpop.xlane.xlu1 %765 }
 0x777   :  { %v769_v59 = vmul.f32 1.442695, %v767_v57  ;;  %v768_v60 = vsub.f32 %v760_v54, %v766_v58 }
 0x779   :  { %3762 = vpow2.f32 %v769_v59  ;;  %v771_v61 = vmul.f32 1.442695, %v768_v60 }
 0x77a   :  { %v834_v62 = vpop.permute.xlu1 %833 }
 0x77b   :  { %3764 = vpow2.f32 %v771_v61  ;;  %v839_v63 = vsel %vm565_vm3, %v834_v62, 0 }
 0x77c   :  { %3439 = vmatpush3.bf16.msra.mxu0 %v839_v63 }
 0x77d   :  { %3450 = vmatprep.subr.bf16.mxu0 %v4318_v15 }
 0x77e   :  { %v884_v9 = vpop.permute.xlu1 %883 }
 0x77f   :  { %v889_v16 = vsel %vm437_vm2, %v884_v9, 0 }
 0x782   :  { %v934_v14 = vpop.permute.xlu1 %933 }
 0x783   :  { %v3763_v0 = vpop.eup %3762  ;;  %v939_v18 = vsel %vm437_vm2, %v934_v14, 0 }
 0x784   :  { %v773_v1 = vsel %vm437_vm2, %v3763_v0, 0.0 }
 0x785   :  { %v3765_v2 = vpop.eup %3764  ;;  %774 = vadd.xlane.f32.xlu0 %v773_v1 }
 0x786   :  { %v776_v3 = vsel %vm437_vm2, %v3765_v2, 0.0  ;;  %v932_v20 = vpop.permute.xlu1 %931 }
 0x789   :  { %777 = vadd.xlane.f32.xlu0 %v776_v3 }
 0x79f   :  { %785 = vrot.lane.b32.xlu0 %v4707_v39, %s4323_s9 }
 0x7a3   :  { %881 = vrot.lane.b32.xlu0 %v4707_v39, %s4325_s27 }
 0x812   :  { %v775_v4 = vpop.xlane.xlu0 %774 }
 0x813   :  { %3766 = vrcp.f32 %v775_v4 }
 0x816   :  { %v778_v5 = vpop.xlane.xlu0 %777 }
 0x817   :  { %3768 = vrcp.f32 %v778_v5 }
 0x81a   :  { %v786_v6 = vpop.permute.xlu0 %785 }
 0x81b   :  { %v791_v7 = vsel %vm565_vm3, %v786_v6, 0 }
 0x81c   :  { %3433 = vmatpush3.bf16.msra.mxu1 %v791_v7 }
 0x81d   :  { %v3767_v8 = vpop.eup %3766  ;;  %3444 = vmatprep.subr.bf16.mxu1 %v4318_v15 }
 0x81e   :  { %v780_v10 = vmul.f32 %v3767_v8, %v3763_v0  ;;  %v882_v19 = vpop.permute.xlu0 %881 }
 0x820   :  { %v783_v11 = vpack.c.bf16 %v780_v10, %v780_v10 }
 0x821   :  { %v3769_v12 = vpop.eup %3768 }
 0x822   :  { %v782_v13 = vmul.f32 %v3769_v12, %v3765_v2  ;;  %3435 = vmatmul.mubr.msk.bf16.vlgmr.msra.gmra.mrb[12].mxu1 %vm437_vm2, %v783_v11 }
 0x823   :  { %3446 = vmatprep.mubr.msk.bf16.mxu1 %vm4319_vm1, %v4318_v15 }
 0x824   :  { %v784_v17 = vpack.c.bf16 %v782_v13, %v782_v13 }
 0x825   :  { %3445 = vmatpush3.bf16.xpose.msra.mxu1 %v889_v16 }
 0x826   :  { %3441 = vmatmul.mubr.msk.bf16.vlgmr.msra.gmra.mrb[16].mxu0 %vm437_vm2, %v784_v17  ;;  %3456 = vmatprep.subr.bf16.mxu1 %v4318_v15 }
 0x827   :  { %3451 = vmatpush3.bf16.xpose.msra.mxu0 %v939_v18  ;;  %3452 = vmatprep.mubr.msk.bf16.mxu0 %vm4319_vm1, %v4318_v15 }
 0x828   :  { %3462 = vmatprep.subr.bf16.mxu0 %v4318_v15 }
 0x82c   :  { %3447 = vmatmul.mubr.msk.bf16.vlgmr.msra.gmra.mrb[16].mxu1 %vm437_vm2, %v882_v19 }
 0x82d   :  { %3458 = vmatprep.mubr.msk.bf16.mxu1 %vm4319_vm1, %v4318_v15 }
 0x82e   :  { %3453 = vmatmul.mubr.msk.bf16.vlgmr.msra.gmra.mrb[20].mxu0 %vm437_vm2, %v932_v20 }
 0x82f   :  { %3464 = vmatprep.mubr.msk.bf16.mxu0 %vm4319_vm1, %v4318_v15 }
 0x8f5   :  { %v4811_v21 = vpop.f32.mrb[12].mxu1 }
 0x8f6   :  { %v3436_v22 = vpop.f32.mrb[13].mxu1 }
 0x8f7   :  { %v830_v23 = vpop.f32.mrb[14].mxu1 }
 0x8f8   :  { %v3437_v24 = vpop.f32.mrb[15].mxu1 }
 0x8f9   :  { %v4813_v25 = vpop.f32.mrb[16].mxu0 }
 0x8fa   :  { %v3698_v26 = vpack.i.bf16 %v4813_v25, %v4811_v21  ;;  %v3442_v27 = vpop.f32.mrb[17].mxu0 }
 0x8fb   :  { %v878_v29 = vpop.f32.mrb[18].mxu0 }
 0x8fc   :  { %v3443_v30 = vpop.f32.mrb[19].mxu0 }
 0x8ff   :  { %v925_v34 = vpop.f32.mrb[16].mxu1 }
 0x900   :  { %v981_v35 = vmul.f32 0.35355338, %v925_v34  ;;  %v3448_v36 = vpop.f32.mrb[17].mxu1 }
 0x901   :  { %v928_v37 = vpop.f32.mrb[18].mxu1  ;;  %v975_v38 = vpop.f32.mrb[20].mxu0 }
 0x902   :  { %v982_v40 = vmul.f32 0.35355338, %v975_v38  ;;  %v3449_v41 = vpop.f32.mrb[19].mxu1  ;;  %v3454_v43 = vpop.f32.mrb[21].mxu0  ;;  %v983_v44 = vadd.f32 %v4727_v48, %v981_v35 }
 0x903   :  { %v978_v45 = vpop.f32.mrb[22].mxu0 }
 0x904   :  { %v3455_v46 = vpop.f32.mrb[23].mxu0  ;;  %v985_v47 = vsel %vm437_vm2, %v983_v44, -inf  ;;  %v984_v49 = vadd.f32 %v4729_v53, %v982_v40 }
 0x905   :  { %986 = vmax.xlane.f32.xlu0 %v985_v47 }
 0x906   :  { %v988_v50 = vsel %vm437_vm2, %v984_v49, -inf }
 0x907   :  { %989 = vmax.xlane.f32.xlu1 %v988_v50 }
 0x918   :  { %1057 = vrot.lane.b32.xlu1 %v4709_v42, %s4326_s20 }
 0x91c   :  { %1107 = vrot.lane.b32.xlu1 %v4707_v39, %s4327_s30 }
 0x920   :  { %1157 = vrot.lane.b32.xlu1 %v4709_v42, %s4327_s30 }
 0x924   :  { %1155 = vrot.lane.b32.xlu1 %v4709_v42, %s4328_s7 }
 0x992   :  { %v987_v51 = vpop.xlane.xlu0 %986 }
 0x993   :  { %v991_v52 = vsub.f32 %v983_v44, %v987_v51 }
 0x994   :  { %v990_v54 = vpop.xlane.xlu1 %989 }
 0x995   :  { %v993_v55 = vmul.f32 1.442695, %v991_v52  ;;  %v992_v56 = vsub.f32 %v984_v49, %v990_v54 }
 0x997   :  { %3770 = vpow2.f32 %v993_v55  ;;  %v995_v57 = vmul.f32 1.442695, %v992_v56 }
 0x998   :  { %v1058_v58 = vpop.permute.xlu1 %1057 }
 0x999   :  { %3772 = vpow2.f32 %v995_v57  ;;  %v1063_v59 = vsel %vm565_vm3, %v1058_v58, 0 }
 0x99a   :  { %3463 = vmatpush3.bf16.msra.mxu0 %v1063_v59 }
 0x99b   :  { %3474 = vmatprep.subr.bf16.mxu0 %v4318_v15 }
 0x99c   :  { %v1108_v5 = vpop.permute.xlu1 %1107 }
 0x99d   :  { %v1113_v11 = vsel %vm437_vm2, %v1108_v5, 0 }
 0x9a0   :  { %v1158_v10 = vpop.permute.xlu1 %1157 }
 0x9a1   :  { %v3771_v60 = vpop.eup %3770  ;;  %v1163_v13 = vsel %vm437_vm2, %v1158_v10, 0 }
 0x9a2   :  { %v997_v61 = vsel %vm437_vm2, %v3771_v60, 0.0 }
 0x9a3   :  { %v3773_v62 = vpop.eup %3772  ;;  %998 = vadd.xlane.f32.xlu0 %v997_v61 }
 0x9a4   :  { %v1000_v63 = vsel %vm437_vm2, %v3773_v62, 0.0  ;;  %v1156_v16 = vpop.permute.xlu1 %1155 }
 0x9a7   :  { %1001 = vadd.xlane.f32.xlu0 %v1000_v63 }
 0x9bd   :  { %1009 = vrot.lane.b32.xlu0 %v4707_v39, %s4326_s20 }
 0x9c1   :  { %1105 = vrot.lane.b32.xlu0 %v4707_v39, %s4328_s7 }
 0xa30   :  { %v999_v0 = vpop.xlane.xlu0 %998 }
 0xa31   :  { %3774 = vrcp.f32 %v999_v0 }
 0xa34   :  { %v1002_v1 = vpop.xlane.xlu0 %1001 }
 0xa35   :  { %3776 = vrcp.f32 %v1002_v1 }
 0xa38   :  { %v1010_v2 = vpop.permute.xlu0 %1009 }
 0xa39   :  { %v1015_v3 = vsel %vm565_vm3, %v1010_v2, 0  ;;  %v3730_v2 = vld [vmem:[#allocation13] sm:$0xff]  }
 0xa3a   :  { %3457 = vmatpush3.bf16.msra.mxu1 %v1015_v3  ;;  %v3731_v3 = vld [vmem:[#allocation13 + $0x8] sm:$0xff]  }
 0xa3b   :  { %v3775_v4 = vpop.eup %3774  ;;  %3468 = vmatprep.subr.bf16.mxu1 %v4318_v15 }
 0xa3c   :  { %v1004_v6 = vmul.f32 %v3775_v4, %v3771_v60  ;;  %v1106_v14 = vpop.permute.xlu0 %1105 }
 0xa3e   :  { %v1007_v7 = vpack.c.bf16 %v1004_v6, %v1004_v6 }
 0xa3f   :  { %v3777_v8 = vpop.eup %3776 }
 0xa40   :  { %v1006_v9 = vmul.f32 %v3777_v8, %v3773_v62  ;;  %3459 = vmatmul.mubr.msk.bf16.vlgmr.msra.gmra.mrb[20].mxu1 %vm437_vm2, %v1007_v7 }
 0xa41   :  { %3470 = vmatprep.mubr.msk.bf16.mxu1 %vm4319_vm1, %v4318_v15 }
 0xa42   :  { %v1008_v12 = vpack.c.bf16 %v1006_v9, %v1006_v9 }
 0xa43   :  { %3469 = vmatpush3.bf16.xpose.msra.mxu1 %v1113_v11 }
 0xa44   :  { %3465 = vmatmul.mubr.msk.bf16.vlgmr.msra.gmra.mrb[24].mxu0 %vm437_vm2, %v1008_v12  ;;  %3480 = vmatprep.subr.bf16.mxu1 %v4318_v15 }
 0xa45   :  { %3475 = vmatpush3.bf16.xpose.msra.mxu0 %v1163_v13  ;;  %3476 = vmatprep.mubr.msk.bf16.mxu0 %vm4319_vm1, %v4318_v15 }
 0xa46   :  { %3486 = vmatprep.subr.bf16.mxu0 %v4318_v15 }
 0xa4a   :  { %3471 = vmatmul.mubr.msk.bf16.vlgmr.msra.gmra.mrb[24].mxu1 %vm437_vm2, %v1106_v14 }
 0xa4b   :  { %3482 = vmatprep.mubr.msk.bf16.mxu1 %vm4319_vm1, %v4318_v15 }
 0xa4c   :  { %3477 = vmatmul.mubr.msk.bf16.vlgmr.msra.gmra.mrb[28].mxu0 %vm437_vm2, %v1156_v16 }
 0xa4d   :  { %3488 = vmatprep.mubr.msk.bf16.mxu0 %vm4319_vm1, %v4318_v15 }
 0xb13   :  { %v1051_v17 = vpop.f32.mrb[20].mxu1 }
 0xb14   :  { %v3460_v18 = vpop.f32.mrb[21].mxu1 }
 0xb15   :  { %v1054_v19 = vpop.f32.mrb[22].mxu1 }
 0xb16   :  { %v3461_v20 = vpop.f32.mrb[23].mxu1 }
 0xb17   :  { %v1099_v22 = vpop.f32.mrb[24].mxu0 }
 0xb18   :  { %v3703_v23 = vpack.i.bf16 %v1099_v22, %v1051_v17  ;;  %v3466_v24 = vpop.f32.mrb[25].mxu0 }
 0xb19   :  { %v1102_v27 = vpop.f32.mrb[26].mxu0 }
 0xb1a   :  { %v3467_v29 = vpop.f32.mrb[27].mxu0 }
 0xb1d   :  { %v1149_v30 = vpop.f32.mrb[24].mxu1 }
 0xb1e   :  { %v1205_v34 = vmul.f32 0.35355338, %v1149_v30  ;;  %v3472_v35 = vpop.f32.mrb[25].mxu1 }
 0xb1f   :  { %v1152_v36 = vpop.f32.mrb[26].mxu1  ;;  %v1199_v37 = vpop.f32.mrb[28].mxu0 }
 0xb20   :  { %v1206_v38 = vmul.f32 0.35355338, %v1199_v37  ;;  %v3473_v40 = vpop.f32.mrb[27].mxu1  ;;  %v3478_v41 = vpop.f32.mrb[29].mxu0  ;;  %v1207_v43 = vadd.f32 %v4727_v48, %v1205_v34 }
 0xb21   :  { %v1202_v44 = vpop.f32.mrb[30].mxu0 }
 0xb22   :  { %v3479_v45 = vpop.f32.mrb[31].mxu0  ;;  %v1209_v46 = vsel %vm437_vm2, %v1207_v43, -inf  ;;  %v1208_v47 = vadd.f32 %v4729_v53, %v1206_v38 }
 0xb23   :  { %1210 = vmax.xlane.f32.xlu0 %v1209_v46 }
 0xb24   :  { %v1212_v49 = vsel %vm437_vm2, %v1208_v47, -inf }
 0xb25   :  { %1213 = vmax.xlane.f32.xlu1 %v1212_v49 }
 0xb36   :  { %1281 = vrot.lane.b32.xlu1 %v4709_v42, %s4329_s1 }
 0xb3a   :  { %3699 = vrot.lane.b32.xlu1 %v3698_v26, %s4306_s21 }
 0xb3e   :  { %3704 = vrot.lane.b32.xlu1 %v3703_v23, %s4295_s23 }
 0xbb0   :  { %v1211_v48 = vpop.xlane.xlu0 %1210 }
 0xbb1   :  { %v1215_v50 = vsub.f32 %v1207_v43, %v1211_v48 }
 0xbb2   :  { %v1214_v51 = vpop.xlane.xlu1 %1213 }
 0xbb3   :  { %v1217_v52 = vmul.f32 1.442695, %v1215_v50  ;;  %v1216_v53 = vsub.f32 %v1208_v47, %v1214_v51 }
 0xbb5   :  { %3778 = vpow2.f32 %v1217_v52  ;;  %v1219_v54 = vmul.f32 1.442695, %v1216_v53 }
 0xbb6   :  { %v1282_v55 = vpop.permute.xlu1 %1281 }
 0xbb7   :  { %3780 = vpow2.f32 %v1219_v54  ;;  %v1287_v56 = vsel %vm565_vm3, %v1282_v55, 0 }
 0xbb8   :  { %3487 = vmatpush3.bf16.msra.mxu0 %v1287_v56 }
 0xbb9   :  { %3500 = vmatprep.subr.bf16.mxu0 %v4318_v15 }
 0xbba   :  { %v3700_v13 = vpop.permute.xlu1 %3699 }
 0xbbb   :  { %v3702_v16 = vunpack.i.h.bf16 %v3700_v13  ;;  %v3701_v17 = vunpack.i.l.bf16 %v3700_v13 }
 0xbbd   :  { %v1354_v22 = vsel %vm437_vm2, %v4771_v33, %v3702_v16  ;;  %v1353_v23 = vsel %vm437_vm2, %v4769_v28, %v3701_v17  ;;  %v3227_v33 = vld [vmem:[#allocation14] ss:$0 sm:$0xff] }
 0xbbe   :  { %v3705_v14 = vpop.permute.xlu1 %3704 }
 0xbbf   :  { %v3779_v42 = vpop.eup %3778  ;;  %v3707_v18 = vunpack.i.h.bf16 %v3705_v14  ;;  %v3706_v19 = vunpack.i.l.bf16 %v3705_v14 }
 0xbc0   :  { %v1221_v21 = vsel %vm437_vm2, %v3779_v42, 0.0 }
 0xbc1   :  { %v3781_v25 = vpop.eup %3780  ;;  %1222 = vadd.xlane.f32.xlu0 %v1221_v21  ;;  %v1356_v29 = vsel %vm1355_vm4, %v1353_v23, %v3706_v19  ;;  %v1357_v30 = vsel %vm1355_vm4, %v1354_v22, %v3707_v18 }
 0xbc2   :  { %v1224_v26 = vsel %vm437_vm2, %v3781_v25, 0.0 }
 0xbc5   :  { %1225 = vadd.xlane.f32.xlu0 %v1224_v26 }
 0xbdb   :  { %1233 = vrot.lane.b32.xlu0 %v4707_v39, %s4329_s1 }
 0xc4e   :  { %v1223_v57 = vpop.xlane.xlu0 %1222 }
 0xc4f   :  { %3782 = vrcp.f32 %v1223_v57 }
 0xc52   :  { %v1226_v58 = vpop.xlane.xlu0 %1225 }
 0xc53   :  { %3784 = vrcp.f32 %v1226_v58 }
 0xc56   :  { %v1234_v59 = vpop.permute.xlu0 %1233 }
 0xc57   :  { %v1239_v60 = vsel %vm565_vm3, %v1234_v59, 0 }
 0xc58   :  { %3481 = vmatpush3.bf16.msra.mxu1 %v1239_v60 }
 0xc59   :  { %v3783_v61 = vpop.eup %3782  ;;  %3492 = vmatprep.subr.bf16.mxu1 %v4318_v15 }
 0xc5a   :  { %v1228_v62 = vmul.f32 %v3783_v61, %v3779_v42  ;;  %v3732_v42 = vld [vmem:[#allocation19] sm:$0xff]  }
 0xc5c   :  { %v1231_v63 = vpack.c.bf16 %v1228_v62, %v1228_v62  ;;  %v3231_v62 = vld [vmem:[#allocation16] ss:$0 sm:$0xff] }
 0xc5d   :  { %v3785_v0 = vpop.eup %3784 }
 0xc5e   :  { %v1230_v1 = vmul.f32 %v3785_v0, %v3781_v25  ;;  %3483 = vmatmul.mubr.msk.bf16.vlgmr.msra.gmra.mrb[28].mxu1 %vm437_vm2, %v1231_v63 }
 0xc5f   :  { %3496 = vmatprep.mubr.msk.bf16.mxu1 %vm4319_vm1, %v4318_v15  ;;  %3493 = vmatpush3.bf16.msra.mxu1 %v3730_v2 }
 0xc60   :  { %v1232_v39 = vpack.c.bf16 %v1230_v1, %v1230_v1  ;;  %3494 = vmatprep.subr.bf16.mxu1 %v4318_v15 }
 0xc62   :  { %3489 = vmatmul.mubr.msk.bf16.vlgmr.msra.gmra.mrb[32].mxu0 %vm437_vm2, %v1232_v39  ;;  %v3232_v39 = vld [vmem:[#allocation17] ss:$0 sm:$0xff] }
 0xc63   :  { %3504 = vmatprep.mubr.msk.bf16.mxu0 %vm4319_vm1, %v4318_v15  ;;  %3495 = vmatpush3.bf16.msra.mxu1 %v3731_v3 }
 0xc64   :  { %3508 = vmatprep.subr.bf16.mxu1 %v4318_v15  ;;  %3501 = vmatpush3.bf16.msra.mxu0 %v3732_v42 }
 0xc65   :  { %3502 = vmatprep.subr.bf16.mxu0 %v4318_v15 }
 0xd31   :  { %v1275_v4 = vpop.f32.mrb[28].mxu1 }
 0xd32   :  { %v3484_v5 = vpop.f32.mrb[29].mxu1 }
 0xd33   :  { %v1278_v6 = vpop.f32.mrb[30].mxu1 }
 0xd34   :  { %v3485_v7 = vpop.f32.mrb[31].mxu1  ;;  %v3734_v6 = vld [vmem:[#allocation22] sm:$0xff]  }
 0xd35   :  { %v1323_v8 = vpop.f32.mrb[32].mxu0  ;;  %v3735_v7 = vld [vmem:[#allocation22 + $0x8] sm:$0xff]  }
 0xd36   :  { %v3708_v9 = vpack.i.bf16 %v1323_v8, %v1275_v4  ;;  %v3490_v10 = vpop.f32.mrb[33].mxu0  ;;  %v3736_v8 = vld [vmem:[#allocation22 + $0x10] sm:$0xff]  }
 0xd37   :  { %v1326_v11 = vpop.f32.mrb[34].mxu0  ;;  %v3233_v10 = vld [vmem:[#allocation20] ss:$0 sm:$0xff] }
 0xd38   :  { %3709 = vrot.lane.b32.xlu0 %v3708_v9, %s4330_s6  ;;  %v3491_v12 = vpop.f32.mrb[35].mxu0  ;;  %v3737_v9 = vld [vmem:[#allocation22 + $0x18] sm:$0xff]  }
 0xdaa   :  { %v3710_v20 = vpop.permute.xlu0 %3709 }
 0xdab   :  { %v3712_v24 = vunpack.i.h.bf16 %v3710_v20  ;;  %v3711_v27 = vunpack.i.l.bf16 %v3710_v20 }
 0xdad   :  { %v1360_v34 = vsel %vm1358_vm5, %v1357_v30, %v3712_v24  ;;  %v1359_v35 = vsel %vm1358_vm5, %v1356_v29, %v3711_v27 }
 0xdae   :  { %v1361_v36 = vpack.c.bf16 %v1360_v34, %v1359_v35 }
 0xdb0   :  { %3497 = vmatmul.mubr.msk.bf16.vlgmr.msra.gmra.mrb[32].mxu1 %vm303_vm0, %v1361_v36 }
 0xdb1   :  { %3516 = vmatprep.mubr.msk.bf16.mxu1 %vm4319_vm1, %v4318_v15  ;;  %3509 = vmatpush3.bf16.msra.mxu1 %v3734_v6 }
 0xdb2   :  { %3510 = vmatprep.subr.bf16.mxu1 %v4318_v15 }
 0xdb5   :  { %3511 = vmatpush3.bf16.msra.mxu1 %v3735_v7  ;;  %v3237_v7 = vld [vmem:[#allocation23] ss:$0 sm:$0xff] }
 0xdb6   :  { %3512 = vmatprep.subr.bf16.mxu1 %v4318_v15 }
 0xdb9   :  { %3513 = vmatpush3.bf16.msra.mxu1 %v3736_v8 }
 0xdba   :  { %3514 = vmatprep.subr.bf16.mxu1 %v4318_v15 }
 0xdbd   :  { %3515 = vmatpush3.bf16.msra.mxu1 %v3737_v9 }
 0xdbe   :  { %3534 = vmatprep.subr.bf16.mxu1 %v4318_v15 }
 0xe83   :  { %v1422_v37 = vpop.f32.mrb[32].mxu1 }
 0xe84   :  { %v1423_v38 = vadd.f32 %v3227_v33, %v1422_v37  ;;  %v3498_v28 = vpop.f32.mrb[33].mxu1 }
 0xe85   :  { %v1425_v40 = vpop.f32.mrb[34].mxu1 }
 0xe86   :  { %v1426_v41 = vadd.f32 %v3227_v33, %v1425_v40  ;;  %v3499_v43 = vpop.f32.mrb[35].mxu1  ;;  %v1429_v44 = vadd.f32 %v1423_v38, %v4698_v31 }
 0xe88   :  { %v1433_v45 = vsel %vm303_vm0, %v1429_v44, 0.0  ;;  %v1430_v46 = vadd.f32 %v1426_v41, %v4700_v32  ;;  %v3733_v32 = vld [vmem:[#allocation19 + $0x8] sm:$0xff]  }
 0xe89   :  { %1434 = vadd.xlane.f32.xlu1 %v1433_v45  ;;  %3503 = vmatpush3.bf16.msra.mxu0 %v3733_v32 }
 0xe8a   :  { %v1436_v47 = vsel %vm303_vm0, %v1430_v46, 0.0  ;;  %3520 = vmatprep.subr.bf16.mxu0 %v4318_v15 }
 0xe8b   :  { %1437 = vadd.xlane.f32.xlu0 %v1436_v47 }
 0xf16   :  { %v1435_v49 = vpop.xlane.xlu1 %1434 }
 0xf17   :  { %v1439_v48 = vmul.f32 0.03125, %v1435_v49 }
 0xf18   :  { %v1438_v50 = vpop.xlane.xlu0 %1437 }
 0xf19   :  { %v1441_v51 = vsub.f32 %v1429_v44, %v1439_v48  ;;  %v1440_v52 = vmul.f32 0.03125, %v1438_v50 }
 0xf1b   :  { %v1442_v53 = vsub.f32 %v1430_v46, %v1440_v52  ;;  %v1443_v54 = vmul.f32 %v1441_v51, %v1441_v51 }
 0xf1d   :  { %v1445_v55 = vsel %vm303_vm0, %v1443_v54, 0.0  ;;  %v1444_v56 = vmul.f32 %v1442_v53, %v1442_v53 }
 0xf1e   :  { %1446 = vadd.xlane.f32.xlu0 %v1445_v55 }
 0xf1f   :  { %v1448_v31 = vsel %vm303_vm0, %v1444_v56, 0.0 }
 0xf22   :  { %1449 = vadd.xlane.f32.xlu0 %v1448_v31 }
 0xfab   :  { %v1447_v21 = vpop.xlane.xlu0 %1446 }
 0xfac   :  { %v1451_v25 = vmul.f32 0.03125, %v1447_v21 }
 0xfae   :  { %v1453_v26 = vadd.f32 1e-12, %v1451_v25 }
 0xfaf   :  { %v1450_v57 = vpop.xlane.xlu0 %1449 }
 0xfb0   :  { %3786 = vrsqrt.f32 %v1453_v26  ;;  %v1452_v58 = vmul.f32 0.03125, %v1450_v57 }
 0xfb2   :  { %v1454_v59 = vadd.f32 1e-12, %v1452_v58 }
 0xfb4   :  { %3788 = vrsqrt.f32 %v1454_v59 }
 0xfba   :  { %v3787_v60 = vpop.eup %3786 }
 0xfbb   :  { %v1457_v61 = vmul.f32 %v3787_v60, %v1441_v51 }
 0xfbd   :  { %v1465_v0 = vmul.f32 %v3231_v62, %v1457_v61 }
 0xfbe   :  { %v3789_v63 = vpop.eup %3788 }
 0xfbf   :  { %v1458_v1 = vmul.f32 %v3789_v63, %v1442_v53  ;;  %v4902_v3 = vadd.f32 %v3232_v39, %v1465_v0 }
 0xfc1   :  { %v1466_v2 = vmul.f32 %v3231_v62, %v1458_v1 }
 0xfc3   :  { %v4904_v4 = vadd.f32 %v3232_v39, %v1466_v2 }
 0xfc5   :  { %v1475_v5 = vpack.c.bf16 %v4904_v4, %v4902_v3 }
 0xfc7   :  { %3505 = vmatmul.mubr.msk.bf16.vlgmr.msra.gmra.mrb[36].mxu0 %vm303_vm0, %v1475_v5 }
 0xfc8   :  { %3524 = vmatprep.mubr.msk.bf16.mxu0 %vm4319_vm1, %v4318_v15 }
0x109a   :  { %v1536_v11 = vpop.f32.mrb[36].mxu0 }
0x109b   :  { %v1537_v12 = vadd.f32 %v3233_v10, %v1536_v11  ;;  %v3506_v13 = vpop.f32.mrb[37].mxu0 }
0x109c   :  { %v1539_v14 = vpop.f32.mrb[38].mxu0 }
0x109d   :  { %v1545_v16 = vmul.f32 0.70710677, %v1537_v12  ;;  %v1540_v17 = vadd.f32 %v3233_v10, %v1539_v14  ;;  %v3507_v18 = vpop.f32.mrb[39].mxu0  ;;  %v1543_v0 = vmul.f32 0.5, %v1537_v12 }
0x109f   :  { %v1547_v19 = vand.u32 2147483647, %v1545_v16  ;;  %v1546_v20 = vmul.f32 0.70710677, %v1540_v17  ;;  %vm1587_vm6 = vcmp.ge.f32.partialorder %v1545_v16, 0.0  ;;  %v1544_v1 = vmul.f32 0.5, %v1540_v17 }
0x10a1   :  { %v1549_v22 = vmul.f32 0.3275911, %v1547_v19  ;;  %v1548_v23 = vand.u32 2147483647, %v1546_v20  ;;  %v1575_v30 = vmul.f32 %v1547_v19, %v1547_v19  ;;  %vm1588_vm7 = vcmp.ge.f32.partialorder %v1546_v20, 0.0 }
0x10a3   :  { %v1551_v24 = vadd.f32 1.0, %v1549_v22  ;;  %v1550_v27 = vmul.f32 0.3275911, %v1548_v23  ;;  %v1576_v34 = vmul.f32 %v1548_v23, %v1548_v23  ;;  %v1577_v36 = vsub.f32 0.0, %v1575_v30 }
0x10a5   :  { %3790 = vrcp.f32 %v1551_v24  ;;  %v1552_v29 = vadd.f32 1.0, %v1550_v27  ;;  %v1578_v28 = vsub.f32 0.0, %v1576_v34  ;;  %v1579_v40 = vmul.f32 1.442695, %v1577_v36 }
0x10a7   :  { %3792 = vrcp.f32 %v1552_v29  ;;  %v1581_v46 = vmul.f32 1.442695, %v1578_v28 }
0x10a8   :  { %3794 = vpow2.f32 %v1579_v40 }
0x10a9   :  { %3796 = vpow2.f32 %v1581_v46 }
0x10af   :  { %v3791_v35 = vpop.eup %3790 }
0x10b0   :  { %v1557_v33 = vmul.f32 1.0614054, %v3791_v35 }
0x10b1   :  { %v3793_v37 = vpop.eup %3792 }
0x10b2   :  { %v1559_v38 = vadd.f32 -1.4531521, %v1557_v33  ;;  %v1558_v41 = vmul.f32 1.0614054, %v3793_v37  ;;  %v3795_v31 = vpop.eup %3794 }
0x10b3   :  { %v3797_v25 = vpop.eup %3796 }
0x10b4   :  { %v1561_v43 = vmul.f32 %v3791_v35, %v1559_v38  ;;  %v1560_v44 = vadd.f32 -1.4531521, %v1558_v41 }
0x10b6   :  { %v1563_v45 = vadd.f32 1.4214138, %v1561_v43  ;;  %v1562_v47 = vmul.f32 %v3793_v37, %v1560_v44  ;;  %v3243_v43 = vld [vmem:[#allocation25] ss:$0 sm:$0xff] }
0x10b8   :  { %v1565_v49 = vmul.f32 %v3791_v35, %v1563_v45  ;;  %v1564_v48 = vadd.f32 1.4214138, %v1562_v47 }
0x10ba   :  { %v1567_v50 = vadd.f32 -0.28449672, %v1565_v49  ;;  %v1566_v51 = vmul.f32 %v3793_v37, %v1564_v48  ;;  %v3244_v49 = vld [vmem:[#allocation26] ss:$0 sm:$0xff] }
0x10bc   :  { %v1569_v52 = vmul.f32 %v3791_v35, %v1567_v50  ;;  %v1568_v53 = vadd.f32 -0.28449672, %v1566_v51 }
0x10be   :  { %v1571_v54 = vadd.f32 0.2548296, %v1569_v52  ;;  %v1570_v55 = vmul.f32 %v3793_v37, %v1568_v53  ;;  %v3245_v53 = vld [vmem:[#allocation11 + $0x1] ss:$0 sm:$0xff] }
0x10c0   :  { %v1573_v56 = vmul.f32 %v3791_v35, %v1571_v54  ;;  %v1572_v42 = vadd.f32 0.2548296, %v1570_v55  ;;  %v3738_v35 = vld [vmem:[#allocation10 + $0x10] sm:$0xff]  }
0x10c1   :  { %3521 = vmatpush3.bf16.msra.mxu0 %v3738_v35 }
0x10c2   :  { %v1583_v32 = vmul.f32 %v3795_v31, %v1573_v56  ;;  %v1574_v21 = vmul.f32 %v3793_v37, %v1572_v42  ;;  %3522 = vmatprep.subr.bf16.mxu0 %v4318_v15 }
0x10c4   :  { %v1585_v26 = vsub.f32 1.0, %v1583_v32  ;;  %v1584_v57 = vmul.f32 %v3797_v25, %v1574_v21 }
0x10c6   :  { %v1589_v58 = vsub.f32 0.0, %v1585_v26  ;;  %v1586_v59 = vsub.f32 1.0, %v1584_v57 }
0x10c8   :  { %v1591_v60 = vsel %vm1587_vm6, %v1585_v26, %v1589_v58  ;;  %v1590_v61 = vsub.f32 0.0, %v1586_v59 }
0x10c9   :  { %v1593_v62 = vadd.f32 1.0, %v1591_v60 }
0x10ca   :  { %v1592_v63 = vsel %vm1588_vm7, %v1586_v59, %v1590_v61 }
0x10cb   :  { %v1594_v39 = vadd.f32 1.0, %v1592_v63  ;;  %v1595_v2 = vmul.f32 %v1593_v62, %v1543_v0 }
0x10cd   :  { %v1596_v5 = vmul.f32 %v1594_v39, %v1544_v1 }
0x10cf   :  { %v1597_v6 = vpack.c.bf16 %v1596_v5, %v1595_v2  ;;  %v4955_v5 = vld [vmem:[#allocation5] ss:$0 sm:$0xff] }
0x10d1   :  { %3517 = vmatmul.mubr.msk.bf16.vlgmr.msra.gmra.mrb[36].mxu1 %vm1637_vm8, %v1597_v6 }
0x10d2   :  { %3536 = vmatprep.mubr.msk.bf16.mxu1 %vm4319_vm1, %v4318_v15 }
0x11a4   :  { %v1675_v8 = vpop.f32.mrb[36].mxu1 }
0x11a5   :  { %v1676_v9 = vadd.f32 %v3237_v7, %v1675_v8  ;;  %v3518_v10 = vpop.f32.mrb[37].mxu1 }
0x11a6   :  { %v1678_v11 = vpop.f32.mrb[38].mxu1  ;;  %v4959_v10 = vld [vmem:[#allocation5 + $0x1] ss:$0 sm:$0xff] }
0x11a7   :  { %v1679_v13 = vadd.f32 %v3237_v7, %v1678_v11  ;;  %v3519_v14 = vpop.f32.mrb[39].mxu1  ;;  %v1682_v12 = vadd.f32 %v1676_v9, %v4902_v3 }
0x11a9   :  { %v1686_v16 = vsel %vm303_vm0, %v1682_v12, 0.0  ;;  %v1683_v17 = vadd.f32 %v1679_v13, %v4904_v4  ;;  %v3739_v4 = vld [vmem:[#allocation10 + $0x18] sm:$0xff]  }
0x11aa   :  { %1687 = vadd.xlane.f32.xlu1 %v1686_v16  ;;  %3523 = vmatpush3.bf16.msra.mxu0 %v3739_v4 }
0x11ab   :  { %v1689_v18 = vsel %vm303_vm0, %v1683_v17, 0.0  ;;  %3528 = vmatprep.subr.bf16.mxu0 %v4318_v15 }
0x11ac   :  { %1690 = vadd.xlane.f32.xlu0 %v1689_v18 }
0x1237   :  { %v1688_v19 = vpop.xlane.xlu1 %1687 }
0x1238   :  { %v1692_v20 = vmul.f32 0.03125, %v1688_v19 }
0x1239   :  { %v1691_v22 = vpop.xlane.xlu0 %1690 }
0x123a   :  { %v1694_v23 = vsub.f32 %v1682_v12, %v1692_v20  ;;  %v1693_v24 = vmul.f32 0.03125, %v1691_v22 }
0x123c   :  { %v1695_v27 = vsub.f32 %v1683_v17, %v1693_v24  ;;  %v1696_v29 = vmul.f32 %v1694_v23, %v1694_v23 }
0x123e   :  { %v1698_v30 = vsel %vm303_vm0, %v1696_v29, 0.0  ;;  %v1697_v34 = vmul.f32 %v1695_v27, %v1695_v27 }
0x123f   :  { %1699 = vadd.xlane.f32.xlu1 %v1698_v30 }
0x1240   :  { %v1701_v3 = vsel %vm303_vm0, %v1697_v34, 0.0 }
0x1241   :  { %1702 = vadd.xlane.f32.xlu0 %v1701_v3 }
0x12cc   :  { %v1700_v36 = vpop.xlane.xlu1 %1699 }
0x12cd   :  { %v1704_v33 = vmul.f32 0.03125, %v1700_v36 }
0x12ce   :  { %v1703_v37 = vpop.xlane.xlu0 %1702 }
0x12cf   :  { %v1706_v38 = vadd.f32 1e-12, %v1704_v33  ;;  %v1705_v28 = vmul.f32 0.03125, %v1703_v37 }
0x12d1   :  { %3798 = vrsqrt.f32 %v1706_v38  ;;  %v1707_v40 = vadd.f32 1e-12, %v1705_v28 }
0x12d3   :  { %3800 = vrsqrt.f32 %v1707_v40 }
0x12db   :  { %v3799_v41 = vpop.eup %3798 }
0x12dc   :  { %v1710_v44 = vmul.f32 %v3799_v41, %v1694_v23 }
0x12dd   :  { %v3801_v45 = vpop.eup %3800 }
0x12de   :  { %v1718_v46 = vmul.f32 %v3243_v43, %v1710_v44  ;;  %v1711_v47 = vmul.f32 %v3801_v45, %v1695_v27 }
0x12e0   :  { %v1719_v48 = vmul.f32 %v3243_v43, %v1711_v47  ;;  %v4926_v50 = vadd.f32 %v3244_v49, %v1718_v46 }
0x12e2   :  { %v4928_v51 = vadd.f32 %v3244_v49, %v1719_v48 }
0x12e4   :  { %v1728_v52 = vpack.c.bf16 %v4928_v51, %v4926_v50 }
0x12e6   :  { %3525 = vmatmul.mubr.msk.bf16.vlgmr.msra.gmra.mrb[40].mxu0 %vm303_vm0, %v1728_v52 }
0x12e7   :  { %3530 = vmatprep.mubr.msk.bf16.mxu0 %vm4319_vm1, %v4318_v15 }
0x13b9   :  { %v1791_v54 = vpop.f32.mrb[40].mxu0 }
0x13ba   :  { %v1792_v55 = vadd.f32 %v3245_v53, %v1791_v54  ;;  %v3526_v56 = vpop.f32.mrb[41].mxu0 }
0x13bb   :  { %v1794_v31 = vpop.f32.mrb[42].mxu0 }
0x13bc   :  { %v4935_v42 = vpack.c.bf16 %v1792_v55, %v1792_v55  ;;  %v1795_v32 = vadd.f32 %v3245_v53, %v1794_v31  ;;  %v3527_v21 = vpop.f32.mrb[43].mxu0 }
0x13be   :  { %v4937_v25 = vpack.c.bf16 %v1795_v32, %v1795_v32  ;;  %1804 = vrot.lane.b32.xlu1 %v4935_v42, %s4320_s5 }
0x13c0   :  { %1852 = vrot.lane.b32.xlu0 %v4937_v25, %s4320_s5 }
0x1430   :  { %v1805_v26 = vpop.permute.xlu1 %1804 }
0x1431   :  { %v1810_v57 = vsel %vm437_vm2, %v1805_v26, 0 }
0x1432   :  { %3529 = vmatpush3.bf16.xpose.msra.mxu0 %v1810_v57  ;;  %v1853_v58 = vpop.permute.xlu0 %1852 }
0x1433   :  { %v1858_v59 = vsel %vm437_vm2, %v1853_v58, 0  ;;  %3540 = vmatprep.subr.bf16.mxu0 %v4318_v15 }
0x1434   :  { %3535 = vmatpush3.bf16.xpose.msra.mxu1 %v1858_v59 }
0x1435   :  { %3546 = vmatprep.subr.bf16.mxu1 %v4318_v15 }
0x1439   :  { %3531 = vmatmul.mubr.msk.bf16.vlgmr.msra.gmra.mrb[44].mxu0 %vm437_vm2, %v4935_v42 }
0x143a   :  { %3542 = vmatprep.mubr.msk.bf16.mxu0 %vm4319_vm1, %v4318_v15 }
0x143b   :  { %3537 = vmatmul.mubr.msk.bf16.vlgmr.msra.gmra.mrb[40].mxu1 %vm437_vm2, %v4937_v25 }
0x143c   :  { %3548 = vmatprep.mubr.msk.bf16.mxu1 %vm4319_vm1, %v4318_v15 }
0x150c   :  { %v1846_v60 = vpop.f32.mrb[44].mxu0 }
0x150d   :  { %v1900_v61 = vmul.f32 0.35355338, %v1846_v60  ;;  %v3532_v62 = vpop.f32.mrb[45].mxu0 }
0x150e   :  { %v1849_v63 = vpop.f32.mrb[46].mxu0  ;;  %v1894_v0 = vpop.f32.mrb[40].mxu1 }
0x150f   :  { %v1901_v1 = vmul.f32 0.35355338, %v1894_v0  ;;  %v3533_v39 = vpop.f32.mrb[47].mxu0  ;;  %v3538_v2 = vpop.f32.mrb[41].mxu1  ;;  %v1902_v6 = vadd.f32 %v4955_v5, %v1900_v61 }
0x1510   :  { %v1897_v7 = vpop.f32.mrb[42].mxu1 }
0x1511   :  { %v3539_v8 = vpop.f32.mrb[43].mxu1  ;;  %v1904_v9 = vsel %vm437_vm2, %v1902_v6, -inf  ;;  %v1903_v11 = vadd.f32 %v4959_v10, %v1901_v1 }
0x1512   :  { %1905 = vmax.xlane.f32.xlu1 %v1904_v9 }
0x1513   :  { %v1907_v13 = vsel %vm437_vm2, %v1903_v11, -inf }
0x1514   :  { %1908 = vmax.xlane.f32.xlu0 %v1907_v13 }
0x1523   :  { %1928 = vrot.lane.b32.xlu1 %v4935_v42, %s4309_s25 }
0x159f   :  { %v1906_v14 = vpop.xlane.xlu1 %1905 }
0x15a0   :  { %v1910_v12 = vsub.f32 %v1902_v6, %v1906_v14 }
0x15a1   :  { %v1909_v16 = vpop.xlane.xlu0 %1908 }
0x15a2   :  { %v1912_v17 = vmul.f32 1.442695, %v1910_v12  ;;  %v1911_v18 = vsub.f32 %v1903_v11, %v1909_v16 }
0x15a3   :  { %v1929_v19 = vpop.permute.xlu1 %1928 }
0x15a4   :  { %3802 = vpow2.f32 %v1912_v17  ;;  %v1914_v20 = vmul.f32 1.442695, %v1911_v18  ;;  %v1934_v22 = vsel %vm565_vm3, %v1929_v19, 0 }
0x15a5   :  { %3541 = vmatpush3.bf16.msra.mxu0 %v1934_v22 }
0x15a6   :  { %3804 = vpow2.f32 %v1914_v20  ;;  %3552 = vmatprep.subr.bf16.mxu0 %v4318_v15 }
0x15ae   :  { %v3803_v23 = vpop.eup %3802 }
0x15af   :  { %v1916_v24 = vsel %vm437_vm2, %v3803_v23, 0.0 }
0x15b0   :  { %v3805_v27 = vpop.eup %3804  ;;  %1917 = vadd.xlane.f32.xlu1 %v1916_v24 }
0x15b1   :  { %v1919_v29 = vsel %vm437_vm2, %v3805_v27, 0.0 }
0x15b2   :  { %1920 = vadd.xlane.f32.xlu0 %v1919_v29 }
0x15c1   :  { %2026 = vrot.lane.b32.xlu1 %v4935_v42, %s4321_s12 }
0x15c5   :  { %2076 = vrot.lane.b32.xlu1 %v4937_v25, %s4321_s12 }
0x15c8   :  { %1976 = vrot.lane.b32.xlu0 %v4937_v25, %s4309_s25 }
0x15c9   :  { %2024 = vrot.lane.b32.xlu1 %v4935_v42, %s4322_s18 }
0x15cc   :  { %2074 = vrot.lane.b32.xlu0 %v4937_v25, %s4322_s18 }
0x163d   :  { %v1918_v30 = vpop.xlane.xlu1 %1917 }
0x163e   :  { %3806 = vrcp.f32 %v1918_v30 }
0x163f   :  { %v1921_v34 = vpop.xlane.xlu0 %1920 }
0x1640   :  { %3808 = vrcp.f32 %v1921_v34 }
0x1641   :  { %v2027_v4 = vpop.permute.xlu1 %2026 }
0x1642   :  { %v2032_v41 = vsel %vm437_vm2, %v2027_v4, 0 }
0x1643   :  { %v1977_v3 = vpop.permute.xlu0 %1976 }
0x1644   :  { %v1982_v35 = vsel %vm565_vm3, %v1977_v3, 0 }
0x1645   :  { %3547 = vmatpush3.bf16.msra.mxu1 %v1982_v35  ;;  %v2077_v40 = vpop.permute.xlu1 %2076 }
0x1646   :  { %3558 = vmatprep.subr.bf16.mxu1 %v4318_v15  ;;  %v2082_v44 = vsel %vm437_vm2, %v2077_v40, 0 }
0x1647   :  { %v2075_v46 = vpop.permute.xlu0 %2074 }
0x1648   :  { %v3807_v36 = vpop.eup %3806 }
0x1649   :  { %v1923_v33 = vmul.f32 %v3807_v36, %v3803_v23  ;;  %v2025_v45 = vpop.permute.xlu1 %2024 }
0x164a   :  { %v3809_v37 = vpop.eup %3808 }
0x164b   :  { %v1925_v38 = vmul.f32 %v3809_v37, %v3805_v27  ;;  %v1926_v28 = vpack.c.bf16 %v1923_v33, %v1923_v33 }
0x164d   :  { %3543 = vmatmul.mubr.msk.bf16.vlgmr.msra.gmra.mrb[48].mxu0 %vm437_vm2, %v1926_v28  ;;  %v1927_v43 = vpack.c.bf16 %v1925_v38, %v1925_v38 }
0x164e   :  { %3553 = vmatpush3.bf16.xpose.msra.mxu0 %v2032_v41  ;;  %3554 = vmatprep.mubr.msk.bf16.mxu0 %vm4319_vm1, %v4318_v15 }
0x164f   :  { %3549 = vmatmul.mubr.msk.bf16.vlgmr.msra.gmra.mrb[44].mxu1 %vm437_vm2, %v1927_v43  ;;  %3564 = vmatprep.subr.bf16.mxu0 %v4318_v15 }
0x1650   :  { %3559 = vmatpush3.bf16.xpose.msra.mxu1 %v2082_v44  ;;  %3560 = vmatprep.mubr.msk.bf16.mxu1 %vm4319_vm1, %v4318_v15 }
0x1651   :  { %3570 = vmatprep.subr.bf16.mxu1 %v4318_v15 }
0x1655   :  { %3555 = vmatmul.mubr.msk.bf16.vlgmr.msra.gmra.mrb[52].mxu0 %vm437_vm2, %v2025_v45 }
0x1656   :  { %3566 = vmatprep.mubr.msk.bf16.mxu0 %vm4319_vm1, %v4318_v15 }
0x1657   :  { %3561 = vmatmul.mubr.msk.bf16.vlgmr.msra.gmra.mrb[48].mxu1 %vm437_vm2, %v2075_v46 }
0x1658   :  { %3572 = vmatprep.mubr.msk.bf16.mxu1 %vm4319_vm1, %v4318_v15 }
0x1720   :  { %v4997_v47 = vpop.f32.mrb[48].mxu0 }
0x1721   :  { %v3544_v49 = vpop.f32.mrb[49].mxu0 }
0x1722   :  { %v1973_v48 = vpop.f32.mrb[50].mxu0  ;;  %v4999_v52 = vpop.f32.mrb[44].mxu1 }
0x1723   :  { %v3545_v53 = vpop.f32.mrb[51].mxu0  ;;  %v3550_v54 = vpop.f32.mrb[45].mxu1 }
0x1724   :  { %v2021_v55 = vpop.f32.mrb[46].mxu1 }
0x1725   :  { %v3551_v56 = vpop.f32.mrb[47].mxu1 }
0x1728   :  { %v2068_v31 = vpop.f32.mrb[52].mxu0 }
0x1729   :  { %v2124_v32 = vmul.f32 0.35355338, %v2068_v31  ;;  %v3556_v21 = vpop.f32.mrb[53].mxu0 }
0x172a   :  { %v2071_v26 = vpop.f32.mrb[54].mxu0  ;;  %v2118_v57 = vpop.f32.mrb[48].mxu1 }
0x172b   :  { %v2125_v58 = vmul.f32 0.35355338, %v2118_v57  ;;  %v3557_v59 = vpop.f32.mrb[55].mxu0  ;;  %v3562_v60 = vpop.f32.mrb[49].mxu1  ;;  %v2126_v61 = vadd.f32 %v4955_v5, %v2124_v32 }
0x172c   :  { %v2121_v62 = vpop.f32.mrb[50].mxu1 }
0x172d   :  { %v3563_v63 = vpop.f32.mrb[51].mxu1  ;;  %v2128_v0 = vsel %vm437_vm2, %v2126_v61, -inf  ;;  %v2127_v1 = vadd.f32 %v4959_v10, %v2125_v58 }
0x172e   :  { %2129 = vmax.xlane.f32.xlu1 %v2128_v0 }
0x172f   :  { %v2131_v39 = vsel %vm437_vm2, %v2127_v1, -inf }
0x1730   :  { %2132 = vmax.xlane.f32.xlu0 %v2131_v39 }
0x173f   :  { %2152 = vrot.lane.b32.xlu1 %v4935_v42, %s4323_s9 }
0x1743   :  { %2250 = vrot.lane.b32.xlu1 %v4935_v42, %s4324_s0 }
0x1747   :  { %2300 = vrot.lane.b32.xlu1 %v4937_v25, %s4324_s0 }
0x174b   :  { %2248 = vrot.lane.b32.xlu1 %v4935_v42, %s4325_s27 }
0x17bb   :  { %v2130_v2 = vpop.xlane.xlu1 %2129 }
0x17bc   :  { %v2134_v6 = vsub.f32 %v2126_v61, %v2130_v2 }
0x17bd   :  { %v2133_v7 = vpop.xlane.xlu0 %2132 }
0x17be   :  { %v2136_v8 = vmul.f32 1.442695, %v2134_v6  ;;  %v2135_v9 = vsub.f32 %v2127_v1, %v2133_v7 }
0x17bf   :  { %v2153_v11 = vpop.permute.xlu1 %2152 }
0x17c0   :  { %3810 = vpow2.f32 %v2136_v8  ;;  %v2138_v13 = vmul.f32 1.442695, %v2135_v9  ;;  %v2158_v14 = vsel %vm565_vm3, %v2153_v11, 0 }
0x17c1   :  { %3565 = vmatpush3.bf16.msra.mxu0 %v2158_v14 }
0x17c2   :  { %3812 = vpow2.f32 %v2138_v13  ;;  %3576 = vmatprep.subr.bf16.mxu0 %v4318_v15 }
0x17c3   :  { %v2251_v27 = vpop.permute.xlu1 %2250 }
0x17c4   :  { %v2256_v3 = vsel %vm437_vm2, %v2251_v27, 0 }
0x17c7   :  { %v2301_v4 = vpop.permute.xlu1 %2300 }
0x17c8   :  { %v2306_v33 = vsel %vm437_vm2, %v2301_v4, 0 }
0x17ca   :  { %v3811_v12 = vpop.eup %3810 }
0x17cb   :  { %v2140_v16 = vsel %vm437_vm2, %v3811_v12, 0.0  ;;  %v2249_v37 = vpop.permute.xlu1 %2248 }
0x17cc   :  { %v3813_v17 = vpop.eup %3812  ;;  %2141 = vadd.xlane.f32.xlu0 %v2140_v16 }
0x17cd   :  { %v2143_v18 = vsel %vm437_vm2, %v3813_v17, 0.0 }
0x17d0   :  { %2144 = vadd.xlane.f32.xlu0 %v2143_v18 }
0x17e6   :  { %2200 = vrot.lane.b32.xlu0 %v4937_v25, %s4323_s9 }
0x17ea   :  { %2298 = vrot.lane.b32.xlu0 %v4937_v25, %s4325_s27 }
0x1859   :  { %v2142_v19 = vpop.xlane.xlu0 %2141 }
0x185a   :  { %3814 = vrcp.f32 %v2142_v19 }
0x185d   :  { %v2145_v20 = vpop.xlane.xlu0 %2144 }
0x185e   :  { %3816 = vrcp.f32 %v2145_v20 }
0x1861   :  { %v2201_v22 = vpop.permute.xlu0 %2200 }
0x1862   :  { %v2206_v23 = vsel %vm565_vm3, %v2201_v22, 0 }
0x1863   :  { %3571 = vmatpush3.bf16.msra.mxu1 %v2206_v23 }
0x1864   :  { %v3815_v24 = vpop.eup %3814  ;;  %3582 = vmatprep.subr.bf16.mxu1 %v4318_v15 }
0x1865   :  { %v2147_v29 = vmul.f32 %v3815_v24, %v3811_v12  ;;  %v2299_v38 = vpop.permute.xlu0 %2298 }
0x1867   :  { %v2150_v30 = vpack.c.bf16 %v2147_v29, %v2147_v29 }
0x1868   :  { %v3817_v34 = vpop.eup %3816 }
0x1869   :  { %v2149_v35 = vmul.f32 %v3817_v34, %v3813_v17  ;;  %3567 = vmatmul.mubr.msk.bf16.vlgmr.msra.gmra.mrb[56].mxu0 %vm437_vm2, %v2150_v30 }
0x186a   :  { %3577 = vmatpush3.bf16.xpose.msra.mxu0 %v2256_v3  ;;  %3578 = vmatprep.mubr.msk.bf16.mxu0 %vm4319_vm1, %v4318_v15 }
0x186b   :  { %v2151_v36 = vpack.c.bf16 %v2149_v35, %v2149_v35  ;;  %3588 = vmatprep.subr.bf16.mxu0 %v4318_v15 }
0x186d   :  { %3573 = vmatmul.mubr.msk.bf16.vlgmr.msra.gmra.mrb[52].mxu1 %vm437_vm2, %v2151_v36 }
0x186e   :  { %3583 = vmatpush3.bf16.xpose.msra.mxu1 %v2306_v33  ;;  %3584 = vmatprep.mubr.msk.bf16.mxu1 %vm4319_vm1, %v4318_v15 }
0x186f   :  { %3594 = vmatprep.subr.bf16.mxu1 %v4318_v15 }
0x1871   :  { %3579 = vmatmul.mubr.msk.bf16.vlgmr.msra.gmra.mrb[60].mxu0 %vm437_vm2, %v2249_v37 }
0x1872   :  { %3590 = vmatprep.mubr.msk.bf16.mxu0 %vm4319_vm1, %v4318_v15 }
0x1875   :  { %3585 = vmatmul.mubr.msk.bf16.vlgmr.msra.gmra.mrb[56].mxu1 %vm437_vm2, %v2299_v38 }
0x1876   :  { %3596 = vmatprep.mubr.msk.bf16.mxu1 %vm4319_vm1, %v4318_v15 }
0x193c   :  { %v5039_v28 = vpop.f32.mrb[56].mxu0 }
0x193d   :  { %v3568_v40 = vpop.f32.mrb[57].mxu0 }
0x193e   :  { %v2197_v41 = vpop.f32.mrb[58].mxu0 }
0x193f   :  { %v3569_v43 = vpop.f32.mrb[59].mxu0 }
0x1940   :  { %v5041_v44 = vpop.f32.mrb[52].mxu1 }
0x1941   :  { %v3713_v45 = vpack.i.bf16 %v5041_v44, %v5039_v28  ;;  %v3574_v46 = vpop.f32.mrb[53].mxu1 }
0x1942   :  { %v2245_v49 = vpop.f32.mrb[54].mxu1 }
0x1943   :  { %v3575_v48 = vpop.f32.mrb[55].mxu1 }
0x1944   :  { %v2292_v53 = vpop.f32.mrb[60].mxu0 }
0x1945   :  { %v2348_v54 = vmul.f32 0.35355338, %v2292_v53  ;;  %v3580_v55 = vpop.f32.mrb[61].mxu0 }
0x1946   :  { %v2295_v56 = vpop.f32.mrb[62].mxu0 }
0x1947   :  { %v3581_v31 = vpop.f32.mrb[63].mxu0  ;;  %v2350_v32 = vadd.f32 %v4955_v5, %v2348_v54 }
0x1948   :  { %v2342_v21 = vpop.f32.mrb[56].mxu1 }
0x1949   :  { %v2349_v26 = vmul.f32 0.35355338, %v2342_v21  ;;  %v3586_v57 = vpop.f32.mrb[57].mxu1  ;;  %v2352_v58 = vsel %vm437_vm2, %v2350_v32, -inf }
0x194a   :  { %v2345_v59 = vpop.f32.mrb[58].mxu1  ;;  %2353 = vmax.xlane.f32.xlu1 %v2352_v58 }
0x194b   :  { %v3587_v60 = vpop.f32.mrb[59].mxu1  ;;  %v2351_v61 = vadd.f32 %v4959_v10, %v2349_v26 }
0x194d   :  { %v2355_v62 = vsel %vm437_vm2, %v2351_v61, -inf }
0x194e   :  { %2356 = vmax.xlane.f32.xlu0 %v2355_v62 }
0x195b   :  { %2376 = vrot.lane.b32.xlu1 %v4935_v42, %s4326_s20 }
0x195f   :  { %2474 = vrot.lane.b32.xlu1 %v4935_v42, %s4327_s30 }
0x1963   :  { %2524 = vrot.lane.b32.xlu1 %v4937_v25, %s4327_s30 }
0x1967   :  { %2472 = vrot.lane.b32.xlu1 %v4935_v42, %s4328_s7 }
0x19d7   :  { %v2354_v63 = vpop.xlane.xlu1 %2353 }
0x19d8   :  { %v2358_v0 = vsub.f32 %v2350_v32, %v2354_v63 }
0x19da   :  { %v2360_v1 = vmul.f32 1.442695, %v2358_v0 }
0x19db   :  { %v2357_v39 = vpop.xlane.xlu0 %2356  ;;  %v2377_v2 = vpop.permute.xlu1 %2376 }
0x19dc   :  { %3818 = vpow2.f32 %v2360_v1  ;;  %v2359_v6 = vsub.f32 %v2351_v61, %v2357_v39  ;;  %v2382_v7 = vsel %vm565_vm3, %v2377_v2, 0 }
0x19dd   :  { %3589 = vmatpush3.bf16.msra.mxu0 %v2382_v7 }
0x19de   :  { %v2362_v8 = vmul.f32 1.442695, %v2359_v6  ;;  %3600 = vmatprep.subr.bf16.mxu0 %v4318_v15 }
0x19df   :  { %v2475_v20 = vpop.permute.xlu1 %2474 }
0x19e0   :  { %3820 = vpow2.f32 %v2362_v8  ;;  %v2480_v27 = vsel %vm437_vm2, %v2475_v20, 0 }
0x19e3   :  { %v2525_v30 = vpop.permute.xlu1 %2524 }
0x19e4   :  { %v2530_v3 = vsel %vm437_vm2, %v2525_v30, 0 }
0x19e6   :  { %v3819_v9 = vpop.eup %3818 }
0x19e7   :  { %v2364_v11 = vsel %vm437_vm2, %v3819_v9, 0.0  ;;  %v2473_v35 = vpop.permute.xlu1 %2472 }
0x19e8   :  { %2365 = vadd.xlane.f32.xlu0 %v2364_v11 }
0x19ea   :  { %v3821_v13 = vpop.eup %3820 }
0x19eb   :  { %v2367_v14 = vsel %vm437_vm2, %v3821_v13, 0.0 }
0x19ec   :  { %2368 = vadd.xlane.f32.xlu0 %v2367_v14 }
0x1a02   :  { %2424 = vrot.lane.b32.xlu0 %v4937_v25, %s4326_s20 }
0x1a06   :  { %2522 = vrot.lane.b32.xlu0 %v4937_v25, %s4328_s7 }
0x1a75   :  { %v2366_v12 = vpop.xlane.xlu0 %2365 }
0x1a76   :  { %3822 = vrcp.f32 %v2366_v12 }
0x1a79   :  { %v2369_v16 = vpop.xlane.xlu0 %2368 }
0x1a7a   :  { %3824 = vrcp.f32 %v2369_v16 }
0x1a7d   :  { %v2425_v17 = vpop.permute.xlu0 %2424 }
0x1a7e   :  { %v2430_v18 = vsel %vm565_vm3, %v2425_v17, 0  ;;  %v3740_v17 = vld [vmem:[#allocation13 + $0x10] sm:$0xff]  }
0x1a7f   :  { %3595 = vmatpush3.bf16.msra.mxu1 %v2430_v18  ;;  %v3741_v18 = vld [vmem:[#allocation13 + $0x18] sm:$0xff]  }
0x1a80   :  { %v3823_v19 = vpop.eup %3822  ;;  %3606 = vmatprep.subr.bf16.mxu1 %v4318_v15 }
0x1a81   :  { %v2371_v22 = vmul.f32 %v3823_v19, %v3819_v9  ;;  %v2523_v4 = vpop.permute.xlu0 %2522 }
0x1a83   :  { %v2374_v23 = vpack.c.bf16 %v2371_v22, %v2371_v22 }
0x1a84   :  { %v3825_v24 = vpop.eup %3824 }
0x1a85   :  { %v2373_v29 = vmul.f32 %v3825_v24, %v3821_v13  ;;  %3591 = vmatmul.mubr.msk.bf16.vlgmr.msra.gmra.mrb[64].mxu0 %vm437_vm2, %v2374_v23 }
0x1a86   :  { %3601 = vmatpush3.bf16.xpose.msra.mxu0 %v2480_v27  ;;  %3602 = vmatprep.mubr.msk.bf16.mxu0 %vm4319_vm1, %v4318_v15 }
0x1a87   :  { %v2375_v34 = vpack.c.bf16 %v2373_v29, %v2373_v29  ;;  %3612 = vmatprep.subr.bf16.mxu0 %v4318_v15 }
0x1a89   :  { %3597 = vmatmul.mubr.msk.bf16.vlgmr.msra.gmra.mrb[60].mxu1 %vm437_vm2, %v2375_v34 }
0x1a8a   :  { %3607 = vmatpush3.bf16.xpose.msra.mxu1 %v2530_v3  ;;  %3608 = vmatprep.mubr.msk.bf16.mxu1 %vm4319_vm1, %v4318_v15 }
0x1a8b   :  { %3618 = vmatprep.subr.bf16.mxu1 %v4318_v15 }
0x1a8d   :  { %3603 = vmatmul.mubr.msk.bf16.vlgmr.msra.gmra.mrb[68].mxu0 %vm437_vm2, %v2473_v35 }
0x1a8e   :  { %3614 = vmatprep.mubr.msk.bf16.mxu0 %vm4319_vm1, %v4318_v15 }
0x1a91   :  { %3609 = vmatmul.mubr.msk.bf16.vlgmr.msra.gmra.mrb[64].mxu1 %vm437_vm2, %v2523_v4 }
0x1a92   :  { %3620 = vmatprep.mubr.msk.bf16.mxu1 %vm4319_vm1, %v4318_v15 }
0x1b58   :  { %v2418_v36 = vpop.f32.mrb[64].mxu0 }
0x1b59   :  { %v3592_v33 = vpop.f32.mrb[65].mxu0 }
0x1b5a   :  { %v2421_v37 = vpop.f32.mrb[66].mxu0 }
0x1b5b   :  { %v3593_v38 = vpop.f32.mrb[67].mxu0 }
0x1b5c   :  { %v2466_v40 = vpop.f32.mrb[60].mxu1 }
0x1b5d   :  { %v3718_v41 = vpack.i.bf16 %v2466_v40, %v2418_v36  ;;  %v3598_v43 = vpop.f32.mrb[61].mxu1 }
0x1b5e   :  { %v2469_v46 = vpop.f32.mrb[62].mxu1 }
0x1b5f   :  { %v3599_v49 = vpop.f32.mrb[63].mxu1 }
0x1b60   :  { %v2516_v48 = vpop.f32.mrb[68].mxu0 }
0x1b61   :  { %v2572_v53 = vmul.f32 0.35355338, %v2516_v48  ;;  %v3604_v54 = vpop.f32.mrb[69].mxu0 }
0x1b62   :  { %v2519_v55 = vpop.f32.mrb[70].mxu0 }
0x1b63   :  { %v3605_v56 = vpop.f32.mrb[71].mxu0  ;;  %v2574_v31 = vadd.f32 %v4955_v5, %v2572_v53 }
0x1b64   :  { %v2566_v32 = vpop.f32.mrb[64].mxu1 }
0x1b65   :  { %v2573_v21 = vmul.f32 0.35355338, %v2566_v32  ;;  %v3610_v26 = vpop.f32.mrb[65].mxu1  ;;  %v2576_v57 = vsel %vm437_vm2, %v2574_v31, -inf }
0x1b66   :  { %v2569_v58 = vpop.f32.mrb[66].mxu1  ;;  %2577 = vmax.xlane.f32.xlu1 %v2576_v57 }
0x1b67   :  { %v3611_v59 = vpop.f32.mrb[67].mxu1  ;;  %v2575_v60 = vadd.f32 %v4959_v10, %v2573_v21 }
0x1b69   :  { %v2579_v61 = vsel %vm437_vm2, %v2575_v60, -inf }
0x1b6a   :  { %2580 = vmax.xlane.f32.xlu0 %v2579_v61 }
0x1b77   :  { %2600 = vrot.lane.b32.xlu1 %v4935_v42, %s4329_s1 }
0x1b7b   :  { %3714 = vrot.lane.b32.xlu1 %v3713_v45, %s4306_s21 }
0x1b7f   :  { %3719 = vrot.lane.b32.xlu1 %v3718_v41, %s4295_s23  ;;  %s4331_s23 = smov [#allocation31]  }
0x1b80   :  { %s3183_s21 = sshll.u32 %s4331_s23, 4  ;;  %s3184_s21 = int_to_ptr.vmem [resolvable:$true] %s3183_s21 }
0x1b81   :  { %s4250_s25 = scalar_lea.vmem %s3184_s21, 32  ;;  %p4255_p5 = scmp.lt.s32.totalorder %s3184_s21, %s3184_s21 }
0x1b82   :  { %p4251_p4 = scmp.ne.s32.totalorder %s3184_s21, %s4250_s25  ;;  %p4256_p6 = scmp.lt.s32.totalorder %s4250_s25, %s4250_s25 }
0x1b84   :  { %p4257_p7 = por %p4256_p6, %p4255_p5 }
0x1b86   :  { %p4258_p8 = pnand %p4257_p7, %p4251_p4 }
0x1bf3   :  { %v2578_v5 = vpop.xlane.xlu1 %2577 }
0x1bf4   :  { %v2582_v62 = vsub.f32 %v2574_v31, %v2578_v5 }
0x1bf6   :  { %v2584_v63 = vmul.f32 1.442695, %v2582_v62 }
0x1bf7   :  { %v2581_v0 = vpop.xlane.xlu0 %2580  ;;  %v2601_v1 = vpop.permute.xlu1 %2600 }
0x1bf8   :  { %3826 = vpow2.f32 %v2584_v63  ;;  %v2583_v10 = vsub.f32 %v2575_v60, %v2581_v0  ;;  %v2606_v39 = vsel %vm565_vm3, %v2601_v1, 0 }
0x1bf9   :  { %3613 = vmatpush3.bf16.msra.mxu0 %v2606_v39 }
0x1bfa   :  { %v2586_v2 = vmul.f32 1.442695, %v2583_v10  ;;  %3624 = vmatprep.subr.bf16.mxu0 %v4318_v15 }
0x1bfb   :  { %v3715_v3 = vpop.permute.xlu1 %3714 }
0x1bfc   :  { %3828 = vpow2.f32 %v2586_v2  ;;  %v3717_v4 = vunpack.i.h.bf16 %v3715_v3  ;;  %v3716_v36 = vunpack.i.l.bf16 %v3715_v3 }
0x1bfe   :  { %v2721_v40 = vsel %vm437_vm2, %v4999_v52, %v3717_v4  ;;  %v2720_v41 = vsel %vm437_vm2, %v4997_v47, %v3716_v36  ;;  %v3267_v52 = vld [vmem:[#allocation14 + $0x1] ss:$0 sm:$0xff] }
0x1bff   :  { %v3720_v35 = vpop.permute.xlu1 %3719 }
0x1c00   :  { %v3722_v33 = vunpack.i.h.bf16 %v3720_v35  ;;  %v3721_v37 = vunpack.i.l.bf16 %v3720_v35 }
0x1c02   :  { %v3827_v42 = vpop.eup %3826  ;;  %v2722_v49 = vsel %vm1355_vm4, %v2720_v41, %v3721_v37  ;;  %v2723_v48 = vsel %vm1355_vm4, %v2721_v40, %v3722_v33 }
0x1c03   :  { %v2588_v28 = vsel %vm437_vm2, %v3827_v42, 0.0 }
0x1c04   :  { %2589 = vadd.xlane.f32.xlu0 %v2588_v28 }
0x1c06   :  { %v3829_v44 = vpop.eup %3828 }
0x1c07   :  { %v2591_v45 = vsel %vm437_vm2, %v3829_v44, 0.0 }
0x1c08   :  { %2592 = vadd.xlane.f32.xlu0 %v2591_v45 }
0x1c1e   :  { %2648 = vrot.lane.b32.xlu0 %v4937_v25, %s4329_s1 }
0x1c91   :  { %v2590_v6 = vpop.xlane.xlu0 %2589 }
0x1c92   :  { %3830 = vrcp.f32 %v2590_v6 }
0x1c95   :  { %v2593_v7 = vpop.xlane.xlu0 %2592 }
0x1c96   :  { %3832 = vrcp.f32 %v2593_v7 }
0x1c99   :  { %v2649_v8 = vpop.permute.xlu0 %2648 }
0x1c9a   :  { %v2654_v9 = vsel %vm565_vm3, %v2649_v8, 0 }
0x1c9b   :  { %3619 = vmatpush3.bf16.msra.mxu1 %v2654_v9 }
0x1c9c   :  { %v3831_v11 = vpop.eup %3830  ;;  %3632 = vmatprep.subr.bf16.mxu1 %v4318_v15 }
0x1c9d   :  { %v2595_v13 = vmul.f32 %v3831_v11, %v3827_v42  ;;  %v3742_v42 = vld [vmem:[#allocation19 + $0x10] sm:$0xff]  }
0x1c9f   :  { %v2598_v14 = vpack.c.bf16 %v2595_v13, %v2595_v13  ;;  %v3271_v13 = vld [vmem:[#allocation16 + $0x1] ss:$0 sm:$0xff] }
0x1ca0   :  { %v3833_v12 = vpop.eup %3832 }
0x1ca1   :  { %v2597_v16 = vmul.f32 %v3833_v12, %v3829_v44  ;;  %3615 = vmatmul.mubr.msk.bf16.vlgmr.msra.gmra.mrb[72].mxu0 %vm437_vm2, %v2598_v14 }
0x1ca2   :  { %3628 = vmatprep.mubr.msk.bf16.mxu0 %vm4319_vm1, %v4318_v15  ;;  %3625 = vmatpush3.bf16.msra.mxu0 %v3740_v17 }
0x1ca3   :  { %v2599_v25 = vpack.c.bf16 %v2597_v16, %v2597_v16  ;;  %3626 = vmatprep.subr.bf16.mxu0 %v4318_v15 }
0x1ca5   :  { %3621 = vmatmul.mubr.msk.bf16.vlgmr.msra.gmra.mrb[68].mxu1 %vm437_vm2, %v2599_v25  ;;  %v3272_v25 = vld [vmem:[#allocation17 + $0x1] ss:$0 sm:$0xff] }
0x1ca6   :  { %3636 = vmatprep.mubr.msk.bf16.mxu1 %vm4319_vm1, %v4318_v15  ;;  %3627 = vmatpush3.bf16.msra.mxu0 %v3741_v18 }
0x1ca7   :  { %3640 = vmatprep.subr.bf16.mxu0 %v4318_v15  ;;  %3633 = vmatpush3.bf16.msra.mxu1 %v3742_v42 }
0x1ca8   :  { %3634 = vmatprep.subr.bf16.mxu1 %v4318_v15 }
0x1d74   :  { %v2642_v19 = vpop.f32.mrb[72].mxu0 }
0x1d75   :  { %v3616_v20 = vpop.f32.mrb[73].mxu0 }
0x1d76   :  { %v2645_v22 = vpop.f32.mrb[74].mxu0 }
0x1d77   :  { %v3617_v23 = vpop.f32.mrb[75].mxu0  ;;  %v3744_v22 = vld [vmem:[#allocation22 + $0x20] sm:$0xff]  }
0x1d78   :  { %v2690_v24 = vpop.f32.mrb[68].mxu1  ;;  %v3745_v23 = vld [vmem:[#allocation22 + $0x28] sm:$0xff]  }
0x1d79   :  { %v3723_v27 = vpack.i.bf16 %v2690_v24, %v2642_v19  ;;  %v3622_v29 = vpop.f32.mrb[69].mxu1  ;;  %v3746_v24 = vld [vmem:[#allocation22 + $0x30] sm:$0xff]  }
0x1d7a   :  { %v2693_v30 = vpop.f32.mrb[70].mxu1  ;;  %v3273_v29 = vld [vmem:[#allocation20 + $0x1] ss:$0 sm:$0xff] }
0x1d7b   :  { %v3623_v34 = vpop.f32.mrb[71].mxu1  ;;  %3724 = vrot.lane.b32.xlu1 %v3723_v27, %s4330_s6  ;;  %v3747_v27 = vld [vmem:[#allocation22 + $0x38] sm:$0xff]  }
0x1ded   :  { %v3725_v38 = vpop.permute.xlu1 %3724 }
0x1dee   :  { %v3727_v43 = vunpack.i.h.bf16 %v3725_v38  ;;  %v3726_v46 = vunpack.i.l.bf16 %v3725_v38 }
0x1df0   :  { %v2725_v53 = vsel %vm1358_vm5, %v2723_v48, %v3727_v43  ;;  %v2724_v54 = vsel %vm1358_vm5, %v2722_v49, %v3726_v46 }
0x1df1   :  { %v2726_v55 = vpack.c.bf16 %v2725_v53, %v2724_v54 }
0x1df3   :  { %3629 = vmatmul.mubr.msk.bf16.vlgmr.msra.gmra.mrb[76].mxu0 %vm303_vm0, %v2726_v55 }
0x1df4   :  { %3648 = vmatprep.mubr.msk.bf16.mxu0 %vm4319_vm1, %v4318_v15  ;;  %3641 = vmatpush3.bf16.msra.mxu0 %v3744_v22 }
0x1df5   :  { %3642 = vmatprep.subr.bf16.mxu0 %v4318_v15 }
0x1df8   :  { %3643 = vmatpush3.bf16.msra.mxu0 %v3745_v23  ;;  %v3277_v23 = vld [vmem:[#allocation23 + $0x1] ss:$0 sm:$0xff] }
0x1df9   :  { %3644 = vmatprep.subr.bf16.mxu0 %v4318_v15 }
0x1dfc   :  { %3645 = vmatpush3.bf16.msra.mxu0 %v3746_v24 }
0x1dfd   :  { %3646 = vmatprep.subr.bf16.mxu0 %v4318_v15 }
0x1e00   :  { %3647 = vmatpush3.bf16.msra.mxu0 %v3747_v27 }
0x1ec6   :  { %v2789_v56 = vpop.f32.mrb[76].mxu0 }
0x1ec7   :  { %v2790_v31 = vadd.f32 %v3267_v52, %v2789_v56  ;;  %v3630_v47 = vpop.f32.mrb[77].mxu0 }
0x1ec8   :  { %v2792_v32 = vpop.f32.mrb[78].mxu0 }
0x1ec9   :  { %v2793_v21 = vadd.f32 %v3267_v52, %v2792_v32  ;;  %v3631_v26 = vpop.f32.mrb[79].mxu0  ;;  %v2796_v57 = vadd.f32 %v2790_v31, %v4926_v50 }
0x1ecb   :  { %v2802_v58 = vsel %vm303_vm0, %v2796_v57, 0.0  ;;  %v2797_v59 = vadd.f32 %v2793_v21, %v4928_v51  ;;  %v3743_v51 = vld [vmem:[#allocation19 + $0x18] sm:$0xff]  }
0x1ecc   :  { %2803 = vadd.xlane.f32.xlu0 %v2802_v58  ;;  %3635 = vmatpush3.bf16.msra.mxu1 %v3743_v51 }
0x1ecd   :  { %v2805_v60 = vsel %vm303_vm0, %v2797_v59, 0.0  ;;  %3652 = vmatprep.subr.bf16.mxu1 %v4318_v15 }
0x1ece   :  { %2806 = vadd.xlane.f32.xlu1 %v2805_v60 }
0x1f59   :  { %v2804_v61 = vpop.xlane.xlu0 %2803 }
0x1f5a   :  { %v2808_v5 = vmul.f32 0.03125, %v2804_v61 }
0x1f5b   :  { %v2807_v62 = vpop.xlane.xlu1 %2806 }
0x1f5c   :  { %v2810_v63 = vsub.f32 %v2796_v57, %v2808_v5  ;;  %v2809_v0 = vmul.f32 0.03125, %v2807_v62 }
0x1f5e   :  { %v2811_v1 = vsub.f32 %v2797_v59, %v2809_v0  ;;  %v2812_v10 = vmul.f32 %v2810_v63, %v2810_v63 }
0x1f60   :  { %v2814_v39 = vsel %vm303_vm0, %v2812_v10, 0.0  ;;  %v2813_v2 = vmul.f32 %v2811_v1, %v2811_v1 }
0x1f61   :  { %2815 = vadd.xlane.f32.xlu0 %v2814_v39 }
0x1f62   :  { %v2817_v50 = vsel %vm303_vm0, %v2813_v2, 0.0 }
0x1f65   :  { %2818 = vadd.xlane.f32.xlu0 %v2817_v50 }
0x1fee   :  { %v2816_v28 = vpop.xlane.xlu0 %2815 }
0x1fef   :  { %v2820_v44 = vmul.f32 0.03125, %v2816_v28 }
0x1ff1   :  { %v2822_v45 = vadd.f32 1e-12, %v2820_v44 }
0x1ff2   :  { %v2819_v6 = vpop.xlane.xlu0 %2818 }
0x1ff3   :  { %3834 = vrsqrt.f32 %v2822_v45  ;;  %v2821_v7 = vmul.f32 0.03125, %v2819_v6 }
0x1ff5   :  { %v2823_v8 = vadd.f32 1e-12, %v2821_v7 }
0x1ff7   :  { %3836 = vrsqrt.f32 %v2823_v8 }
0x1ffd   :  { %v3835_v9 = vpop.eup %3834 }
0x1ffe   :  { %v2826_v11 = vmul.f32 %v3835_v9, %v2810_v63 }
0x2000   :  { %v2834_v12 = vmul.f32 %v3271_v13, %v2826_v11 }
0x2001   :  { %v3837_v14 = vpop.eup %3836 }
0x2002   :  { %v2827_v16 = vmul.f32 %v3837_v14, %v2811_v1  ;;  %v5130_v18 = vadd.f32 %v3272_v25, %v2834_v12 }
0x2004   :  { %v2835_v17 = vmul.f32 %v3271_v13, %v2827_v16 }
0x2006   :  { %v5132_v19 = vadd.f32 %v3272_v25, %v2835_v17 }
0x2008   :  { %v2844_v20 = vpack.c.bf16 %v5132_v19, %v5130_v18 }
0x200a   :  { %3637 = vmatmul.mubr.msk.bf16.vlgmr.msra.gmra.mrb[72].mxu1 %vm303_vm0, %v2844_v20 }
0x200b   :  { %3656 = vmatprep.mubr.msk.bf16.mxu1 %vm4319_vm1, %v4318_v15 }
0x20dd   :  { %v2907_v30 = vpop.f32.mrb[72].mxu1 }
0x20de   :  { %v2908_v34 = vadd.f32 %v3273_v29, %v2907_v30  ;;  %v3638_v3 = vpop.f32.mrb[73].mxu1 }
0x20df   :  { %v2910_v35 = vpop.f32.mrb[74].mxu1 }
0x20e0   :  { %v2916_v4 = vmul.f32 0.70710677, %v2908_v34  ;;  %v2911_v36 = vadd.f32 %v3273_v29, %v2910_v35  ;;  %v3639_v33 = vpop.f32.mrb[75].mxu1  ;;  %v2914_v12 = vmul.f32 0.5, %v2908_v34 }
0x20e2   :  { %v2918_v37 = vand.u32 2147483647, %v2916_v4  ;;  %v2917_v38 = vmul.f32 0.70710677, %v2911_v36  ;;  %vm2958_vm9 = vcmp.ge.f32.partialorder %v2916_v4, 0.0  ;;  %v2915_v16 = vmul.f32 0.5, %v2911_v36 }
0x20e4   :  { %v2920_v40 = vmul.f32 0.3275911, %v2918_v37  ;;  %v2919_v41 = vand.u32 2147483647, %v2917_v38  ;;  %v2946_v48 = vmul.f32 %v2918_v37, %v2918_v37  ;;  %vm2959_vm10 = vcmp.ge.f32.partialorder %v2917_v38, 0.0 }
0x20e6   :  { %v2922_v43 = vadd.f32 1.0, %v2920_v40  ;;  %v2921_v46 = vmul.f32 0.3275911, %v2919_v41  ;;  %v2947_v53 = vmul.f32 %v2919_v41, %v2919_v41  ;;  %v2948_v55 = vsub.f32 0.0, %v2946_v48 }
0x20e8   :  { %3838 = vrcp.f32 %v2922_v43  ;;  %v2923_v49 = vadd.f32 1.0, %v2921_v46  ;;  %v2949_v47 = vsub.f32 0.0, %v2947_v53  ;;  %v2950_v32 = vmul.f32 1.442695, %v2948_v55 }
0x20ea   :  { %3840 = vrcp.f32 %v2923_v49  ;;  %v2952_v59 = vmul.f32 1.442695, %v2949_v47 }
0x20eb   :  { %3842 = vpow2.f32 %v2950_v32 }
0x20ec   :  { %3844 = vpow2.f32 %v2952_v59 }
0x20f2   :  { %v3839_v54 = vpop.eup %3838 }
0x20f3   :  { %v2928_v52 = vmul.f32 1.0614054, %v3839_v54 }
0x20f4   :  { %v3841_v56 = vpop.eup %3840 }
0x20f5   :  { %v2930_v31 = vadd.f32 -1.4531521, %v2928_v52  ;;  %v2929_v21 = vmul.f32 1.0614054, %v3841_v56  ;;  %v3843_v50 = vpop.eup %3842 }
0x20f6   :  { %v3845_v44 = vpop.eup %3844 }
0x20f7   :  { %v2932_v26 = vmul.f32 %v3839_v54, %v2930_v31  ;;  %v2931_v57 = vadd.f32 -1.4531521, %v2929_v21 }
0x20f9   :  { %v2934_v58 = vadd.f32 1.4214138, %v2932_v26  ;;  %v2933_v60 = vmul.f32 %v3841_v56, %v2931_v57 }
0x20fb   :  { %v2936_v61 = vmul.f32 %v3839_v54, %v2934_v58  ;;  %v2935_v5 = vadd.f32 1.4214138, %v2933_v60  ;;  %v3283_v58 = vld [vmem:[#allocation25 + $0x1] ss:$0 sm:$0xff] }
0x20fd   :  { %v2938_v62 = vadd.f32 -0.28449672, %v2936_v61  ;;  %v2937_v63 = vmul.f32 %v3841_v56, %v2935_v5  ;;  %v3284_v5 = vld [vmem:[#allocation26 + $0x1] ss:$0 sm:$0xff] }
0x20ff   :  { %v2940_v0 = vmul.f32 %v3839_v54, %v2938_v62  ;;  %v2939_v1 = vadd.f32 -0.28449672, %v2937_v63 }
0x2101   :  { %v2942_v10 = vadd.f32 0.2548296, %v2940_v0  ;;  %v2941_v39 = vmul.f32 %v3841_v56, %v2939_v1 }
0x2103   :  { %v2944_v2 = vmul.f32 %v3839_v54, %v2942_v10  ;;  %v2943_v42 = vadd.f32 0.2548296, %v2941_v39  ;;  %v3749_v54 = vld [vmem:[#allocation28 + $0x8] sm:$0xff]   ;;  %v3285_v10 = vld [vmem:[#allocation29] ss:$0 sm:$0xff] }
0x2105   :  { %v2954_v51 = vmul.f32 %v3843_v50, %v2944_v2  ;;  %v2945_v28 = vmul.f32 %v3841_v56, %v2943_v42 }
0x2107   :  { %v2956_v45 = vsub.f32 1.0, %v2954_v51  ;;  %v2955_v6 = vmul.f32 %v3845_v44, %v2945_v28 }
0x2109   :  { %v2960_v7 = vsub.f32 0.0, %v2956_v45  ;;  %v2957_v8 = vsub.f32 1.0, %v2955_v6 }
0x210b   :  { %v2962_v9 = vsel %vm2958_vm9, %v2956_v45, %v2960_v7  ;;  %v2961_v11 = vsub.f32 0.0, %v2957_v8 }
0x210c   :  { %v2964_v13 = vadd.f32 1.0, %v2962_v9 }
0x210d   :  { %v2963_v14 = vsel %vm2959_vm10, %v2957_v8, %v2961_v11 }
0x210e   :  { %v2965_v25 = vadd.f32 1.0, %v2963_v14  ;;  %v2966_v17 = vmul.f32 %v2964_v13, %v2914_v12 }
0x2110   :  { %v2967_v20 = vmul.f32 %v2965_v25, %v2915_v16 }
0x2112   :  { %v2968_v22 = vpack.c.bf16 %v2967_v20, %v2966_v17 }
0x2114   :  { %3649 = vmatmul.mubr.msk.bf16.vlgmr.msra.gmra.mrb[80].mxu0 %vm1637_vm8, %v2968_v22 }
0x21e7   :  { %v3047_v24 = vpop.f32.mrb[80].mxu0 }
0x21e8   :  { %v3048_v27 = vadd.f32 %v3277_v23, %v3047_v24  ;;  %v3650_v29 = vpop.f32.mrb[81].mxu0 }
0x21e9   :  { %v3050_v30 = vpop.f32.mrb[82].mxu0 }
0x21ea   :  { %v3054_v3 = vadd.f32 %v3048_v27, %v5130_v18  ;;  %v3051_v35 = vadd.f32 %v3277_v23, %v3050_v30  ;;  %v3651_v4 = vpop.f32.mrb[83].mxu0 }
0x21ec   :  { %v3055_v33 = vadd.f32 %v3051_v35, %v5132_v19  ;;  %v3060_v34 = vsel %vm303_vm0, %v3054_v3, 0.0  ;;  %v3748_v19 = vld [vmem:[#allocation28] sm:$0xff]  }
0x21ed   :  { %3061 = vadd.xlane.f32.xlu1 %v3060_v34  ;;  %3653 = vmatpush3.bf16.msra.mxu1 %v3748_v19 }
0x21ee   :  { %v3063_v36 = vsel %vm303_vm0, %v3055_v33, 0.0  ;;  %3654 = vmatprep.subr.bf16.mxu1 %v4318_v15 }
0x21ef   :  { %3064 = vadd.xlane.f32.xlu0 %v3063_v36 }
0x21f1   :  { %3655 = vmatpush3.bf16.msra.mxu1 %v3749_v54 }
0x227a   :  { %v3062_v37 = vpop.xlane.xlu1 %3061 }
0x227b   :  { %v3066_v38 = vmul.f32 0.03125, %v3062_v37 }
0x227c   :  { %v3065_v40 = vpop.xlane.xlu0 %3064 }
0x227d   :  { %v3068_v41 = vsub.f32 %v3054_v3, %v3066_v38  ;;  %v3067_v43 = vmul.f32 0.03125, %v3065_v40 }
0x227f   :  { %v3069_v46 = vsub.f32 %v3055_v33, %v3067_v43  ;;  %v3070_v49 = vmul.f32 %v3068_v41, %v3068_v41 }
0x2281   :  { %v3072_v48 = vsel %vm303_vm0, %v3070_v49, 0.0  ;;  %v3071_v18 = vmul.f32 %v3069_v46, %v3069_v46 }
0x2282   :  { %3073 = vadd.xlane.f32.xlu1 %v3072_v48 }
0x2283   :  { %v3075_v53 = vsel %vm303_vm0, %v3071_v18, 0.0 }
0x2284   :  { %3076 = vadd.xlane.f32.xlu0 %v3075_v53 }
0x230f   :  { %v3074_v55 = vpop.xlane.xlu1 %3073 }
0x2310   :  { %v3078_v52 = vmul.f32 0.03125, %v3074_v55 }
0x2311   :  { %v3077_v56 = vpop.xlane.xlu0 %3076 }
0x2312   :  { %v3080_v31 = vadd.f32 1e-12, %v3078_v52  ;;  %v3079_v47 = vmul.f32 0.03125, %v3077_v56 }
0x2314   :  { %3846 = vrsqrt.f32 %v3080_v31  ;;  %v3081_v32 = vadd.f32 1e-12, %v3079_v47 }
0x2316   :  { %3848 = vrsqrt.f32 %v3081_v32 }
0x231e   :  { %v3847_v21 = vpop.eup %3846 }
0x231f   :  { %v3084_v26 = vmul.f32 %v3847_v21, %v3068_v41 }
0x2320   :  { %v3849_v57 = vpop.eup %3848 }
0x2321   :  { %v3085_v59 = vmul.f32 %v3849_v57, %v3069_v46  ;;  %v3092_v60 = vmul.f32 %v3283_v58, %v3084_v26 }
0x2323   :  { %v3093_v61 = vmul.f32 %v3283_v58, %v3085_v59  ;;  %v3100_v15 = vadd.f32 %v3284_v5, %v3092_v60 }
0x2325   :  { %v3101_v62 = vadd.f32 %v3284_v5, %v3093_v61 }
0x2327   :  { %v3103_v63 = vrot.slane %v3101_v62, 7 }
0x2329   :  { %v3106_v0 = vsel %vm3105_vm11, %v3100_v15, %v3103_v63 }
0x232a   :  { %v3107_v1 = vpack.c.bf16 %v3106_v0, %v3106_v0 }
0x232c   :  { %3657 = vmatmul.mubr.msk.bf16.vlgmr.msra.gmra.mrb[76].mxu1 %vm303_vm0, %v3107_v1 }
0x23ff   :  { %v3168_v39 = vpop.f32.mrb[76].mxu1 }
0x2400   :  { %v3169_v2 = vadd.f32 %v3285_v10, %v3168_v39  ;;  %v3658_v50 = vpop.f32.mrb[77].mxu1 }
0x2401   :  { %v3171_v42 = vpop.f32.mrb[78].mxu1 }
0x2402   :  { %3850 = vtanh.f32 %v3169_v2  ;;  %v3659_v51 = vpop.f32.mrb[79].mxu1 }
0x240c   :  { %v3851_v28 = vpop.eup %3850 }
0x240d   :  { %3176 = vst.msk [vmem:[#allocation31] sm:$0x3] %vm3175_vm12, %v3851_v28 }
0x240e   :  { %4261 = shalt.err (!%p4258_p8)
}
0x240f   :  { %s5196_s24 = sld [smem:[#allocation47_spill]] }
0x2415   :  { %s4262_s10 = scalar_lea.hbm %s5196_s24, 32 }
0x2416   :  { %p4263_p9 = scmp.ne.s32.totalorder %s5196_s24, %s4262_s10  ;;  %p4266_p10 = scmp.lt.u32.totalorder %s4262_s10, %s5196_s24 }
0x2418   :  { %p4268_p11 = pnand %p4266_p10, %p4263_p9 }
0x241a   :  { %4271 = shalt.err (!%p4268_p11)
}
0x241b   :  { %3186 = dma.vmem_to_hbm [thread:$0]  %s3184_s21, 32, %s5196_s24, [#allocation4]  }
0x241c   :  { %4292 = dma.done.wait [#allocation4], 32  }
0x241d   :  { %4293 = vsyncadd [#allocation4], 4294967264 }
0x241e   :  { %3190 = vsyncpa [#allocation3], 1 }
0x241f   :  { %3191 = vsyncpa [#allocation6], 1 }
0x2420   :  { %3192 = vsyncpa [#allocation9], 1 }
0x2421   :  { %3193 = vsyncpa [#allocation12], 1 }
0x2422   :  { %3194 = vsyncpa [#allocation15], 1 }
0x2423   :  { %3195 = vsyncpa [#allocation18], 1 }
0x2424   :  { %3196 = vsyncpa [#allocation21], 1 }
0x2425   :  { %3197 = vsyncpa [#allocation24], 1 }
0x2426   :  { %3198 = vsyncpa [#allocation27], 1 }
0x2427   :  { %3199 = vsyncpa [#allocation30], 1 }
0x2428   :  { %3200 = vsyncpa [#allocation4], 1 }

</bundles_post_ra>
